<compile_context>
chip_gen: v6e
topology: v6e:2x2x1
jax: 0.10.0
libtpu: 0.0.40
codegen_flags: <defaults>
</compile_context>

<pallas_src>
import jax
import jax.numpy as jnp
from jax import lax
from jax.experimental import pallas as pl
from jax.experimental.pallas import tpu as pltpu

LANE = 128


# ------------------------------ fused kernel ------------------------------- #

def _make_disblock_kernel(H, W, Cin, Cp, P):
    HW = H * W
    H2, W2 = H // 2, W // 2

    def conv3x3(pad_ref, w_ref, left_ok, right_ok):
        """3x3 'same' conv as 9 accumulating dots on shifted views of a padded buffer.

        pad_ref: (HW + 2P, C) f32, rows [P, P+HW) hold the activation, pads are 0.
        w_ref  : (9, C, Cp) bf16, tap index k = kh*3 + kw.
        """
        acc = None
        for kh in range(3):
            for kw in range(3):
                dy, dx = kh - 1, kw - 1
                tap = pad_ref[pl.ds(P + dy * W + dx, HW), :]          # (HW, C) f32
                if dx > 0:                       # reading next row's col 0 -> mask
                    tap = jnp.where(right_ok, tap, 0.0)
                elif dx < 0:                     # reading prev row's col W-1 -> mask
                    tap = jnp.where(left_ok, tap, 0.0)
                part = jnp.dot(tap.astype(jnp.bfloat16), w_ref[kh * 3 + kw],
                               preferred_element_type=jnp.float32)
                acc = part if acc is None else acc + part
        return acc                                                     # (HW, Cp) f32

    def pool2x2(ref, off, C):
        """2x2 average pool of the (HW, C) f32 slab stored at ref[off : off+HW]."""
        a = ref[pl.ds(off, HW // 2, 2), :]          # even flat pixels
        b = ref[pl.ds(off + 1, HW // 2, 2), :]      # odd flat pixels
        cs = (a + b).reshape(H2, 2, W2, C)          # horizontal pair sums, row-split
        return (cs[:, 0] + cs[:, 1]).reshape(H2 * W2, C) * 0.25

    def kernel(x_ref, w1_ref, b1_ref, w2_ref, b2_ref, wsc_ref, bsc_ref,
               o_ref, pad_in, pad_mid):
        col = lax.broadcasted_iota(jnp.int32, (HW, 1), 0) % W
        left_ok = col >= 1
        right_ok = col < (W - 1)

        # ---- stage x into the zero-padded staging buffer --------------------
        pad_in[...] = jnp.zeros((HW + 2 * P, Cin), jnp.float32)
        pad_in[pl.ds(P, HW), :] = x_ref[0].astype(jnp.float32)

        # ---- h1 = relu(conv1(x) + b1) -- stays in VMEM -----------------------
        h1 = conv3x3(pad_in, w1_ref, left_ok, right_ok) + b1_ref[...]
        h1 = jnp.maximum(h1, 0.0)

        pad_mid[...] = jnp.zeros((HW + 2 * P, Cp), jnp.float32)
        pad_mid[pl.ds(P, HW), :] = h1

        # ---- h2 = conv2(h1) + b2 ---------------------------------------------
        h2 = conv3x3(pad_mid, w2_ref, left_ok, right_ok) + b2_ref[...]

        # ---- residual = avgpool2(h2) on the VPU ------------------------------
        pad_mid[pl.ds(0, HW), :] = h2
        res = pool2x2(pad_mid, 0, Cp)

        # ---- shortcut = conv1x1(avgpool2(x)) (pool first, then tiny matmul) --
        xs = pool2x2(pad_in, P, Cin)
        sc = jnp.dot(xs.astype(jnp.bfloat16), wsc_ref[...],
                     preferred_element_type=jnp.float32) + bsc_ref[...]

        o_ref[0] = (res + sc).astype(o_ref.dtype)

    return kernel


# ------------------------------- JAX wrapper -------------------------------- #

@jax.jit
def disblock_forward(x_nchw, params):
    w1, b1 = params["w1"], params["b1"]
    w2, b2 = params["w2"], params["b2"]
    wsc, bsc = params["wsc"], params["bsc"]

    N, Cin, H, W = x_nchw.shape
    Cout = w1.shape[0]
    H2, W2 = H // 2, W // 2
    HW = H * W
    # Pooling compaction assumes W//2 is a multiple of the 8-sublane tile.
    assert H % 2 == 0 and W % 16 == 0, "kernel assumes H even and W % 16 == 0"

    Cp = ((Cout + LANE - 1) // LANE) * LANE       # lane-dense output channels
    P = ((W + 1 + 7) // 8) * 8                    # 8-aligned halo rows (>= W+1)

    # NHWC, channels on lanes; activations shipped to the kernel in bf16.
    xf = jnp.transpose(x_nchw, (0, 2, 3, 1)).reshape(N, HW, Cin).astype(jnp.bfloat16)

    def pad_last(a):
        cfg = [(0, 0)] * (a.ndim - 1) + [(0, Cp - Cout)]
        return jnp.pad(a, cfg)

    # PyTorch OIHW -> (kh*3+kw, in, out); out-channel dim zero-padded to Cp.
    w1f = pad_last(jnp.transpose(w1, (2, 3, 1, 0)).reshape(9, Cin, Cout)).astype(jnp.bfloat16)
    w2f = jnp.pad(jnp.transpose(w2, (2, 3, 1, 0)).reshape(9, Cout, Cout),
                  ((0, 0), (0, Cp - Cout), (0, Cp - Cout))).astype(jnp.bfloat16)
    wscf = pad_last(jnp.transpose(wsc[:, :, 0, 0], (1, 0))).astype(jnp.bfloat16)
    b1f = pad_last(b1.reshape(1, Cout)).astype(jnp.float32)
    b2f = pad_last(b2.reshape(1, Cout)).astype(jnp.float32)
    bscf = pad_last(bsc.reshape(1, Cout)).astype(jnp.float32)

    kernel = _make_disblock_kernel(H, W, Cin, Cp, P)

    out = pl.pallas_call(
        kernel,
        out_shape=jax.ShapeDtypeStruct((N, H2 * W2, Cp), jnp.float32),
        grid_spec=pltpu.PrefetchScalarGridSpec(
            num_scalar_prefetch=0,
            grid=(N,),
            in_specs=[
                pl.BlockSpec((1, HW, Cin), lambda n: (n, 0, 0)),     # x (per image)
                pl.BlockSpec((9, Cin, Cp), lambda n: (0, 0, 0)),     # w1 (resident)
                pl.BlockSpec((1, Cp), lambda n: (0, 0)),             # b1
                pl.BlockSpec((9, Cp, Cp), lambda n: (0, 0, 0)),      # w2
                pl.BlockSpec((1, Cp), lambda n: (0, 0)),             # b2
                pl.BlockSpec((Cin, Cp), lambda n: (0, 0)),           # w_sc
                pl.BlockSpec((1, Cp), lambda n: (0, 0)),             # b_sc
            ],
            out_specs=pl.BlockSpec((1, H2 * W2, Cp), lambda n: (n, 0, 0)),
            scratch_shapes=[
                pltpu.VMEM((HW + 2 * P, Cin), jnp.float32),          # padded x
                pltpu.VMEM((HW + 2 * P, Cp), jnp.float32),           # padded h1 / h2
            ],
        ),
        compiler_params=pltpu.CompilerParams(
            dimension_semantics=("parallel",)),
    )(xf, w1f, b1f, w2f, b2f, wscf, bscf)

    out = out.reshape(N, H2, W2, Cp)[:, :, :, :Cout]
    return jnp.transpose(out, (0, 3, 1, 2))                          # NCHW


# ----------------------------- pure-JAX reference --------------------------- #

def _ref_disblock(x, params):
    def conv(h, w, b, pad):
        y = lax.conv_general_dilated(h, w, (1, 1), ((pad, pad), (pad, pad)),
                                     dimension_numbers=("NCHW", "OIHW", "NCHW"))
        return y + b[None, :, None, None]

    def down(h):
        N, C, H, W = h.shape
        return h.reshape(N, C, H // 2, 2, W // 2, 2).mean(axis=(3, 5))

    h = conv(x, params["w1"], params["b1"], 1)
    h = jnp.maximum(h, 0.0)
    h = conv(h, params["w2"], params["b2"], 1)
    h = down(h)
    sc = conv(down(x), params["wsc"], params["bsc"], 0)
    return h + sc


# ---------------------------------- main ------------------------------------ #

if __name__ == "__main__":
    N, Cin, Cout, H, W = 2, 4, 8, 16, 16
    key = jax.random.PRNGKey(0)
    ks = jax.random.split(key, 7)

    x = jax.random.normal(ks[0], (N, Cin, H, W), jnp.float32)
    params = dict(
        w1=0.2 * jax.random.normal(ks[1], (Cout, Cin, 3, 3), jnp.float32),
        b1=0.1 * jax.random.normal(ks[2], (Cout,), jnp.float32),
        w2=0.2 * jax.random.normal(ks[3], (Cout, Cout, 3, 3), jnp.float32),
        b2=0.1 * jax.random.normal(ks[4], (Cout,), jnp.float32),
        wsc=0.2 * jax.random.normal(ks[5], (Cout, Cin, 1, 1), jnp.float32),
        bsc=0.1 * jax.random.normal(ks[6], (Cout,), jnp.float32),
    )

    out = jax.block_until_ready(disblock_forward(x, params))
    ref = _ref_disblock(x, params)

    assert out.shape == (N, Cout, H // 2, W // 2), out.shape
    max_err = float(jnp.max(jnp.abs(out - ref)))
    # bf16 MXU operands (f32 accumulation) -> compare with a bf16-level tolerance.
    tol = 5e-2 * float(jnp.max(jnp.abs(ref))) + 1e-2
    if max_err <= tol:
        print("KERNEL_OK")
    else:
        print(f"MISMATCH max_err={max_err} tol={tol}")
</pallas_src>

<mosaic_0001>
module attributes {stable_mosaic.version = 11 : i64} {
  func.func @kernel(%arg0: i32, %arg1: memref<1x256x4xbf16, #tpu.memory_space<vmem>>, %arg2: memref<9x4x128xbf16, #tpu.memory_space<vmem>>, %arg3: memref<1x128xf32, #tpu.memory_space<vmem>>, %arg4: memref<9x128x128xbf16, #tpu.memory_space<vmem>>, %arg5: memref<1x128xf32, #tpu.memory_space<vmem>>, %arg6: memref<4x128xbf16, #tpu.memory_space<vmem>>, %arg7: memref<1x128xf32, #tpu.memory_space<vmem>>, %arg8: memref<1x64x128xf32, #tpu.memory_space<vmem>>, %arg9: memref<304x4xf32, #tpu.memory_space<vmem>>, %arg10: memref<304x128xf32, #tpu.memory_space<vmem>>) attributes {dimension_semantics = [#tpu.dimension_semantics<parallel>], iteration_bounds = array<i64: 2>, scalar_prefetch = 0 : i64, scratch_operands = 2 : i64, tpu.core_type = #tpu.core_type<tc>, window_params = [{transform_indices = @transform_0, window_bounds = array<i64: 1, 256, 4>}, {pipeline_mode = #tpu.pipeline_mode<synchronous>, transform_indices = @transform_1, window_bounds = array<i64: 9, 4, 128>}, {pipeline_mode = #tpu.pipeline_mode<synchronous>, transform_indices = @transform_2, window_bounds = array<i64: 1, 128>}, {pipeline_mode = #tpu.pipeline_mode<synchronous>, transform_indices = @transform_3, window_bounds = array<i64: 9, 128, 128>}, {pipeline_mode = #tpu.pipeline_mode<synchronous>, transform_indices = @transform_4, window_bounds = array<i64: 1, 128>}, {pipeline_mode = #tpu.pipeline_mode<synchronous>, transform_indices = @transform_5, window_bounds = array<i64: 4, 128>}, {pipeline_mode = #tpu.pipeline_mode<synchronous>, transform_indices = @transform_6, window_bounds = array<i64: 1, 128>}, {transform_indices = @transform_7, window_bounds = array<i64: 1, 64, 128>}]} {
    %0 = tpu.iota {dimensions = array<i32: 0>} : vector<256x1xi32>
    %c16_i32 = arith.constant 16 : i32
    %c0_i32 = arith.constant 0 : i32
    %1 = arith.cmpi eq, %c16_i32, %c0_i32 : i32
    %c1_i32 = arith.constant 1 : i32
    %2 = arith.select %1, %c1_i32, %c16_i32 : i32
    %3 = vector.broadcast %2 : i32 to vector<256x1xi32>
    %4 = arith.remsi %0, %3 : vector<256x1xi32>
    %c0_i32_0 = arith.constant 0 : i32
    %5 = vector.broadcast %c0_i32_0 : i32 to vector<256x1xi32>
    %6 = arith.cmpi ne, %4, %5 : vector<256x1xi32>
    %c0_i32_1 = arith.constant 0 : i32
    %7 = vector.broadcast %c0_i32_1 : i32 to vector<256x1xi32>
    %8 = arith.cmpi slt, %4, %7 : vector<256x1xi32>
    %c0_i32_2 = arith.constant 0 : i32
    %9 = arith.cmpi slt, %2, %c0_i32_2 : i32
    %10 = vector.broadcast %9 : i1 to vector<256x1xi1>
    %11 = vector.broadcast %10 : vector<256x1xi1> to vector<256x1xi1>
    %12 = arith.xori %8, %11 : vector<256x1xi1>
    %13 = arith.andi %12, %6 : vector<256x1xi1>
    %14 = vector.broadcast %2 : i32 to vector<256x1xi32>
    %15 = arith.addi %4, %14 : vector<256x1xi32>
    %16 = arith.select %13, %15, %4 : vector<256x1xi1>, vector<256x1xi32>
    %c1_i32_3 = arith.constant 1 : i32
    %17 = vector.broadcast %c1_i32_3 : i32 to vector<256x1xi32>
    %18 = arith.cmpi sge, %16, %17 : vector<256x1xi32>
    %c15_i32 = arith.constant 15 : i32
    %19 = vector.broadcast %c15_i32 : i32 to vector<256x1xi32>
    %20 = arith.cmpi slt, %16, %19 : vector<256x1xi32>
    %cst = arith.constant 0.000000e+00 : f32
    %21 = vector.broadcast %cst : f32 to vector<304x4xf32>
    %c0 = arith.constant 0 : index
    %c0_4 = arith.constant 0 : index
    %22 = vector.load %arg9[%c0, %c0_4] : memref<304x4xf32, #tpu.memory_space<vmem>>, vector<304x4xf32>
    tpu.vector_store %arg9[%c0, %c0_4], %21 {strides = array<i32>} : memref<304x4xf32, #tpu.memory_space<vmem>>, vector<304x4xf32>,
    %c0_5 = arith.constant 0 : index
    %c0_6 = arith.constant 0 : index
    %c0_7 = arith.constant 0 : index
    %23 = vector.load %arg1[%c0_5, %c0_6, %c0_7] : memref<1x256x4xbf16, #tpu.memory_space<vmem>>, vector<1x256x4xbf16>
    %24 = vector.shape_cast %23 : vector<1x256x4xbf16> to vector<256x4xbf16>
    %25 = arith.extf %24 : vector<256x4xbf16> to vector<256x4xf32>
    %c24 = arith.constant 24 : index
    %c0_8 = arith.constant 0 : index
    %26 = vector.load %arg9[%c24, %c0_8] : memref<304x4xf32, #tpu.memory_space<vmem>>, vector<256x4xf32>
    tpu.vector_store %arg9[%c24, %c0_8], %25 {strides = array<i32>} : memref<304x4xf32, #tpu.memory_space<vmem>>, vector<256x4xf32>,
    %c7 = arith.constant 7 : index
    %c0_9 = arith.constant 0 : index
    %27 = vector.load %arg9[%c7, %c0_9] : memref<304x4xf32, #tpu.memory_space<vmem>>, vector<256x4xf32>
    %cst_10 = arith.constant 0.000000e+00 : f32
    %28 = vector.shape_cast %18 : vector<256x1xi1> to vector<256x1xi1>
    %29 = vector.broadcast %28 : vector<256x1xi1> to vector<256x4xi1>
    %30 = vector.broadcast %cst_10 : f32 to vector<256x4xf32>
    %31 = arith.select %29, %27, %30 : vector<256x4xi1>, vector<256x4xf32>
    %32 = arith.truncf %31 : vector<256x4xf32> to vector<256x4xbf16>
    %c0_11 = arith.constant 0 : index
    %c0_12 = arith.constant 0 : index
    %c0_13 = arith.constant 0 : index
    %33 = vector.load %arg2[%c0_11, %c0_12, %c0_13] : memref<9x4x128xbf16, #tpu.memory_space<vmem>>, vector<1x4x128xbf16>
    %34 = vector.shape_cast %33 : vector<1x4x128xbf16> to vector<4x128xbf16>
    %cst_14 = arith.constant dense<0.000000e+00> : vector<256x128xf32>
    %35 = tpu.matmul %32, %34, %cst_14 {dimension_numbers = #tpu.dot_dimension_numbers<[1], [0], [0], [1], [0, 0, 1, 1], [], []>} : vector<256x4xbf16>, vector<4x128xbf16>, vector<256x128xf32> -> vector<256x128xf32>
    %c8 = arith.constant 8 : index
    %c0_15 = arith.constant 0 : index
    %36 = vector.load %arg9[%c8, %c0_15] : memref<304x4xf32, #tpu.memory_space<vmem>>, vector<256x4xf32>
    %37 = arith.truncf %36 : vector<256x4xf32> to vector<256x4xbf16>
    %c1 = arith.constant 1 : index
    %c0_16 = arith.constant 0 : index
    %c0_17 = arith.constant 0 : index
    %38 = vector.load %arg2[%c1, %c0_16, %c0_17] : memref<9x4x128xbf16, #tpu.memory_space<vmem>>, vector<1x4x128xbf16>
    %39 = vector.shape_cast %38 : vector<1x4x128xbf16> to vector<4x128xbf16>
    %cst_18 = arith.constant dense<0.000000e+00> : vector<256x128xf32>
    %40 = tpu.matmul %37, %39, %cst_18 {dimension_numbers = #tpu.dot_dimension_numbers<[1], [0], [0], [1], [0, 0, 1, 1], [], []>} : vector<256x4xbf16>, vector<4x128xbf16>, vector<256x128xf32> -> vector<256x128xf32>
    %41 = arith.addf %35, %40 : vector<256x128xf32>
    %c9 = arith.constant 9 : index
    %c0_19 = arith.constant 0 : index
    %42 = vector.load %arg9[%c9, %c0_19] : memref<304x4xf32, #tpu.memory_space<vmem>>, vector<256x4xf32>
    %cst_20 = arith.constant 0.000000e+00 : f32
    %43 = vector.shape_cast %20 : vector<256x1xi1> to vector<256x1xi1>
    %44 = vector.broadcast %43 : vector<256x1xi1> to vector<256x4xi1>
    %45 = vector.broadcast %cst_20 : f32 to vector<256x4xf32>
    %46 = arith.select %44, %42, %45 : vector<256x4xi1>, vector<256x4xf32>
    %47 = arith.truncf %46 : vector<256x4xf32> to vector<256x4xbf16>
    %c2 = arith.constant 2 : index
    %c0_21 = arith.constant 0 : index
    %c0_22 = arith.constant 0 : index
    %48 = vector.load %arg2[%c2, %c0_21, %c0_22] : memref<9x4x128xbf16, #tpu.memory_space<vmem>>, vector<1x4x128xbf16>
    %49 = vector.shape_cast %48 : vector<1x4x128xbf16> to vector<4x128xbf16>
    %cst_23 = arith.constant dense<0.000000e+00> : vector<256x128xf32>
    %50 = tpu.matmul %47, %49, %cst_23 {dimension_numbers = #tpu.dot_dimension_numbers<[1], [0], [0], [1], [0, 0, 1, 1], [], []>} : vector<256x4xbf16>, vector<4x128xbf16>, vector<256x128xf32> -> vector<256x128xf32>
    %51 = arith.addf %41, %50 : vector<256x128xf32>
    %c23 = arith.constant 23 : index
    %c0_24 = arith.constant 0 : index
    %52 = vector.load %arg9[%c23, %c0_24] : memref<304x4xf32, #tpu.memory_space<vmem>>, vector<256x4xf32>
    %cst_25 = arith.constant 0.000000e+00 : f32
    %53 = vector.shape_cast %18 : vector<256x1xi1> to vector<256x1xi1>
    %54 = vector.broadcast %53 : vector<256x1xi1> to vector<256x4xi1>
    %55 = vector.broadcast %cst_25 : f32 to vector<256x4xf32>
    %56 = arith.select %54, %52, %55 : vector<256x4xi1>, vector<256x4xf32>
    %57 = arith.truncf %56 : vector<256x4xf32> to vector<256x4xbf16>
    %c3 = arith.constant 3 : index
    %c0_26 = arith.constant 0 : index
    %c0_27 = arith.constant 0 : index
    %58 = vector.load %arg2[%c3, %c0_26, %c0_27] : memref<9x4x128xbf16, #tpu.memory_space<vmem>>, vector<1x4x128xbf16>
    %59 = vector.shape_cast %58 : vector<1x4x128xbf16> to vector<4x128xbf16>
    %cst_28 = arith.constant dense<0.000000e+00> : vector<256x128xf32>
    %60 = tpu.matmul %57, %59, %cst_28 {dimension_numbers = #tpu.dot_dimension_numbers<[1], [0], [0], [1], [0, 0, 1, 1], [], []>} : vector<256x4xbf16>, vector<4x128xbf16>, vector<256x128xf32> -> vector<256x128xf32>
    %61 = arith.addf %51, %60 : vector<256x128xf32>
    %c24_29 = arith.constant 24 : index
    %c0_30 = arith.constant 0 : index
    %62 = vector.load %arg9[%c24_29, %c0_30] : memref<304x4xf32, #tpu.memory_space<vmem>>, vector<256x4xf32>
    %63 = arith.truncf %62 : vector<256x4xf32> to vector<256x4xbf16>
    %c4 = arith.constant 4 : index
    %c0_31 = arith.constant 0 : index
    %c0_32 = arith.constant 0 : index
    %64 = vector.load %arg2[%c4, %c0_31, %c0_32] : memref<9x4x128xbf16, #tpu.memory_space<vmem>>, vector<1x4x128xbf16>
    %65 = vector.shape_cast %64 : vector<1x4x128xbf16> to vector<4x128xbf16>
    %cst_33 = arith.constant dense<0.000000e+00> : vector<256x128xf32>
    %66 = tpu.matmul %63, %65, %cst_33 {dimension_numbers = #tpu.dot_dimension_numbers<[1], [0], [0], [1], [0, 0, 1, 1], [], []>} : vector<256x4xbf16>, vector<4x128xbf16>, vector<256x128xf32> -> vector<256x128xf32>
    %67 = arith.addf %61, %66 : vector<256x128xf32>
    %c25 = arith.constant 25 : index
    %c0_34 = arith.constant 0 : index
    %68 = vector.load %arg9[%c25, %c0_34] : memref<304x4xf32, #tpu.memory_space<vmem>>, vector<256x4xf32>
    %cst_35 = arith.constant 0.000000e+00 : f32
    %69 = vector.shape_cast %20 : vector<256x1xi1> to vector<256x1xi1>
    %70 = vector.broadcast %69 : vector<256x1xi1> to vector<256x4xi1>
    %71 = vector.broadcast %cst_35 : f32 to vector<256x4xf32>
    %72 = arith.select %70, %68, %71 : vector<256x4xi1>, vector<256x4xf32>
    %73 = arith.truncf %72 : vector<256x4xf32> to vector<256x4xbf16>
    %c5 = arith.constant 5 : index
    %c0_36 = arith.constant 0 : index
    %c0_37 = arith.constant 0 : index
    %74 = vector.load %arg2[%c5, %c0_36, %c0_37] : memref<9x4x128xbf16, #tpu.memory_space<vmem>>, vector<1x4x128xbf16>
    %75 = vector.shape_cast %74 : vector<1x4x128xbf16> to vector<4x128xbf16>
    %cst_38 = arith.constant dense<0.000000e+00> : vector<256x128xf32>
    %76 = tpu.matmul %73, %75, %cst_38 {dimension_numbers = #tpu.dot_dimension_numbers<[1], [0], [0], [1], [0, 0, 1, 1], [], []>} : vector<256x4xbf16>, vector<4x128xbf16>, vector<256x128xf32> -> vector<256x128xf32>
    %77 = arith.addf %67, %76 : vector<256x128xf32>
    %c39 = arith.constant 39 : index
    %c0_39 = arith.constant 0 : index
    %78 = vector.load %arg9[%c39, %c0_39] : memref<304x4xf32, #tpu.memory_space<vmem>>, vector<256x4xf32>
    %cst_40 = arith.constant 0.000000e+00 : f32
    %79 = vector.shape_cast %18 : vector<256x1xi1> to vector<256x1xi1>
    %80 = vector.broadcast %79 : vector<256x1xi1> to vector<256x4xi1>
    %81 = vector.broadcast %cst_40 : f32 to vector<256x4xf32>
    %82 = arith.select %80, %78, %81 : vector<256x4xi1>, vector<256x4xf32>
    %83 = arith.truncf %82 : vector<256x4xf32> to vector<256x4xbf16>
    %c6 = arith.constant 6 : index
    %c0_41 = arith.constant 0 : index
    %c0_42 = arith.constant 0 : index
    %84 = vector.load %arg2[%c6, %c0_41, %c0_42] : memref<9x4x128xbf16, #tpu.memory_space<vmem>>, vector<1x4x128xbf16>
    %85 = vector.shape_cast %84 : vector<1x4x128xbf16> to vector<4x128xbf16>
    %cst_43 = arith.constant dense<0.000000e+00> : vector<256x128xf32>
    %86 = tpu.matmul %83, %85, %cst_43 {dimension_numbers = #tpu.dot_dimension_numbers<[1], [0], [0], [1], [0, 0, 1, 1], [], []>} : vector<256x4xbf16>, vector<4x128xbf16>, vector<256x128xf32> -> vector<256x128xf32>
    %87 = arith.addf %77, %86 : vector<256x128xf32>
    %c40 = arith.constant 40 : index
    %c0_44 = arith.constant 0 : index
    %88 = vector.load %arg9[%c40, %c0_44] : memref<304x4xf32, #tpu.memory_space<vmem>>, vector<256x4xf32>
    %89 = arith.truncf %88 : vector<256x4xf32> to vector<256x4xbf16>
    %c7_45 = arith.constant 7 : index
    %c0_46 = arith.constant 0 : index
    %c0_47 = arith.constant 0 : index
    %90 = vector.load %arg2[%c7_45, %c0_46, %c0_47] : memref<9x4x128xbf16, #tpu.memory_space<vmem>>, vector<1x4x128xbf16>
    %91 = vector.shape_cast %90 : vector<1x4x128xbf16> to vector<4x128xbf16>
    %cst_48 = arith.constant dense<0.000000e+00> : vector<256x128xf32>
    %92 = tpu.matmul %89, %91, %cst_48 {dimension_numbers = #tpu.dot_dimension_numbers<[1], [0], [0], [1], [0, 0, 1, 1], [], []>} : vector<256x4xbf16>, vector<4x128xbf16>, vector<256x128xf32> -> vector<256x128xf32>
    %93 = arith.addf %87, %92 : vector<256x128xf32>
    %c41 = arith.constant 41 : index
    %c0_49 = arith.constant 0 : index
    %94 = vector.load %arg9[%c41, %c0_49] : memref<304x4xf32, #tpu.memory_space<vmem>>, vector<256x4xf32>
    %cst_50 = arith.constant 0.000000e+00 : f32
    %95 = vector.shape_cast %20 : vector<256x1xi1> to vector<256x1xi1>
    %96 = vector.broadcast %95 : vector<256x1xi1> to vector<256x4xi1>
    %97 = vector.broadcast %cst_50 : f32 to vector<256x4xf32>
    %98 = arith.select %96, %94, %97 : vector<256x4xi1>, vector<256x4xf32>
    %99 = arith.truncf %98 : vector<256x4xf32> to vector<256x4xbf16>
    %c8_51 = arith.constant 8 : index
    %c0_52 = arith.constant 0 : index
    %c0_53 = arith.constant 0 : index
    %100 = vector.load %arg2[%c8_51, %c0_52, %c0_53] : memref<9x4x128xbf16, #tpu.memory_space<vmem>>, vector<1x4x128xbf16>
    %101 = vector.shape_cast %100 : vector<1x4x128xbf16> to vector<4x128xbf16>
    %cst_54 = arith.constant dense<0.000000e+00> : vector<256x128xf32>
    %102 = tpu.matmul %99, %101, %cst_54 {dimension_numbers = #tpu.dot_dimension_numbers<[1], [0], [0], [1], [0, 0, 1, 1], [], []>} : vector<256x4xbf16>, vector<4x128xbf16>, vector<256x128xf32> -> vector<256x128xf32>
    %103 = arith.addf %93, %102 : vector<256x128xf32>
    %c0_55 = arith.constant 0 : index
    %c0_56 = arith.constant 0 : index
    %104 = vector.load %arg3[%c0_55, %c0_56] : memref<1x128xf32, #tpu.memory_space<vmem>>, vector<1x128xf32>
    %105 = vector.broadcast %104 : vector<1x128xf32> to vector<256x128xf32>
    %106 = arith.addf %103, %105 : vector<256x128xf32>
    %cst_57 = arith.constant 0.000000e+00 : f32
    %107 = vector.broadcast %cst_57 : f32 to vector<256x128xf32>
    %108 = arith.maximumf %106, %107 : vector<256x128xf32>
    %cst_58 = arith.constant 0.000000e+00 : f32
    %109 = vector.broadcast %cst_58 : f32 to vector<304x128xf32>
    %c0_59 = arith.constant 0 : index
    %c0_60 = arith.constant 0 : index
    %110 = vector.load %arg10[%c0_59, %c0_60] : memref<304x128xf32, #tpu.memory_space<vmem>>, vector<304x128xf32>
    tpu.vector_store %arg10[%c0_59, %c0_60], %109 {strides = array<i32>} : memref<304x128xf32, #tpu.memory_space<vmem>>, vector<304x128xf32>,
    %c24_61 = arith.constant 24 : index
    %c0_62 = arith.constant 0 : index
    %111 = vector.load %arg10[%c24_61, %c0_62] : memref<304x128xf32, #tpu.memory_space<vmem>>, vector<256x128xf32>
    tpu.vector_store %arg10[%c24_61, %c0_62], %108 {strides = array<i32>} : memref<304x128xf32, #tpu.memory_space<vmem>>, vector<256x128xf32>,
    %c7_63 = arith.constant 7 : index
    %c0_64 = arith.constant 0 : index
    %112 = vector.load %arg10[%c7_63, %c0_64] : memref<304x128xf32, #tpu.memory_space<vmem>>, vector<256x128xf32>
    %cst_65 = arith.constant 0.000000e+00 : f32
    %113 = vector.shape_cast %18 : vector<256x1xi1> to vector<256x1xi1>
    %114 = vector.broadcast %113 : vector<256x1xi1> to vector<256x128xi1>
    %115 = vector.broadcast %cst_65 : f32 to vector<256x128xf32>
    %116 = arith.select %114, %112, %115 : vector<256x128xi1>, vector<256x128xf32>
    %117 = arith.truncf %116 : vector<256x128xf32> to vector<256x128xbf16>
    %c0_66 = arith.constant 0 : index
    %c0_67 = arith.constant 0 : index
    %c0_68 = arith.constant 0 : index
    %118 = vector.load %arg4[%c0_66, %c0_67, %c0_68] : memref<9x128x128xbf16, #tpu.memory_space<vmem>>, vector<1x128x128xbf16>
    %119 = vector.shape_cast %118 : vector<1x128x128xbf16> to vector<128x128xbf16>
    %cst_69 = arith.constant dense<0.000000e+00> : vector<256x128xf32>
    %120 = tpu.matmul %117, %119, %cst_69 {dimension_numbers = #tpu.dot_dimension_numbers<[1], [0], [0], [1], [0, 0, 1, 1], [], []>} : vector<256x128xbf16>, vector<128x128xbf16>, vector<256x128xf32> -> vector<256x128xf32>
    %c8_70 = arith.constant 8 : index
    %c0_71 = arith.constant 0 : index
    %121 = vector.load %arg10[%c8_70, %c0_71] : memref<304x128xf32, #tpu.memory_space<vmem>>, vector<256x128xf32>
    %122 = arith.truncf %121 : vector<256x128xf32> to vector<256x128xbf16>
    %c1_72 = arith.constant 1 : index
    %c0_73 = arith.constant 0 : index
    %c0_74 = arith.constant 0 : index
    %123 = vector.load %arg4[%c1_72, %c0_73, %c0_74] : memref<9x128x128xbf16, #tpu.memory_space<vmem>>, vector<1x128x128xbf16>
    %124 = vector.shape_cast %123 : vector<1x128x128xbf16> to vector<128x128xbf16>
    %cst_75 = arith.constant dense<0.000000e+00> : vector<256x128xf32>
    %125 = tpu.matmul %122, %124, %cst_75 {dimension_numbers = #tpu.dot_dimension_numbers<[1], [0], [0], [1], [0, 0, 1, 1], [], []>} : vector<256x128xbf16>, vector<128x128xbf16>, vector<256x128xf32> -> vector<256x128xf32>
    %126 = arith.addf %120, %125 : vector<256x128xf32>
    %c9_76 = arith.constant 9 : index
    %c0_77 = arith.constant 0 : index
    %127 = vector.load %arg10[%c9_76, %c0_77] : memref<304x128xf32, #tpu.memory_space<vmem>>, vector<256x128xf32>
    %cst_78 = arith.constant 0.000000e+00 : f32
    %128 = vector.shape_cast %20 : vector<256x1xi1> to vector<256x1xi1>
    %129 = vector.broadcast %128 : vector<256x1xi1> to vector<256x128xi1>
    %130 = vector.broadcast %cst_78 : f32 to vector<256x128xf32>
    %131 = arith.select %129, %127, %130 : vector<256x128xi1>, vector<256x128xf32>
    %132 = arith.truncf %131 : vector<256x128xf32> to vector<256x128xbf16>
    %c2_79 = arith.constant 2 : index
    %c0_80 = arith.constant 0 : index
    %c0_81 = arith.constant 0 : index
    %133 = vector.load %arg4[%c2_79, %c0_80, %c0_81] : memref<9x128x128xbf16, #tpu.memory_space<vmem>>, vector<1x128x128xbf16>
    %134 = vector.shape_cast %133 : vector<1x128x128xbf16> to vector<128x128xbf16>
    %cst_82 = arith.constant dense<0.000000e+00> : vector<256x128xf32>
    %135 = tpu.matmul %132, %134, %cst_82 {dimension_numbers = #tpu.dot_dimension_numbers<[1], [0], [0], [1], [0, 0, 1, 1], [], []>} : vector<256x128xbf16>, vector<128x128xbf16>, vector<256x128xf32> -> vector<256x128xf32>
    %136 = arith.addf %126, %135 : vector<256x128xf32>
    %c23_83 = arith.constant 23 : index
    %c0_84 = arith.constant 0 : index
    %137 = vector.load %arg10[%c23_83, %c0_84] : memref<304x128xf32, #tpu.memory_space<vmem>>, vector<256x128xf32>
    %cst_85 = arith.constant 0.000000e+00 : f32
    %138 = vector.shape_cast %18 : vector<256x1xi1> to vector<256x1xi1>
    %139 = vector.broadcast %138 : vector<256x1xi1> to vector<256x128xi1>
    %140 = vector.broadcast %cst_85 : f32 to vector<256x128xf32>
    %141 = arith.select %139, %137, %140 : vector<256x128xi1>, vector<256x128xf32>
    %142 = arith.truncf %141 : vector<256x128xf32> to vector<256x128xbf16>
    %c3_86 = arith.constant 3 : index
    %c0_87 = arith.constant 0 : index
    %c0_88 = arith.constant 0 : index
    %143 = vector.load %arg4[%c3_86, %c0_87, %c0_88] : memref<9x128x128xbf16, #tpu.memory_space<vmem>>, vector<1x128x128xbf16>
    %144 = vector.shape_cast %143 : vector<1x128x128xbf16> to vector<128x128xbf16>
    %cst_89 = arith.constant dense<0.000000e+00> : vector<256x128xf32>
    %145 = tpu.matmul %142, %144, %cst_89 {dimension_numbers = #tpu.dot_dimension_numbers<[1], [0], [0], [1], [0, 0, 1, 1], [], []>} : vector<256x128xbf16>, vector<128x128xbf16>, vector<256x128xf32> -> vector<256x128xf32>
    %146 = arith.addf %136, %145 : vector<256x128xf32>
    %c24_90 = arith.constant 24 : index
    %c0_91 = arith.constant 0 : index
    %147 = vector.load %arg10[%c24_90, %c0_91] : memref<304x128xf32, #tpu.memory_space<vmem>>, vector<256x128xf32>
    %148 = arith.truncf %147 : vector<256x128xf32> to vector<256x128xbf16>
    %c4_92 = arith.constant 4 : index
    %c0_93 = arith.constant 0 : index
    %c0_94 = arith.constant 0 : index
    %149 = vector.load %arg4[%c4_92, %c0_93, %c0_94] : memref<9x128x128xbf16, #tpu.memory_space<vmem>>, vector<1x128x128xbf16>
    %150 = vector.shape_cast %149 : vector<1x128x128xbf16> to vector<128x128xbf16>
    %cst_95 = arith.constant dense<0.000000e+00> : vector<256x128xf32>
    %151 = tpu.matmul %148, %150, %cst_95 {dimension_numbers = #tpu.dot_dimension_numbers<[1], [0], [0], [1], [0, 0, 1, 1], [], []>} : vector<256x128xbf16>, vector<128x128xbf16>, vector<256x128xf32> -> vector<256x128xf32>
    %152 = arith.addf %146, %151 : vector<256x128xf32>
    %c25_96 = arith.constant 25 : index
    %c0_97 = arith.constant 0 : index
    %153 = vector.load %arg10[%c25_96, %c0_97] : memref<304x128xf32, #tpu.memory_space<vmem>>, vector<256x128xf32>
    %cst_98 = arith.constant 0.000000e+00 : f32
    %154 = vector.shape_cast %20 : vector<256x1xi1> to vector<256x1xi1>
    %155 = vector.broadcast %154 : vector<256x1xi1> to vector<256x128xi1>
    %156 = vector.broadcast %cst_98 : f32 to vector<256x128xf32>
    %157 = arith.select %155, %153, %156 : vector<256x128xi1>, vector<256x128xf32>
    %158 = arith.truncf %157 : vector<256x128xf32> to vector<256x128xbf16>
    %c5_99 = arith.constant 5 : index
    %c0_100 = arith.constant 0 : index
    %c0_101 = arith.constant 0 : index
    %159 = vector.load %arg4[%c5_99, %c0_100, %c0_101] : memref<9x128x128xbf16, #tpu.memory_space<vmem>>, vector<1x128x128xbf16>
    %160 = vector.shape_cast %159 : vector<1x128x128xbf16> to vector<128x128xbf16>
    %cst_102 = arith.constant dense<0.000000e+00> : vector<256x128xf32>
    %161 = tpu.matmul %158, %160, %cst_102 {dimension_numbers = #tpu.dot_dimension_numbers<[1], [0], [0], [1], [0, 0, 1, 1], [], []>} : vector<256x128xbf16>, vector<128x128xbf16>, vector<256x128xf32> -> vector<256x128xf32>
    %162 = arith.addf %152, %161 : vector<256x128xf32>
    %c39_103 = arith.constant 39 : index
    %c0_104 = arith.constant 0 : index
    %163 = vector.load %arg10[%c39_103, %c0_104] : memref<304x128xf32, #tpu.memory_space<vmem>>, vector<256x128xf32>
    %cst_105 = arith.constant 0.000000e+00 : f32
    %164 = vector.shape_cast %18 : vector<256x1xi1> to vector<256x1xi1>
    %165 = vector.broadcast %164 : vector<256x1xi1> to vector<256x128xi1>
    %166 = vector.broadcast %cst_105 : f32 to vector<256x128xf32>
    %167 = arith.select %165, %163, %166 : vector<256x128xi1>, vector<256x128xf32>
    %168 = arith.truncf %167 : vector<256x128xf32> to vector<256x128xbf16>
    %c6_106 = arith.constant 6 : index
    %c0_107 = arith.constant 0 : index
    %c0_108 = arith.constant 0 : index
    %169 = vector.load %arg4[%c6_106, %c0_107, %c0_108] : memref<9x128x128xbf16, #tpu.memory_space<vmem>>, vector<1x128x128xbf16>
    %170 = vector.shape_cast %169 : vector<1x128x128xbf16> to vector<128x128xbf16>
    %cst_109 = arith.constant dense<0.000000e+00> : vector<256x128xf32>
    %171 = tpu.matmul %168, %170, %cst_109 {dimension_numbers = #tpu.dot_dimension_numbers<[1], [0], [0], [1], [0, 0, 1, 1], [], []>} : vector<256x128xbf16>, vector<128x128xbf16>, vector<256x128xf32> -> vector<256x128xf32>
    %172 = arith.addf %162, %171 : vector<256x128xf32>
    %c40_110 = arith.constant 40 : index
    %c0_111 = arith.constant 0 : index
    %173 = vector.load %arg10[%c40_110, %c0_111] : memref<304x128xf32, #tpu.memory_space<vmem>>, vector<256x128xf32>
    %174 = arith.truncf %173 : vector<256x128xf32> to vector<256x128xbf16>
    %c7_112 = arith.constant 7 : index
    %c0_113 = arith.constant 0 : index
    %c0_114 = arith.constant 0 : index
    %175 = vector.load %arg4[%c7_112, %c0_113, %c0_114] : memref<9x128x128xbf16, #tpu.memory_space<vmem>>, vector<1x128x128xbf16>
    %176 = vector.shape_cast %175 : vector<1x128x128xbf16> to vector<128x128xbf16>
    %cst_115 = arith.constant dense<0.000000e+00> : vector<256x128xf32>
    %177 = tpu.matmul %174, %176, %cst_115 {dimension_numbers = #tpu.dot_dimension_numbers<[1], [0], [0], [1], [0, 0, 1, 1], [], []>} : vector<256x128xbf16>, vector<128x128xbf16>, vector<256x128xf32> -> vector<256x128xf32>
    %178 = arith.addf %172, %177 : vector<256x128xf32>
    %c41_116 = arith.constant 41 : index
    %c0_117 = arith.constant 0 : index
    %179 = vector.load %arg10[%c41_116, %c0_117] : memref<304x128xf32, #tpu.memory_space<vmem>>, vector<256x128xf32>
    %cst_118 = arith.constant 0.000000e+00 : f32
    %180 = vector.shape_cast %20 : vector<256x1xi1> to vector<256x1xi1>
    %181 = vector.broadcast %180 : vector<256x1xi1> to vector<256x128xi1>
    %182 = vector.broadcast %cst_118 : f32 to vector<256x128xf32>
    %183 = arith.select %181, %179, %182 : vector<256x128xi1>, vector<256x128xf32>
    %184 = arith.truncf %183 : vector<256x128xf32> to vector<256x128xbf16>
    %c8_119 = arith.constant 8 : index
    %c0_120 = arith.constant 0 : index
    %c0_121 = arith.constant 0 : index
    %185 = vector.load %arg4[%c8_119, %c0_120, %c0_121] : memref<9x128x128xbf16, #tpu.memory_space<vmem>>, vector<1x128x128xbf16>
    %186 = vector.shape_cast %185 : vector<1x128x128xbf16> to vector<128x128xbf16>
    %cst_122 = arith.constant dense<0.000000e+00> : vector<256x128xf32>
    %187 = tpu.matmul %184, %186, %cst_122 {dimension_numbers = #tpu.dot_dimension_numbers<[1], [0], [0], [1], [0, 0, 1, 1], [], []>} : vector<256x128xbf16>, vector<128x128xbf16>, vector<256x128xf32> -> vector<256x128xf32>
    %188 = arith.addf %178, %187 : vector<256x128xf32>
    %c0_123 = arith.constant 0 : index
    %c0_124 = arith.constant 0 : index
    %189 = vector.load %arg5[%c0_123, %c0_124] : memref<1x128xf32, #tpu.memory_space<vmem>>, vector<1x128xf32>
    %190 = vector.broadcast %189 : vector<1x128xf32> to vector<256x128xf32>
    %191 = arith.addf %188, %190 : vector<256x128xf32>
    %c0_125 = arith.constant 0 : index
    %c0_126 = arith.constant 0 : index
    %192 = vector.load %arg10[%c0_125, %c0_126] : memref<304x128xf32, #tpu.memory_space<vmem>>, vector<256x128xf32>
    tpu.vector_store %arg10[%c0_125, %c0_126], %191 {strides = array<i32>} : memref<304x128xf32, #tpu.memory_space<vmem>>, vector<256x128xf32>,
    %c0_127 = arith.constant 0 : index
    %c0_128 = arith.constant 0 : index
    %193 = tpu.strided_load %arg10[%c0_127, %c0_128] {strides = array<i32: 2, 1>} : memref<304x128xf32, #tpu.memory_space<vmem>>, vector<128x128xf32>
    %c1_129 = arith.constant 1 : index
    %c0_130 = arith.constant 0 : index
    %194 = tpu.strided_load %arg10[%c1_129, %c0_130] {strides = array<i32: 2, 1>} : memref<304x128xf32, #tpu.memory_space<vmem>>, vector<128x128xf32>
    %195 = arith.addf %193, %194 : vector<128x128xf32>
    %196 = vector.shape_cast %195 : vector<128x128xf32> to vector<8x2x8x128xf32>
    %197 = vector.extract_strided_slice %196 {offsets = [0, 0, 0, 0], sizes = [8, 1, 8, 128], strides = [1, 1, 1, 1]} : vector<8x2x8x128xf32> to vector<8x1x8x128xf32>
    %198 = vector.shape_cast %197 : vector<8x1x8x128xf32> to vector<8x8x128xf32>
    %199 = vector.extract_strided_slice %196 {offsets = [0, 1, 0, 0], sizes = [8, 1, 8, 128], strides = [1, 1, 1, 1]} : vector<8x2x8x128xf32> to vector<8x1x8x128xf32>
    %200 = vector.shape_cast %199 : vector<8x1x8x128xf32> to vector<8x8x128xf32>
    %201 = arith.addf %198, %200 : vector<8x8x128xf32>
    %202 = vector.shape_cast %201 : vector<8x8x128xf32> to vector<64x128xf32>
    %cst_131 = arith.constant 2.500000e-01 : f32
    %203 = vector.broadcast %cst_131 : f32 to vector<64x128xf32>
    %204 = arith.mulf %202, %203 : vector<64x128xf32>
    %c24_132 = arith.constant 24 : index
    %c0_133 = arith.constant 0 : index
    %205 = tpu.strided_load %arg9[%c24_132, %c0_133] {strides = array<i32: 2, 1>} : memref<304x4xf32, #tpu.memory_space<vmem>>, vector<128x4xf32>
    %c25_134 = arith.constant 25 : index
    %c0_135 = arith.constant 0 : index
    %206 = tpu.strided_load %arg9[%c25_134, %c0_135] {strides = array<i32: 2, 1>} : memref<304x4xf32, #tpu.memory_space<vmem>>, vector<128x4xf32>
    %207 = arith.addf %205, %206 : vector<128x4xf32>
    %208 = vector.shape_cast %207 : vector<128x4xf32> to vector<8x2x8x4xf32>
    %209 = vector.extract_strided_slice %208 {offsets = [0, 0, 0, 0], sizes = [8, 1, 8, 4], strides = [1, 1, 1, 1]} : vector<8x2x8x4xf32> to vector<8x1x8x4xf32>
    %210 = vector.shape_cast %209 : vector<8x1x8x4xf32> to vector<8x8x4xf32>
    %211 = vector.extract_strided_slice %208 {offsets = [0, 1, 0, 0], sizes = [8, 1, 8, 4], strides = [1, 1, 1, 1]} : vector<8x2x8x4xf32> to vector<8x1x8x4xf32>
    %212 = vector.shape_cast %211 : vector<8x1x8x4xf32> to vector<8x8x4xf32>
    %213 = arith.addf %210, %212 : vector<8x8x4xf32>
    %214 = vector.shape_cast %213 : vector<8x8x4xf32> to vector<64x4xf32>
    %cst_136 = arith.constant 2.500000e-01 : f32
    %215 = vector.broadcast %cst_136 : f32 to vector<64x4xf32>
    %216 = arith.mulf %214, %215 : vector<64x4xf32>
    %217 = arith.truncf %216 : vector<64x4xf32> to vector<64x4xbf16>
    %c0_137 = arith.constant 0 : index
    %c0_138 = arith.constant 0 : index
    %218 = vector.load %arg6[%c0_137, %c0_138] : memref<4x128xbf16, #tpu.memory_space<vmem>>, vector<4x128xbf16>
    %cst_139 = arith.constant dense<0.000000e+00> : vector<64x128xf32>
    %219 = tpu.matmul %217, %218, %cst_139 {dimension_numbers = #tpu.dot_dimension_numbers<[1], [0], [0], [1], [0, 0, 1, 1], [], []>} : vector<64x4xbf16>, vector<4x128xbf16>, vector<64x128xf32> -> vector<64x128xf32>
    %c0_140 = arith.constant 0 : index
    %c0_141 = arith.constant 0 : index
    %220 = vector.load %arg7[%c0_140, %c0_141] : memref<1x128xf32, #tpu.memory_space<vmem>>, vector<1x128xf32>
    %221 = vector.broadcast %220 : vector<1x128xf32> to vector<64x128xf32>
    %222 = arith.addf %219, %221 : vector<64x128xf32>
    %223 = arith.addf %204, %222 : vector<64x128xf32>
    %c0_142 = arith.constant 0 : index
    %c0_143 = arith.constant 0 : index
    %c0_144 = arith.constant 0 : index
    %224 = vector.load %arg8[%c0_142, %c0_143, %c0_144] : memref<1x64x128xf32, #tpu.memory_space<vmem>>, vector<1x64x128xf32>
    %225 = vector.shape_cast %224 : vector<1x64x128xf32> to vector<64x128xf32>
    %226 = vector.shape_cast %223 : vector<64x128xf32> to vector<1x64x128xf32>
    tpu.vector_store %arg8[%c0_142, %c0_143, %c0_144], %226 {strides = array<i32>} : memref<1x64x128xf32, #tpu.memory_space<vmem>>, vector<1x64x128xf32>,
    return
  }
  func.func @transform_0(%arg0: i32) -> (i32, i32, i32) {
    %c0_i32 = arith.constant 0 : i32
    %c0_i32_0 = arith.constant 0 : i32
    %c0_i32_1 = arith.constant 0 : i32
    return %arg0, %c0_i32, %c0_i32_0 : i32, i32, i32
  }
  func.func @transform_1(%arg0: i32) -> (i32, i32, i32) {
    %c0_i32 = arith.constant 0 : i32
    %c0_i32_0 = arith.constant 0 : i32
    %c0_i32_1 = arith.constant 0 : i32
    %c0_i32_2 = arith.constant 0 : i32
    return %c0_i32, %c0_i32_0, %c0_i32_1 : i32, i32, i32
  }
  func.func @transform_2(%arg0: i32) -> (i32, i32) {
    %c0_i32 = arith.constant 0 : i32
    %c0_i32_0 = arith.constant 0 : i32
    %c0_i32_1 = arith.constant 0 : i32
    return %c0_i32, %c0_i32_0 : i32, i32
  }
  func.func @transform_3(%arg0: i32) -> (i32, i32, i32) {
    %c0_i32 = arith.constant 0 : i32
    %c0_i32_0 = arith.constant 0 : i32
    %c0_i32_1 = arith.constant 0 : i32
    %c0_i32_2 = arith.constant 0 : i32
    return %c0_i32, %c0_i32_0, %c0_i32_1 : i32, i32, i32
  }
  func.func @transform_4(%arg0: i32) -> (i32, i32) {
    %c0_i32 = arith.constant 0 : i32
    %c0_i32_0 = arith.constant 0 : i32
    %c0_i32_1 = arith.constant 0 : i32
    return %c0_i32, %c0_i32_0 : i32, i32
  }
  func.func @transform_5(%arg0: i32) -> (i32, i32) {
    %c0_i32 = arith.constant 0 : i32
    %c0_i32_0 = arith.constant 0 : i32
    %c0_i32_1 = arith.constant 0 : i32
    return %c0_i32, %c0_i32_0 : i32, i32
  }
  func.func @transform_6(%arg0: i32) -> (i32, i32) {
    %c0_i32 = arith.constant 0 : i32
    %c0_i32_0 = arith.constant 0 : i32
    %c0_i32_1 = arith.constant 0 : i32
    return %c0_i32, %c0_i32_0 : i32, i32
  }
  func.func @transform_7(%arg0: i32) -> (i32, i32, i32) {
    %c0_i32 = arith.constant 0 : i32
    %c0_i32_0 = arith.constant 0 : i32
    %c0_i32_1 = arith.constant 0 : i32
    return %arg0, %c0_i32, %c0_i32_0 : i32, i32, i32
  }
}

</mosaic_0001>

<bundles_post_ra>
// kernel: disblock_forward.1
= control target key start
LH: loop header
LB: loop body
LE: loop exit
PB: predicated region body
PF: predicated region fallthrough
CT: control target
= control target key end

     0   :  { %s9256_s24 = smov 0   ;;  %s12436_s0 = inlined_call_operand.vmem [shape: bf16[2,256,4], index: 0, kind: input, shape index: {}]   ;;  %s12437_s1 = inlined_call_operand.vmem [shape: bf16[9,4,128], index: 1, kind: input, shape index: {}]   ;;  %s12438_s2 = inlined_call_operand.vmem [shape: f32[1,128], index: 2, kind: input, shape index: {}]   ;;  %s12439_s3 = inlined_call_operand.vmem [shape: bf16[9,128,128], index: 3, kind: input, shape index: {}]   ;;  %s12440_s4 = inlined_call_operand.vmem [shape: f32[1,128], index: 4, kind: input, shape index: {}]   ;;  %s12441_s5 = inlined_call_operand.vmem [shape: bf16[4,128], index: 5, kind: input, shape index: {}]   ;;  %s12442_s6 = inlined_call_operand.vmem [shape: f32[1,128], index: 6, kind: input, shape index: {}]   ;;  %s12443_s7 = inlined_call_operand.vmem [shape: f32[2,64,128], index: 7, kind: output, shape index: {}]  }
   0x1 LB: > { %s7245_s25 = sadd.s32 4294967295, %s9212_s24   ;;  %p7249_p0 = scmp.ge.s32.totalorder %s9212_s24, 1  ;;  %s9212_s24 = sphi %s9256_s24, %s17_s24  }
   0x2   : > { %p237_p1 = scmp.lt.s32.totalorder %s9212_s24, 3 }
   0x4   : > { %p238_p2 = pnand %p7249_p0, %p237_p1 }
   0x6   : > { %241 = sbr.rel (%p238_p2) target bundleno = 1036 (0x40c), region = 48 }
   0xb   : > { %v7254_v0 = vld [vmem:[%s12437_s1 + $0x2] sm:$0x3]  ;;  %vm12445_vm0 = vcmask 1041408   ;;  %vm12444_vm1 = vcmask 31744   ;;  %p9269_p3 = scmp.lt.s32.totalorder %s7245_s25, 1  ;;  %v280_v1 = vlaneseq  ;;  %v9214_v3 = vmov 0.0  }
   0xc   : > { %9108 = vmatprep.subr.msk.bf16.mxu0 %vm12445_vm0, %v7254_v0  ;;  %v1141_v2 = vsel %vm12445_vm0, %v7254_v0, 0  ;;  %9109 = vmatprep.subr.msk.bf16.mxu1 %vm12445_vm0, %v7254_v0  ;;  %763 = vst.msk [vmem:[#allocation2 + $0x8] sm:$0xff] %vm12444_vm1, %v9214_v3  ;;  %764 = vst.msk [vmem:[#allocation2 + $0x10] sm:$0xff] %vm12444_vm1, %v9214_v3  ;;  %v9317_v4 = vld [vmem:[%s12437_s1 + $0x4] sm:$0x3] }
   0xd   : > { %762 = vst.msk [vmem:[#allocation2] sm:$0xff] %vm12444_vm1, %v9214_v3  ;;  %765 = vst.msk [vmem:[#allocation2 + $0x18] sm:$0xff] %vm12444_vm1, %v9214_v3  ;;  %v9322_v5 = vld [vmem:[%s12437_s1] sm:$0x3]  ;;  %8359 = vmatpush3.bf16.msra.mxu0 %v1141_v2  ;;  %9107 = vmatpush3.bf16.msra.mxu1 %v1141_v2  ;;  %s13440_s25 = smov (!%p9269_p3, %s7245_s25), 1  ;;  %v9330_v6 = vshrl.u32 %v280_v1, 7 }
   0xe   : > { %766 = vst.msk [vmem:[#allocation2 + $0x20] sm:$0xff] %vm12444_vm1, %v9214_v3  ;;  %767 = vst.msk [vmem:[#allocation2 + $0x28] sm:$0xff] %vm12444_vm1, %v9214_v3  ;;  %9111 = vmatprep.subr.msk.bf16.mxu0 %vm12445_vm0, %v9317_v4  ;;  %9110 = vmatprep.subr.msk.bf16.mxu1 %vm12445_vm0, %v9322_v5  ;;  %s7903_s10 = sshll.u32 %s13440_s25, 7  ;;  %v1711_v1 = vsel %vm12445_vm0, %v9317_v4, 0 }
   0xf   : > { %768 = vst.msk [vmem:[#allocation2 + $0x30] sm:$0xff] %vm12444_vm1, %v9214_v3  ;;  %769 = vst.msk [vmem:[#allocation2 + $0x38] sm:$0xff] %vm12444_vm1, %v9214_v3  ;;  %s9340_s13 = scalar_lea.vmem %s12436_s0, %s7903_s10  ;;  %v317_v10 = vand.u32 15, %v9330_v6  ;;  %v9360_v29 = vadd.s32 16, %v9330_v6  ;;  %v9372_v38 = vadd.s32 32, %v9330_v6  ;;  %s7904_s10 = sshll.u32 %s13440_s25, 6 }
  0x10   : > { %770 = vst.msk [vmem:[#allocation2 + $0x40] sm:$0xff] %vm12444_vm1, %v9214_v3  ;;  %771 = vst.msk [vmem:[#allocation2 + $0x48] sm:$0xff] %vm12444_vm1, %v9214_v3  ;;  %v7906_v7 = vld [vmem:[%s9340_s13] sm:$0xff]   ;;  %v7981_v8 = vld [vmem:[%s9340_s13 + $0x68] sm:$0xff]   ;;  %s12337_s12 = scalar_lea.vmem %s12443_s7, %s7904_s10 }
  0x11   : > { %772 = vst.msk [vmem:[#allocation2 + $0x50] sm:$0xff] %vm12444_vm1, %v9214_v3  ;;  %773 = vst.msk [vmem:[#allocation2 + $0x58] sm:$0xff] %vm12444_vm1, %v9214_v3  ;;  %v7982_v9 = vld [vmem:[%s9340_s13 + $0x70] sm:$0xff]   ;;  %v7907_v11 = vunpack.c.l.bf16 %v7906_v7  ;;  %v7908_v12 = vunpack.c.h.bf16 %v7906_v7  ;;  %v7959_v13 = vunpack.c.l.bf16 %v7981_v8  ;;  %v7960_v14 = vunpack.c.h.bf16 %v7981_v8  ;;  %v7969_v15 = vld [vmem:[%s9340_s13 + $0x8] sm:$0xff]  }
  0x12   : > { %774 = vst.msk [vmem:[#allocation2 + $0x60] sm:$0xff] %vm12444_vm1, %v9214_v3  ;;  %775 = vst.msk [vmem:[#allocation2 + $0x68] sm:$0xff] %vm12444_vm1, %v9214_v3  ;;  %v7970_v16 = vld [vmem:[%s9340_s13 + $0x10] sm:$0xff]   ;;  %v7971_v17 = vld [vmem:[%s9340_s13 + $0x18] sm:$0xff]   ;;  %v7963_v20 = vunpack.c.l.bf16 %v7982_v9  ;;  %v7964_v21 = vunpack.c.h.bf16 %v7982_v9  ;;  %v7911_v22 = vunpack.c.l.bf16 %v7969_v15  ;;  %v7912_v23 = vunpack.c.h.bf16 %v7969_v15 }
  0x13   : > { %776 = vst.msk [vmem:[#allocation2 + $0x70] sm:$0xff] %vm12444_vm1, %v9214_v3  ;;  %777 = vst.msk [vmem:[#allocation2 + $0x78] sm:$0xff] %vm12444_vm1, %v9214_v3  ;;  %v1041_v18 = vld [vmem:[#allocation2 + $0x8] sm:$0xff]  ;;  %v1042_v19 = vld [vmem:[#allocation2 + $0x10] sm:$0xff]  ;;  %v7915_v25 = vunpack.c.l.bf16 %v7970_v16  ;;  %v7916_v26 = vunpack.c.h.bf16 %v7970_v16  ;;  %v7919_v30 = vunpack.c.l.bf16 %v7971_v17  ;;  %v7920_v31 = vunpack.c.h.bf16 %v7971_v17 }
  0x14   : > { %778 = vst.msk [vmem:[#allocation2 + $0x80] sm:$0xff] %vm12444_vm1, %v9214_v3  ;;  %779 = vst.msk [vmem:[#allocation2 + $0x88] sm:$0xff] %vm12444_vm1, %v9214_v3  ;;  %v1073_v24 = vpack.c.bf16 %v1042_v19, %v1041_v18  ;;  %v7972_v27 = vld [vmem:[%s9340_s13 + $0x20] sm:$0xff]   ;;  %v7973_v28 = vld [vmem:[%s9340_s13 + $0x28] sm:$0xff]   ;;  %vm9367_vm2 = vcmp.ge.s32.totalorder %v317_v10, 1  ;;  %v331_v52 = vand.u32 15, %v9360_v29 }
  0x15   : > { %780 = vst.msk [vmem:[#allocation2 + $0x90] sm:$0xff] %vm12444_vm1, %v9214_v3  ;;  %781 = vst.msk [vmem:[#allocation2 + $0x98] sm:$0xff] %vm12444_vm1, %v9214_v3  ;;  %v7974_v32 = vld [vmem:[%s9340_s13 + $0x30] sm:$0xff]   ;;  %v7975_v33 = vld [vmem:[%s9340_s13 + $0x38] sm:$0xff]   ;;  %v7923_v36 = vunpack.c.l.bf16 %v7972_v27  ;;  %v7924_v37 = vunpack.c.h.bf16 %v7972_v27  ;;  %v7927_v40 = vunpack.c.l.bf16 %v7973_v28  ;;  %v7928_v41 = vunpack.c.h.bf16 %v7973_v28 }
  0x16   : > { %782 = vst.msk [vmem:[#allocation2 + $0xa0] sm:$0xff] %vm12444_vm1, %v9214_v3  ;;  %783 = vst.msk [vmem:[#allocation2 + $0xa8] sm:$0xff] %vm12444_vm1, %v9214_v3  ;;  %8360 = vmatprep.mubr.msk.bf16.mxu0 %vm12444_vm1, %v1073_v24  ;;  %v896_v35 = vld [vmem:[#allocation2 + $0x7] sm:$0xff]  ;;  %v7931_v42 = vunpack.c.l.bf16 %v7974_v32  ;;  %v7932_v43 = vunpack.c.h.bf16 %v7974_v32  ;;  %v7935_v45 = vunpack.c.l.bf16 %v7975_v33  ;;  %v7978_v46 = vld [vmem:[%s9340_s13 + $0x50] sm:$0xff]   ;;  %v7936_v49 = vunpack.c.h.bf16 %v7975_v33 }
  0x17   : > { %784 = vst.msk [vmem:[#allocation2 + $0xb0] sm:$0xff] %vm12444_vm1, %v9214_v3  ;;  %785 = vst.msk [vmem:[#allocation2 + $0xb8] sm:$0xff] %vm12444_vm1, %v9214_v3  ;;  %v7976_v39 = vld [vmem:[%s9340_s13 + $0x40] sm:$0xff]   ;;  %v7977_v44 = vld [vmem:[%s9340_s13 + $0x48] sm:$0xff]   ;;  %v992_v48 = vsel %vm9367_vm2, %v896_v35, 0.0  ;;  %v345_v59 = vand.u32 15, %v9372_v38  ;;  %v7947_v61 = vunpack.c.l.bf16 %v7978_v46  ;;  %v7948_v62 = vunpack.c.h.bf16 %v7978_v46 }
  0x18   : > { %786 = vst.msk [vmem:[#allocation2 + $0xc0] sm:$0xff] %vm12444_vm1, %v9214_v3  ;;  %787 = vst.msk [vmem:[#allocation2 + $0xc8] sm:$0xff] %vm12444_vm1, %v9214_v3  ;;  %v897_v47 = vld [vmem:[#allocation2 + $0xf] sm:$0xff]  ;;  %v7939_v50 = vunpack.c.l.bf16 %v7976_v39  ;;  %v7940_v51 = vunpack.c.h.bf16 %v7976_v39  ;;  %v7943_v53 = vunpack.c.l.bf16 %v7977_v44  ;;  %v7979_v54 = vld [vmem:[%s9340_s13 + $0x58] sm:$0xff]   ;;  %v7944_v60 = vunpack.c.h.bf16 %v7977_v44 }
  0x19   : > { %788 = vst.msk [vmem:[#allocation2 + $0xd0] sm:$0xff] %vm12444_vm1, %v9214_v3  ;;  %789 = vst.msk [vmem:[#allocation2 + $0xd8] sm:$0xff] %vm12444_vm1, %v9214_v3  ;;  %v7980_v55 = vld [vmem:[%s9340_s13 + $0x60] sm:$0xff]   ;;  %v1353_v7 = vsel %vm12445_vm0, %v9322_v5, 0  ;;  %v1024_v8 = vpack.c.bf16 %v897_v47, %v992_v48  ;;  %v7952_v4 = vunpack.c.h.bf16 %v7979_v54  ;;  %vm9409_vm3 = vcmp.ge.s32.totalorder %v331_v52, 1 }
  0x1a   : > { %790 = vst.msk [vmem:[#allocation2 + $0xe0] sm:$0xff] %vm12444_vm1, %v9214_v3  ;;  %791 = vst.msk [vmem:[#allocation2 + $0xe8] sm:$0xff] %vm12444_vm1, %v9214_v3  ;;  %v12652_v5 = vmov 0  ;;  %v287_v16 = vadd.s32 48, %v9330_v6  ;;  %v7955_v17 = vunpack.c.l.bf16 %v7980_v55  ;;  %v7304_v18 = vld [vmem:[%s12437_s1 + $0x6] sm:$0x3] }
  0x1b   : > { %792 = vst.msk [vmem:[#allocation2 + $0xf0] sm:$0xff] %vm12444_vm1, %v9214_v3  ;;  %793 = vst.msk [vmem:[#allocation2 + $0xf8] sm:$0xff] %vm12444_vm1, %v9214_v3  ;;  %v12653_v5 = vsel %vm9409_vm3, 4294967295, %v12652_v5  ;;  %vm9420_vm4 = vcmp.ge.s32.totalorder %v345_v59, 1  ;;  %v9430_v24 = vld [vmem:[%s12437_s1 + $0x8] sm:$0x3] }
  0x1c   : > { %794 = vst.msk [vmem:[#allocation2 + $0x100] sm:$0xff] %vm12444_vm1, %v9214_v3  ;;  %795 = vst.msk [vmem:[#allocation2 + $0x108] sm:$0xff] %vm12444_vm1, %v9214_v3  ;;  %v359_v35 = vand.u32 15, %v287_v16  ;;  %v2037_v44 = vsel %vm12445_vm0, %v7304_v18, 0  ;;  %v12664_v48 = vmov 0 }
  0x1d   : > { %796 = vst.msk [vmem:[#allocation2 + $0x110] sm:$0xff] %vm12444_vm1, %v9214_v3  ;;  %797 = vst.msk [vmem:[#allocation2 + $0x118] sm:$0xff] %vm12444_vm1, %v9214_v3 }
  0x1e   : > { %798 = vst.msk [vmem:[#allocation2 + $0x120] sm:$0xff] %vm12444_vm1, %v9214_v3  ;;  %799 = vst.msk [vmem:[#allocation2 + $0x128] sm:$0xff] %vm12444_vm1, %v9214_v3  ;;  %vm9462_vm5 = vcmp.ge.s32.totalorder %v359_v35, 1  ;;  %v12682_v35 = vmov 0 }
  0x1f   : > { %3869 = vst [vmem:[#allocation3] sm:$0xff] %v9214_v3  ;;  %3870 = vst [vmem:[#allocation3 + $0x8] sm:$0xff] %v9214_v3 }
  0x20   : > { %3871 = vst [vmem:[#allocation3 + $0x10] sm:$0xff] %v9214_v3  ;;  %3904 = vst [vmem:[#allocation3 + $0x118] sm:$0xff] %v9214_v3 }
  0x21   : > { %3905 = vst [vmem:[#allocation3 + $0x120] sm:$0xff] %v9214_v3  ;;  %3906 = vst [vmem:[#allocation3 + $0x128] sm:$0xff] %v9214_v3 }
  0x22   : > { %864 = vst.msk [vmem:[#allocation2 + $0x18] sm:$0xff] %vm12444_vm1, %v7907_v11  ;;  %865 = vst.msk [vmem:[#allocation2 + $0x20] sm:$0xff] %vm12444_vm1, %v7908_v12 }
  0x23   : > { %890 = vst.msk [vmem:[#allocation2 + $0xe8] sm:$0xff] %vm12444_vm1, %v7959_v13  ;;  %891 = vst.msk [vmem:[#allocation2 + $0xf0] sm:$0xff] %vm12444_vm1, %v7960_v14  ;;  %v7951_v13 = vunpack.c.l.bf16 %v7979_v54 }
  0x24   : > { %892 = vst.msk [vmem:[#allocation2 + $0xf8] sm:$0xff] %vm12444_vm1, %v7963_v20  ;;  %893 = vst.msk [vmem:[#allocation2 + $0x100] sm:$0xff] %vm12444_vm1, %v7964_v21  ;;  %v12655_v21 = vmov 0 }
  0x25   : > { %866 = vst.msk [vmem:[#allocation2 + $0x28] sm:$0xff] %vm12444_vm1, %v7911_v22  ;;  %867 = vst.msk [vmem:[#allocation2 + $0x30] sm:$0xff] %vm12444_vm1, %v7912_v23  ;;  %v12656_v21 = vsel %vm9420_vm4, 4294967295, %v12655_v21  ;;  %v289_v22 = vadd.s32 64, %v9330_v6  ;;  %v7956_v23 = vunpack.c.h.bf16 %v7980_v55 }
  0x26   : > { %868 = vst.msk [vmem:[#allocation2 + $0x38] sm:$0xff] %vm12444_vm1, %v7915_v25  ;;  %869 = vst.msk [vmem:[#allocation2 + $0x40] sm:$0xff] %vm12444_vm1, %v7916_v26 }
  0x27   : > { %870 = vst.msk [vmem:[#allocation2 + $0x48] sm:$0xff] %vm12444_vm1, %v7919_v30  ;;  %871 = vst.msk [vmem:[#allocation2 + $0x50] sm:$0xff] %vm12444_vm1, %v7920_v31  ;;  %v7983_v30 = vld [vmem:[%s9340_s13 + $0x78] sm:$0xff]  }
  0x28   : > { %872 = vst.msk [vmem:[#allocation2 + $0x58] sm:$0xff] %vm12444_vm1, %v7923_v36  ;;  %873 = vst.msk [vmem:[#allocation2 + $0x60] sm:$0xff] %vm12444_vm1, %v7924_v37  ;;  %v373_v37 = vand.u32 15, %v289_v22  ;;  %v7967_v39 = vunpack.c.l.bf16 %v7983_v30 }
  0x29   : > { %874 = vst.msk [vmem:[#allocation2 + $0x68] sm:$0xff] %vm12444_vm1, %v7927_v40  ;;  %875 = vst.msk [vmem:[#allocation2 + $0x70] sm:$0xff] %vm12444_vm1, %v7928_v41  ;;  %v1043_v56 = vld [vmem:[#allocation2 + $0x18] sm:$0xff]  ;;  %v1044_v57 = vld [vmem:[#allocation2 + $0x20] sm:$0xff]  ;;  %v12660_v41 = vmov 0 }
  0x2a   : > { %876 = vst.msk [vmem:[#allocation2 + $0x78] sm:$0xff] %vm12444_vm1, %v7931_v42  ;;  %877 = vst.msk [vmem:[#allocation2 + $0x80] sm:$0xff] %vm12444_vm1, %v7932_v43  ;;  %v1069_v58 = vld [vmem:[#allocation2 + $0xe8] sm:$0xff]  ;;  %v9395_v63 = vpack.c.bf16 %v1044_v57, %v1043_v56  ;;  %v1070_v0 = vld [vmem:[#allocation2 + $0xf0] sm:$0xff]  ;;  %v12661_v41 = vsel %vm9462_vm5, 4294967295, %v12660_v41  ;;  %v291_v43 = vadd.s32 80, %v9330_v6 }
  0x2b   : > { %878 = vst.msk [vmem:[#allocation2 + $0x88] sm:$0xff] %vm12444_vm1, %v7935_v45  ;;  %879 = vst.msk [vmem:[#allocation2 + $0x90] sm:$0xff] %vm12444_vm1, %v7936_v49  ;;  %v1071_v2 = vld [vmem:[#allocation2 + $0xf8] sm:$0xff]  ;;  %v1072_v3 = vld [vmem:[#allocation2 + $0x100] sm:$0xff]  ;;  %v1087_v9 = vpack.c.bf16 %v1070_v0, %v1069_v58  ;;  %vm9478_vm6 = vcmp.ge.s32.totalorder %v373_v37, 1  ;;  %v7968_v0 = vunpack.c.h.bf16 %v7983_v30 }
  0x2c   : > { %880 = vst.msk [vmem:[#allocation2 + $0x98] sm:$0xff] %vm12444_vm1, %v7939_v50  ;;  %881 = vst.msk [vmem:[#allocation2 + $0xa0] sm:$0xff] %vm12444_vm1, %v7940_v51  ;;  %v1088_v10 = vpack.c.bf16 %v1072_v3, %v1071_v2  ;;  %v1045_v11 = vld [vmem:[#allocation2 + $0x28] sm:$0xff]  ;;  %v1046_v12 = vld [vmem:[#allocation2 + $0x30] sm:$0xff]  ;;  %8361 = vmatmul.mubr.msk.bf16.vlgmr.msra.gmra.mxu0 %vm12444_vm1, %v9395_v63  ;;  %v12665_v48 = vsel %vm9478_vm6, 4294967295, %v12664_v48  ;;  %v293_v50 = vadd.s32 96, %v9330_v6 }
  0x2d   : > { %12650 = vst [vmem:[#allocation4_spill] sm:$0xff] %v9395_v63  ;;  %882 = vst.msk [vmem:[#allocation2 + $0xa8] sm:$0xff] %vm12444_vm1, %v7943_v53  ;;  %v9407_v14 = vpack.c.bf16 %v1046_v12, %v1045_v11  ;;  %v9413_v15 = vld [vmem:[#allocation2 + $0x17] sm:$0xff]  ;;  %8388 = vmatprep.mubr.msk.bf16.mxu1 %vm12444_vm1, %v1087_v9  ;;  %8427 = vmatpush3.bf16.msra.mxu0 %v1711_v1  ;;  %v1048_v20 = vld [vmem:[#allocation2 + $0x40] sm:$0xff]  ;;  %v387_v58 = vand.u32 15, %v291_v43  ;;  %v12670_v2 = vmov 0 }
  0x2e   : > { %883 = vst.msk [vmem:[#allocation2 + $0xb0] sm:$0xff] %vm12444_vm1, %v7944_v60  ;;  %884 = vst.msk [vmem:[#allocation2 + $0xb8] sm:$0xff] %vm12444_vm1, %v7947_v61  ;;  %v1047_v19 = vld [vmem:[#allocation2 + $0x38] sm:$0xff]  ;;  %8389 = vmatmul.mubr.msk.bf16.vlgmr.msra.gmra.mxu1 %vm12444_vm1, %v1088_v10  ;;  %v1049_v25 = vld [vmem:[#allocation2 + $0x48] sm:$0xff]  ;;  %v994_v29 = vsel %vm9409_vm3, %v9413_v15, 0.0  ;;  %9113 = vmatprep.subr.msk.bf16.mxu0 %vm12445_vm0, %v9430_v24  ;;  %v401_v60 = vand.u32 15, %v293_v50 }
  0x2f   : > { %885 = vst.msk [vmem:[#allocation2 + $0xc0] sm:$0xff] %vm12444_vm1, %v7948_v62  ;;  %12651 = vst [vmem:[#allocation5_spill] sm:$0xff] %v9407_v14  ;;  %8364 = vmatprep.mubr.msk.bf16.mxu0 %vm12444_vm1, %v9407_v14  ;;  %v1050_v26 = vld [vmem:[#allocation2 + $0x50] sm:$0xff]  ;;  %v9435_v27 = vld [vmem:[#allocation2 + $0x27] sm:$0xff]  ;;  %8393 = vmatpush3.bf16.msra.mxu1 %v1353_v7  ;;  %v9446_v31 = vpack.c.bf16 %v1048_v20, %v1047_v19  ;;  %v295_v61 = vadd.s32 112, %v9330_v6  ;;  %vm9508_vm7 = vcmp.ge.s32.totalorder %v387_v58, 1 }
  0x30   : > { %12654 = vst [vmem:[#allocation6_spill] sm:$0xff] %v12653_v5  ;;  %12657 = vst [vmem:[#allocation7_spill] sm:$0xff] %v12656_v21  ;;  %8394 = vmatprep.mubr.msk.bf16.mxu1 %vm12444_vm1, %v1024_v8  ;;  %v9439_v28 = vld [vmem:[#allocation2 + $0x1f] sm:$0xff]  ;;  %v9448_v32 = vld [vmem:[#allocation2 + $0x2f] sm:$0xff]  ;;  %v996_v33 = vsel %vm9420_vm4, %v9435_v27, 0.0  ;;  %9112 = vmatprep.subr.msk.bf16.mxu1 %vm12445_vm0, %v7304_v18  ;;  %v9456_v36 = vpack.c.bf16 %v1050_v26, %v1049_v25  ;;  %v12671_v2 = vsel %vm9508_vm7, 4294967295, %v12670_v2 }
  0x31   : > { %886 = vst.msk [vmem:[#allocation2 + $0xc8] sm:$0xff] %vm12444_vm1, %v7951_v13  ;;  %887 = vst.msk [vmem:[#allocation2 + $0xd0] sm:$0xff] %vm12444_vm1, %v7952_v4  ;;  %v1025_v38 = vpack.c.bf16 %v9439_v28, %v994_v29  ;;  %v1026_v40 = vpack.c.bf16 %v9448_v32, %v996_v33  ;;  %v9466_v42 = vld [vmem:[#allocation2 + $0x37] sm:$0xff]  ;;  %v9474_v45 = vld [vmem:[%s12437_s1 + $0xa] sm:$0x3]  ;;  %v297_v7 = vadd.s32 128, %v9330_v6 }
  0x32   : > { %888 = vst.msk [vmem:[#allocation2 + $0xd8] sm:$0xff] %vm12444_vm1, %v7955_v17  ;;  %889 = vst.msk [vmem:[#allocation2 + $0xe0] sm:$0xff] %vm12444_vm1, %v7956_v23  ;;  %v1051_v46 = vld [vmem:[#allocation2 + $0x58] sm:$0xff]  ;;  %v1052_v47 = vld [vmem:[#allocation2 + $0x60] sm:$0xff]  ;;  %v998_v54 = vsel %vm9462_vm5, %v9466_v42, 0.0  ;;  %vm9518_vm8 = vcmp.ge.s32.totalorder %v401_v60, 1 }
  0x33   : > { %12658 = vst [vmem:[#allocation8_spill] sm:$0xff] %v9446_v31  ;;  %12659 = vst [vmem:[#allocation9_spill] sm:$0xff] %v9456_v36  ;;  %v9482_v49 = vld [vmem:[#allocation2 + $0x47] sm:$0xff]  ;;  %v1054_v52 = vld [vmem:[#allocation2 + $0x70] sm:$0xff]  ;;  %v9492_v55 = vpack.c.bf16 %v1052_v47, %v1051_v46  ;;  %v12674_v10 = vmov 0  ;;  %v415_v12 = vand.u32 15, %v295_v61 }
  0x34   : > { %8365 = vmatmul.mubr.msk.bf16.gmra.mxu0 %vm12444_vm1, %v9446_v31  ;;  %12662 = vst [vmem:[#allocation10_spill] sm:$0xff] %v12661_v41  ;;  %894 = vst.msk [vmem:[#allocation2 + $0x108] sm:$0xff] %vm12444_vm1, %v7967_v39  ;;  %v1053_v51 = vld [vmem:[#allocation2 + $0x68] sm:$0xff]  ;;  %v9487_v53 = vld [vmem:[#allocation2 + $0x3f] sm:$0xff]  ;;  %v1000_v57 = vsel %vm9478_vm6, %v9482_v49, 0.0  ;;  %v12675_v10 = vsel %vm9518_vm8, 4294967295, %v12674_v10 }
  0x35   : > { %12663 = vst [vmem:[#allocation11_spill] sm:$0xff] %v9474_v45  ;;  %8368 = vmatprep.mubr.msk.bf16.mxu0 %vm12444_vm1, %v9456_v36  ;;  %12666 = vst [vmem:[#allocation12_spill] sm:$0xff] %v12665_v48  ;;  %v9494_v56 = vld [vmem:[#allocation2 + $0x4f] sm:$0xff]  ;;  %v9501_v59 = vpack.c.bf16 %v1054_v52, %v1053_v51  ;;  %v1027_v62 = vpack.c.bf16 %v9487_v53, %v998_v54  ;;  %v9512_v3 = vld [vmem:[#allocation2 + $0x57] sm:$0xff]  ;;  %v299_v13 = vadd.s32 144, %v9330_v6  ;;  %v301_v17 = vadd.s32 160, %v9330_v6 }
  0x36   : > { %8395 = vmatmul.mubr.msk.bf16.vlgmr.msra.gmra.mxu1 %vm12444_vm1, %v1025_v38  ;;  %12667 = vst [vmem:[#allocation13_spill] sm:$0xff] %v9492_v55  ;;  %12668 = vst [vmem:[#allocation14_spill] sm:$0xff] %v9494_v56  ;;  %v1028_v1 = vpack.c.bf16 %v9494_v56, %v1000_v57  ;;  %v1055_v8 = vld [vmem:[#allocation2 + $0x78] sm:$0xff]  ;;  %v1056_v9 = vld [vmem:[#allocation2 + $0x80] sm:$0xff]  ;;  %v303_v18 = vadd.s32 176, %v9330_v6  ;;  %v282_v19 = vadd.s32 8, %v9330_v6 }
  0x37   : > { %8398 = vmatprep.mubr.msk.bf16.mxu1 %vm12444_vm1, %v1026_v40  ;;  %8461 = vmatpush3.bf16.msra.mxu1 %v2037_v44  ;;  %12669 = vst [vmem:[#allocation15_spill] sm:$0xff] %v9501_v59  ;;  %12672 = vst [vmem:[#allocation16_spill] sm:$0xff] %v12671_v2  ;;  %v9522_v11 = vld [vmem:[#allocation2 + $0x67] sm:$0xff]  ;;  %v1058_v16 = vld [vmem:[#allocation2 + $0x90] sm:$0xff]  ;;  %v1002_v22 = vsel %vm9508_vm7, %v9512_v3, 0.0  ;;  %v305_v23 = vadd.s32 192, %v9330_v6  ;;  %v9536_v25 = vpack.c.bf16 %v1056_v9, %v1055_v8 }
  0x38   : > { %9114 = vmatprep.subr.msk.bf16.mxu1 %vm12445_vm0, %v9474_v45  ;;  %12673 = vst [vmem:[#allocation17_spill] sm:$0xff] %v9512_v3  ;;  %895 = vst.msk [vmem:[#allocation2 + $0x110] sm:$0xff] %vm12444_vm1, %v7968_v0  ;;  %v1057_v4 = vld [vmem:[#allocation2 + $0x88] sm:$0xff]  ;;  %v9530_v20 = vld [vmem:[#allocation2 + $0x5f] sm:$0xff]  ;;  %v1004_v29 = vsel %vm9518_vm8, %v9522_v11, 0.0  ;;  %v429_v30 = vand.u32 15, %v297_v7 }
  0x39   : > { %12676 = vst [vmem:[#allocation18_spill] sm:$0xff] %v12675_v10  ;;  %12677 = vst [vmem:[#allocation19_spill] sm:$0xff] %v9522_v11  ;;  %v9538_v26 = vld [vmem:[#allocation2 + $0x6f] sm:$0xff]  ;;  %v9543_v33 = vpack.c.bf16 %v1058_v16, %v1057_v4  ;;  %vm9545_vm9 = vcmp.ge.s32.totalorder %v415_v12, 1  ;;  %v443_v37 = vand.u32 15, %v299_v13  ;;  %v284_v38 = vadd.s32 24, %v9330_v6 }
  0x3a   : > { %12678 = vst [vmem:[#allocation20_spill] sm:$0xff] %v9530_v20  ;;  %12679 = vst [vmem:[#allocation21_spill] sm:$0xff] %v9536_v25  ;;  %v12683_v35 = vsel %vm9545_vm9, 4294967295, %v12682_v35  ;;  %v1029_v39 = vpack.c.bf16 %v9530_v20, %v1002_v22  ;;  %v9551_v40 = vld [vmem:[#allocation2 + $0x77] sm:$0xff]  ;;  %v457_v43 = vand.u32 15, %v301_v17  ;;  %v471_v44 = vand.u32 15, %v303_v18 }
  0x3b   : > { %12680 = vst [vmem:[#allocation22_spill] sm:$0xff] %v9538_v26  ;;  %12681 = vst [vmem:[#allocation23_spill] sm:$0xff] %v9543_v33  ;;  %v324_v46 = vand.u32 15, %v282_v19  ;;  %v1030_v47 = vpack.c.bf16 %v9538_v26, %v1004_v29  ;;  %v485_v50 = vand.u32 15, %v305_v23  ;;  %v307_v51 = vadd.s32 208, %v9330_v6  ;;  %v1059_v52 = vld [vmem:[#allocation2 + $0x98] sm:$0xff] }
  0x3c   : > { %8369 = vmatmul.mubr.msk.bf16.gmra.mxu0 %vm12444_vm1, %v9492_v55  ;;  %12684 = vst [vmem:[#allocation24_spill] sm:$0xff] %v12683_v35  ;;  %12685 = vst [vmem:[#allocation25_spill] sm:$0xff] %v9551_v40  ;;  %v1060_v54 = vld [vmem:[#allocation2 + $0xa0] sm:$0xff]  ;;  %vm9557_vm10 = vcmp.ge.s32.totalorder %v429_v30, 1  ;;  %v12686_v57 = vmov 0  ;;  %v1006_v60 = vsel %vm9545_vm9, %v9551_v40, 0.0 }
  0x3d   : > { %8372 = vmatprep.mubr.msk.bf16.mxu0 %vm12444_vm1, %v9501_v59  ;;  %v12687_v57 = vsel %vm9557_vm10, 4294967295, %v12686_v57  ;;  %v9563_v58 = vld [vmem:[#allocation2 + $0x7f] sm:$0xff]  ;;  %v1061_v61 = vld [vmem:[#allocation2 + $0xa8] sm:$0xff]  ;;  %vm9570_vm11 = vcmp.ge.s32.totalorder %v443_v37, 1  ;;  %v12691_v0 = vmov 0  ;;  %v1062_v7 = vld [vmem:[#allocation2 + $0xb0] sm:$0xff]  ;;  %v9603_v29 = vpack.c.bf16 %v1060_v54, %v1059_v52 }
  0x3e   : > { %8399 = vmatmul.mubr.msk.bf16.gmra.mxu1 %vm12444_vm1, %v1027_v62  ;;  %12688 = vst [vmem:[#allocation26_spill] sm:$0xff] %v12687_v57  ;;  %12689 = vst [vmem:[#allocation27_spill] sm:$0xff] %v9563_v58  ;;  %v9568_v62 = vld [vmem:[#allocation2 + $0x87] sm:$0xff]  ;;  %v12692_v0 = vsel %vm9570_vm11, 4294967295, %v12691_v0  ;;  %v9575_v8 = vld [vmem:[#allocation2 + $0x97] sm:$0xff]  ;;  %vm9577_vm12 = vcmp.ge.s32.totalorder %v457_v43, 1  ;;  %v1031_v30 = vpack.c.bf16 %v9563_v58, %v1006_v60  ;;  %v9612_v43 = vpack.c.bf16 %v1062_v7, %v1061_v61 }
  0x3f   : > { %8402 = vmatprep.mubr.msk.bf16.mxu1 %vm12444_vm1, %v1028_v1  ;;  %12690 = vst [vmem:[#allocation28_spill] sm:$0xff] %v9568_v62  ;;  %12693 = vst [vmem:[#allocation29_spill] sm:$0xff] %v12692_v0  ;;  %v338_v1 = vand.u32 15, %v284_v38  ;;  %v12695_v9 = vmov 0  ;;  %v9581_v12 = vld [vmem:[#allocation2 + $0xa7] sm:$0xff]  ;;  %vm9583_vm13 = vcmp.ge.s32.totalorder %v471_v44, 1 }
  0x40   : > { %12694 = vst [vmem:[#allocation30_spill] sm:$0xff] %v9575_v8  ;;  %v12696_v9 = vsel %vm9577_vm12, 4294967295, %v12695_v9  ;;  %12698 = vst [vmem:[#allocation32_spill] sm:$0xff] %v9581_v12  ;;  %v12699_v13 = vmov 0  ;;  %vm9587_vm14 = vcmp.lt.s32.totalorder %v324_v46, 15  ;;  %v12702_v4 = vmov 0 }
  0x41   : > { %12697 = vst [vmem:[#allocation31_spill] sm:$0xff] %v12696_v9  ;;  %v12700_v13 = vsel %vm9583_vm13, 4294967295, %v12699_v13  ;;  %v12703_v4 = vsel %vm9587_vm14, 4294967295, %v12702_v4  ;;  %v9592_v16 = vld [vmem:[#allocation2 + $0xb7] sm:$0xff]  ;;  %vm9596_vm15 = vcmp.ge.s32.totalorder %v485_v50, 1  ;;  %v12706_v18 = vmov 0 }
  0x42   : > { %12701 = vst [vmem:[#allocation33_spill] sm:$0xff] %v12700_v13  ;;  %12704 = vst [vmem:[#allocation34_spill] sm:$0xff] %v12703_v4  ;;  %v9594_v17 = vld [vmem:[#allocation2 + $0x11] sm:$0xff]  ;;  %v12707_v18 = vsel %vm9596_vm15, 4294967295, %v12706_v18  ;;  %v9600_v19 = vld [vmem:[#allocation2 + $0xc7] sm:$0xff]  ;;  %v499_v22 = vand.u32 15, %v307_v51 }
  0x43   : > { %12705 = vst [vmem:[#allocation35_spill] sm:$0xff] %v9592_v16  ;;  %12708 = vst [vmem:[#allocation36_spill] sm:$0xff] %v12707_v18  ;;  %v286_v23 = vadd.s32 40, %v9330_v6  ;;  %v9606_v37 = vld [vmem:[#allocation2 + $0x8f] sm:$0xff]  ;;  %v1008_v38 = vsel %vm9557_vm10, %v9568_v62, 0.0  ;;  %v1010_v44 = vsel %vm9570_vm11, %v9575_v8, 0.0 }
  0x44   : > { %8373 = vmatmul.mubr.msk.bf16.gmra.mxu0 %vm12444_vm1, %v9536_v25  ;;  %12709 = vst [vmem:[#allocation37_spill] sm:$0xff] %v9600_v19  ;;  %12710 = vst [vmem:[#allocation38_spill] sm:$0xff] %v9603_v29  ;;  %v12713_v46 = vmov 0  ;;  %v1063_v50 = vld [vmem:[#allocation2 + $0xb8] sm:$0xff]  ;;  %v1064_v51 = vld [vmem:[#allocation2 + $0xc0] sm:$0xff]  ;;  %v1012_v52 = vsel %vm9577_vm12, %v9581_v12, 0.0 }
  0x45   : > { %8376 = vmatprep.mubr.msk.bf16.mxu0 %vm12444_vm1, %v9543_v33  ;;  %12711 = vst [vmem:[#allocation39_spill] sm:$0xff] %v9606_v37  ;;  %12712 = vst [vmem:[#allocation40_spill] sm:$0xff] %v9612_v43  ;;  %v12716_v7 = vmov 0  ;;  %v9644_v33 = vld [vmem:[#allocation2 + $0xd7] sm:$0xff]  ;;  %v352_v25 = vand.u32 15, %v286_v23  ;;  %vm12719_vm12 = vcmask 31744   ;;  %v9666_v31 = vpack.c.bf16 %v1064_v51, %v1063_v50 }
  0x46   : > { %8403 = vmatmul.mubr.msk.bf16.gmra.mxu1 %vm12444_vm1, %v1029_v39  ;;  %v309_v39 = vadd.s32 224, %v9330_v6  ;;  %v1065_v54 = vld [vmem:[#allocation2 + $0xc8] sm:$0xff]  ;;  %v288_v59 = vadd.s32 56, %v9330_v6  ;;  %vm12720_vm11 = vmmov %vm12719_vm12  ;;  %v292_v61 = vadd.s32 88, %v9330_v6  ;;  %v1066_v55 = vld [vmem:[#allocation2 + $0xd0] sm:$0xff]  ;;  %v296_v36 = vadd.s32 120, %v9330_v6 }
  0x47   : > { %8406 = vmatprep.mubr.msk.bf16.mxu1 %vm12444_vm1, %v1030_v47  ;;  %vm9617_vm1 = vcmp.lt.s32.totalorder %v338_v1, 15  ;;  %v9623_v47 = vsel %vm12445_vm0, %v9430_v24, 0  ;;  %v1032_v24 = vpack.c.bf16 %v9606_v37, %v1008_v38  ;;  %v9638_v1 = vld [vmem:[#allocation2 + $0x21] sm:$0xff]  ;;  %vm9640_vm0 = vcmp.ge.s32.totalorder %v499_v22, 1  ;;  %vm12722_vm10 = vmmov %vm12720_vm11  ;;  %v9656_v23 = vld [vmem:[#allocation2 + $0xaf] sm:$0xff]  ;;  %12724 = vst [vmem:[#allocation45_spill] sm:$0xff] %v9666_v31 }
  0x48   : > { %v12714_v46 = vsel %vm9617_vm1, 4294967295, %v12713_v46  ;;  %v12717_v7 = vsel %vm9640_vm0, 4294967295, %v12716_v7  ;;  %v513_v60 = vand.u32 15, %v309_v39  ;;  %v9651_v38 = vld [vmem:[#allocation2 + $0x9f] sm:$0xff]  ;;  %v290_v22 = vadd.s32 72, %v9330_v6  ;;  %12723 = vst [vmem:[#allocation44_spill] sm:$0xff] %v9656_v23 }
  0x49   : > { %12715 = vst [vmem:[#allocation41_spill] sm:$0xff] %v12714_v46  ;;  %12718 = vst [vmem:[#allocation42_spill] sm:$0xff] %v12717_v7  ;;  %v300_v14 = vadd.s32 152, %v9330_v6  ;;  %v1067_v63 = vld [vmem:[#allocation2 + $0xd8] sm:$0xff]  ;;  %v1068_v9 = vld [vmem:[#allocation2 + $0xe0] sm:$0xff]  ;;  %v12726_v39 = vmov 0  ;;  %v9686_v12 = vpack.c.bf16 %v1066_v55, %v1065_v54  ;;  %v1034_v8 = vpack.c.bf16 %v9656_v23, %v1012_v52 }
  0x4a   : > { %12721 = vst [vmem:[#allocation43_spill] sm:$0xff] %v9651_v38  ;;  %v9675_v0 = vld [vmem:[#allocation2 + $0x31] sm:$0xff]  ;;  %v9681_v50 = vld [vmem:[#allocation2 + $0xe7] sm:$0xff]  ;;  %v366_v51 = vand.u32 15, %v288_v59  ;;  %v380_v37 = vand.u32 15, %v290_v22  ;;  %v394_v57 = vand.u32 15, %v292_v61 }
  0x4b   : > { %12732 = vst [vmem:[#allocation48_spill] sm:$0xff] %v9686_v12  ;;  %v422_v62 = vand.u32 15, %v296_v36  ;;  %v450_v58 = vand.u32 15, %v300_v14  ;;  %v9691_v26 = vadd.s32 168, %v9330_v6  ;;  %v9694_v59 = vadd.s32 184, %v9330_v6  ;;  %v1516_v55 = vld [vmem:[#allocation2 + $0x9] sm:$0xff] }
  0x4c   : > { %8377 = vmatmul.mubr.msk.bf16.gmra.mxu0 %vm12719_vm12, %v9603_v29  ;;  %vm9677_vm12 = vcmp.ge.s32.totalorder %v513_v60, 1  ;;  %v12729_v29 = vmov 0  ;;  %v9699_v54 = vadd.s32 200, %v9330_v6  ;;  %v9706_v14 = vpack.c.bf16 %v1068_v9, %v1067_v63  ;;  %v9715_v52 = vld [vmem:[#allocation2 + $0xbf] sm:$0xff]  ;;  %v9717_v61 = vld [vmem:[#allocation2 + $0xcf] sm:$0xff] }
  0x4d   : > { %8380 = vmatprep.mubr.msk.bf16.mxu0 %vm12720_vm11, %v9612_v43  ;;  %v294_v43 = vadd.s32 104, %v9330_v6  ;;  %vm12725_vm11 = vmmov %vm12722_vm10  ;;  %v12730_v29 = vsel %vm9677_vm12, 4294967295, %v12729_v29  ;;  %12736 = vst [vmem:[#allocation50_spill] sm:$0xff] %v9715_v52  ;;  %vm9719_vm8 = vcmp.lt.s32.totalorder %v366_v51, 15  ;;  %v12738_v22 = vmov 0  ;;  %v9753_v36 = vld [vmem:[#allocation2 + $0x29] sm:$0xff] }
  0x4e   : > { %8407 = vmatmul.mubr.msk.bf16.gmra.mxu1 %vm12722_vm10, %v1031_v30  ;;  %v298_v30 = vadd.s32 136, %v9330_v6  ;;  %vm9671_vm10 = vcmp.lt.s32.totalorder %v352_v25, 15  ;;  %12731 = vst [vmem:[#allocation47_spill] sm:$0xff] %v12730_v29  ;;  %v1033_v25 = vpack.c.bf16 %v9651_v38, %v1010_v44  ;;  %v9702_v44 = vadd.s32 216, %v9330_v6  ;;  %vm12733_vm9 = vmmov %vm12725_vm11  ;;  %v9781_v13 = vld [vmem:[#allocation2 + $0x81] sm:$0xff]  ;;  %v9807_v20 = vld [vmem:[#allocation2 + $0xb1] sm:$0xff] }
  0x4f   : > { %8410 = vmatprep.mubr.msk.bf16.mxu1 %vm12725_vm11, %v1032_v24  ;;  %v12727_v39 = vsel %vm9671_vm10, 4294967295, %v12726_v39  ;;  %v9684_v24 = vadd.s32 240, %v9330_v6  ;;  %v408_v35 = vand.u32 15, %v294_v43  ;;  %12734 = vst [vmem:[#allocation49_spill] sm:$0xff] %v9706_v14  ;;  %12737 = vst [vmem:[#allocation51_spill] sm:$0xff] %v9717_v61  ;;  %v12739_v22 = vsel %vm9719_vm8, 4294967295, %v12738_v22 }
  0x50   : > { %12728 = vst [vmem:[#allocation46_spill] sm:$0xff] %v12727_v39  ;;  %v436_v60 = vand.u32 15, %v298_v30  ;;  %12740 = vst [vmem:[#allocation52_spill] sm:$0xff] %v12739_v22  ;;  %v12741_v9 = vmov 0  ;;  %vm9728_vm7 = vcmp.lt.s32.totalorder %v394_v57, 15  ;;  %v12744_v30 = vmov 0 }
  0x51   : > { %v527_v63 = vand.u32 15, %v9684_v24  ;;  %v12745_v30 = vsel %vm9728_vm7, 4294967295, %v12744_v30  ;;  %v9735_v43 = vld [vmem:[#allocation2 + $0x51] sm:$0xff]  ;;  %v12748_v51 = vmov 0  ;;  %vm9741_vm5 = vcmp.lt.s32.totalorder %v422_v62, 15  ;;  %12764 = vst [vmem:[#allocation60_spill] sm:$0xff] %v9807_v20 }
  0x52   : > { %12746 = vst [vmem:[#allocation54_spill] sm:$0xff] %v12745_v30  ;;  %v12751_v24 = vmov 0  ;;  %vm9745_vm4 = vcmp.lt.s32.totalorder %v436_v60, 15  ;;  %vm9749_vm3 = vcmp.lt.s32.totalorder %v450_v58, 15  ;;  %v12757_v57 = vmov 0  ;;  %v9826_v3 = vld [vmem:[#allocation2 + $0x99] sm:$0xff] }
  0x53   : > { %v12752_v24 = vsel %vm9741_vm5, 4294967295, %v12751_v24  ;;  %v12758_v57 = vsel %vm9749_vm3, 4294967295, %v12757_v57  ;;  %v464_v62 = vand.u32 15, %v9691_v26  ;;  %v492_v60 = vand.u32 15, %v9699_v54  ;;  %v9777_v54 = vld [vmem:[#allocation2 + $0x61] sm:$0xff] }
  0x54   : > { %8381 = vmatmul.mubr.msk.bf16.gmra.mxu0 %vm12725_vm11, %v9666_v31  ;;  %vm12735_vm11 = vmmov %vm12733_vm9  ;;  %12753 = vst [vmem:[#allocation56_spill] sm:$0xff] %v12752_v24  ;;  %v478_v31 = vand.u32 15, %v9694_v59  ;;  %v506_v23 = vand.u32 15, %v9702_v44  ;;  %v12760_v58 = vsel %vm9583_vm13, %v9592_v16, 0.0  ;;  %v12761_v10 = vsel %vm9587_vm14, %v9594_v17, 0.0  ;;  %v9779_v44 = vld [vmem:[#allocation2 + $0x71] sm:$0xff] }
  0x55   : > { %8384 = vmatprep.mubr.msk.bf16.mxu0 %vm12733_vm9, %v9686_v12  ;;  %vm9724_vm9 = vcmp.lt.s32.totalorder %v380_v37, 15  ;;  %vm12747_vm6 = vmmov %vm12735_vm11  ;;  %v12754_v37 = vmov 0  ;;  %12759 = vst [vmem:[#allocation58_spill] sm:$0xff] %v12758_v57  ;;  %v9755_v12 = vld [vmem:[#allocation2 + $0x39] sm:$0xff]  ;;  %v1035_v38 = vpack.c.bf16 %v9715_v52, %v12760_v58  ;;  %v1644_v40 = vpack.c.bf16 %v12761_v10, %v1516_v55  ;;  %v9783_v16 = vld [vmem:[#allocation2 + $0x91] sm:$0xff] }
  0x56   : > { %8411 = vmatmul.mubr.msk.bf16.gmra.mxu1 %vm12735_vm11, %v1033_v25  ;;  %v12742_v9 = vsel %vm9724_vm9, 4294967295, %v12741_v9  ;;  %v9733_v25 = vld [vmem:[#allocation2 + $0x41] sm:$0xff]  ;;  %vm9737_vm11 = vcmp.lt.s32.totalorder %v408_v35, 15  ;;  %v12755_v37 = vsel %vm9745_vm4, 4294967295, %v12754_v37  ;;  %v9757_v35 = vld [vmem:[#allocation2 + $0x49] sm:$0xff]  ;;  %v12762_v26 = vsel %vm9596_vm15, %v9600_v19, 0.0  ;;  %vm12776_vm15 = vmmov %vm12747_vm6 }
  0x57   : > { %12743 = vst [vmem:[#allocation53_spill] sm:$0xff] %v12742_v9  ;;  %8414 = vmatprep.mubr.msk.bf16.mxu1 %vm12747_vm6, %v1034_v8  ;;  %v12749_v51 = vsel %vm9737_vm11, 4294967295, %v12748_v51  ;;  %12756 = vst [vmem:[#allocation57_spill] sm:$0xff] %v12755_v37  ;;  %v1518_v8 = vld [vmem:[#allocation2 + $0x19] sm:$0xff]  ;;  %v1036_v59 = vpack.c.bf16 %v9717_v61, %v12762_v26  ;;  %v9787_v52 = vld [vmem:[#allocation2 + $0x69] sm:$0xff]  ;;  %v2559_v55 = vsel %vm9587_vm14, %v9638_v1, 0.0 }
  0x58   : > { %12750 = vst [vmem:[#allocation55_spill] sm:$0xff] %v12749_v51  ;;  %12763 = vst [vmem:[#allocation59_spill] sm:$0xff] %v9783_v16  ;;  %v9785_v58 = vld [vmem:[#allocation2 + $0x59] sm:$0xff]  ;;  %v9791_v10 = vld [vmem:[#allocation2 + $0x89] sm:$0xff]  ;;  %v2561_v26 = vsel %vm9617_vm1, %v9675_v0, 0.0  ;;  %v2563_v61 = vsel %vm9671_vm10, %v9733_v25, 0.0  ;;  %v9809_v2 = vpack.c.bf16 %v2559_v55, %v1518_v8 }
  0x59   : > { %v9789_v17 = vld [vmem:[#allocation2 + $0x79] sm:$0xff]  ;;  %v2565_v18 = vsel %vm9719_vm8, %v9735_v43, 0.0  ;;  %v9805_v19 = vld [vmem:[#allocation2 + $0xa1] sm:$0xff]  ;;  %v9812_v4 = vpack.c.bf16 %v2561_v26, %v9753_v36  ;;  %v9815_v11 = vpack.c.bf16 %v2563_v61, %v9755_v12  ;;  %vm9822_vm14 = vcmp.ge.s32.totalorder %v527_v63, 1  ;;  %v9828_v55 = vld [vmem:[#allocation2 + $0xa9] sm:$0xff] }
  0x5a   : > { %12765 = vst [vmem:[#allocation61_spill] sm:$0xff] %v9809_v2  ;;  %v9818_v56 = vpack.c.bf16 %v2565_v18, %v9757_v35  ;;  %v12769_v48 = vmov 0  ;;  %v2567_v26 = vsel %vm9724_vm9, %v9777_v54, 0.0  ;;  %v2569_v18 = vsel %vm9728_vm7, %v9779_v44, 0.0  ;;  %v9989_v9 = vld [vmem:[#allocation2 + $0xf9] sm:$0xff] }
  0x5b   : > { %12766 = vst [vmem:[#allocation62_spill] sm:$0xff] %v9812_v4  ;;  %12767 = vst [vmem:[#allocation63_spill] sm:$0xff] %v9815_v11  ;;  %v12770_v48 = vsel %vm9822_vm14, 4294967295, %v12769_v48  ;;  %v2571_v61 = vsel %vm9737_vm11, %v9781_v13, 0.0  ;;  %v2573_v63 = vsel %vm9741_vm5, %v9783_v16, 0.0  ;;  %v9849_v11 = vpack.c.bf16 %v2569_v18, %v9787_v52  ;;  %v9862_v16 = vld [vmem:[#allocation2 + $0xef] sm:$0xff] }
  0x5c   : > { %12768 = vst [vmem:[#allocation64_spill] sm:$0xff] %v9818_v56  ;;  %8385 = vmatmul.mubr.msk.bf16.gmra.mxu0 %vm12747_vm6, %v9706_v14  ;;  %12771 = vst [vmem:[#allocation65_spill] sm:$0xff] %v12770_v48  ;;  %v9843_v14 = vld [vmem:[#allocation2 + $0xdf] sm:$0xff]  ;;  %v9846_v56 = vpack.c.bf16 %v2567_v26, %v9785_v58  ;;  %v9852_v4 = vpack.c.bf16 %v2571_v61, %v9789_v17  ;;  %v9855_v2 = vpack.c.bf16 %v2573_v63, %v9791_v10  ;;  %v12778_v26 = vmov 0 }
  0x5d   : > { %8428 = vmatprep.mubr.msk.bf16.mxu0 %vm12747_vm6, %v1644_v40  ;;  %12773 = vst [vmem:[#allocation67_spill] sm:$0xff] %v9849_v11  ;;  %v12777_v40 = vsel %vm9617_vm1, %v9638_v1, 0.0  ;;  %vm9864_vm6 = vcmp.lt.s32.totalorder %v464_v62, 15  ;;  %v9868_v18 = vld [vmem:[#allocation2 + $0xb9] sm:$0xff]  ;;  %v9870_v61 = vld [vmem:[#allocation2 + $0xc1] sm:$0xff]  ;;  %v2577_v1 = vsel %vm9749_vm3, %v9807_v20, 0.0 }
  0x5e   : > { %12772 = vst [vmem:[#allocation66_spill] sm:$0xff] %v9846_v56  ;;  %12774 = vst [vmem:[#allocation68_spill] sm:$0xff] %v9852_v4  ;;  %8415 = vmatmul.mubr.msk.bf16.gmra.mxu1 %vm12776_vm15, %v1035_v38  ;;  %v1645_v45 = vpack.c.bf16 %v12777_v40, %v1518_v8  ;;  %v12779_v26 = vsel %vm9864_vm6, 4294967295, %v12778_v26  ;;  %v9872_v4 = vld [vmem:[#allocation2 + $0xc9] sm:$0xff]  ;;  %v2575_v38 = vsel %vm9745_vm4, %v9805_v19, 0.0  ;;  %vm9881_vm1 = vcmp.lt.s32.totalorder %v478_v31, 15 }
  0x5f   : > { %12775 = vst [vmem:[#allocation69_spill] sm:$0xff] %v9855_v2  ;;  %12780 = vst [vmem:[#allocation70_spill] sm:$0xff] %v12779_v26  ;;  %8418 = vmatprep.mubr.msk.bf16.mxu1 %vm12776_vm15, %v1036_v59  ;;  %v12781_v8 = vmov 0  ;;  %v9885_v62 = vld [vmem:[#allocation2 + $0xd1] sm:$0xff]  ;;  %v9887_v63 = vld [vmem:[#allocation2 + $0xd9] sm:$0xff]  ;;  %v9892_v46 = vpack.c.bf16 %v2575_v38, %v9826_v3  ;;  %v9895_v2 = vpack.c.bf16 %v2577_v1, %v9828_v55  ;;  %v2579_v59 = vsel %vm9864_vm6, %v9870_v61, 0.0 }
  0x60   : > { %v12782_v8 = vsel %vm9881_vm1, 4294967295, %v12781_v8  ;;  %v9889_v40 = vld [vmem:[#allocation2 + $0xe1] sm:$0xff]  ;;  %vm9900_vm15 = vcmp.lt.s32.totalorder %v492_v60, 15  ;;  %v12786_v31 = vmov 0  ;;  %v310_v11 = vadd.s32 232, %v9330_v6  ;;  %v9905_v56 = vld [vmem:[#allocation2 + $0xf1] sm:$0xff] }
  0x61   : > { %12783 = vst [vmem:[#allocation71_spill] sm:$0xff] %v12782_v8  ;;  %12784 = vst [vmem:[#allocation72_spill] sm:$0xff] %v9892_v46  ;;  %v12787_v31 = vsel %vm9900_vm15, 4294967295, %v12786_v31  ;;  %v9908_v20 = vpack.c.bf16 %v2579_v59, %v9868_v18  ;;  %v2581_v38 = vsel %vm9881_vm1, %v9885_v62, 0.0  ;;  %v12790_v1 = vsel %vm9671_vm10, %v9675_v0, 0.0 }
  0x62   : > { %12785 = vst [vmem:[#allocation73_spill] sm:$0xff] %v9895_v2  ;;  %12788 = vst [vmem:[#allocation74_spill] sm:$0xff] %v12787_v31  ;;  %v1646_v60 = vpack.c.bf16 %v12790_v1, %v9753_v36  ;;  %vm9918_vm13 = vcmp.lt.s32.totalorder %v506_v23, 15  ;;  %v12791_v2 = vmov 0  ;;  %v9925_v46 = vld [vmem:[%s12437_s1 + $0xc] sm:$0x3]  ;;  %v9928_v59 = vpack.c.bf16 %v2581_v38, %v9872_v4 }
  0x63   : > { %12789 = vst [vmem:[#allocation75_spill] sm:$0xff] %v9908_v20  ;;  %v12792_v2 = vsel %vm9918_vm13, 4294967295, %v12791_v2  ;;  %v2583_v20 = vsel %vm9900_vm15, %v9889_v40, 0.0  ;;  %v12795_v0 = vsel %vm9640_vm0, %v9644_v33, 0.0  ;;  %v9938_v36 = vld [vmem:[#allocation2 + $0xf7] sm:$0xff]  ;;  %v12797_v38 = vsel %vm9677_vm12, %v9681_v50, 0.0 }
  0x64   : > { %12793 = vst [vmem:[#allocation76_spill] sm:$0xff] %v12792_v2  ;;  %12794 = vst [vmem:[#allocation77_spill] sm:$0xff] %v9928_v59  ;;  %v1037_v23 = vpack.c.bf16 %v9843_v14, %v12795_v0  ;;  %v9941_v1 = vpack.c.bf16 %v2583_v20, %v9887_v63  ;;  %v1038_v39 = vpack.c.bf16 %v9862_v16, %v12797_v38  ;;  %v9948_v59 = vld [vmem:[#allocation2 + $0xe9] sm:$0xff]  ;;  %v2585_v7 = vsel %vm9918_vm13, %v9905_v56, 0.0  ;;  %v9963_v38 = vld [vmem:[#allocation2 + $0xff] sm:$0xff] }
  0x65   : > { %vm12798_vm10 = vcmask 31744   ;;  %v1619_v0 = vsel %vm9719_vm8, %v9733_v25, 0.0  ;;  %v520_v20 = vand.u32 15, %v310_v11  ;;  %v1022_v11 = vsel %vm9822_vm14, %v9938_v36, 0.0 }
  0x66   : > { %12796 = vst [vmem:[#allocation78_spill] sm:$0xff] %v9941_v1  ;;  %8429 = vmatmul.mubr.msk.bf16.vlgmr.msra.gmra.mxu0 %vm12798_vm10, %v1645_v45  ;;  %v9958_v1 = vpack.c.bf16 %v2585_v7, %v9948_v59  ;;  %vm12799_vm12 = vmmov %vm12798_vm10  ;;  %v1621_v45 = vsel %vm9724_vm9, %v9735_v43, 0.0  ;;  %v1647_v7 = vpack.c.bf16 %v1619_v0, %v9755_v12  ;;  %v9983_v43 = vld [vmem:[#allocation2 + $0x101] sm:$0xff]  ;;  %v1623_v12 = vsel %vm9728_vm7, %v9777_v54, 0.0 }
  0x67   : > { %8495 = vmatpush3.bf16.msra.mxu0 %v9623_v47  ;;  %8432 = vmatprep.mubr.msk.bf16.mxu0 %vm12799_vm12, %v1646_v60  ;;  %vm12800_vm0 = vmmov %vm12798_vm10  ;;  %vm12801_vm10 = vcmask 1041408   ;;  %v1938_v47 = vsel %vm9367_vm2, %v9413_v15, 0.0  ;;  %v1648_v25 = vpack.c.bf16 %v1621_v45, %v9757_v35  ;;  %v12803_v60 = vmov 0 }
  0x68   : > { %8419 = vmatmul.mubr.msk.bf16.gmra.mxu1 %vm12800_vm0, %v1037_v23  ;;  %9115 = vmatprep.subr.msk.bf16.mxu0 %vm12801_vm10, %v9925_v46  ;;  %vm12802_vm8 = vmmov %vm12800_vm0  ;;  %vm9979_vm0 = vcmp.lt.s32.totalorder %v520_v20, 15  ;;  %v1970_v35 = vpack.c.bf16 %v9439_v28, %v1938_v47  ;;  %v1625_v0 = vsel %vm9737_vm11, %v9779_v44, 0.0  ;;  %vm12810_vm7 = vnez %v12656_v21 }
  0x69   : > { %8422 = vmatprep.mubr.msk.bf16.mxu1 %vm12802_vm8, %v1038_v39  ;;  %v12804_v60 = vsel %vm9979_vm0, 4294967295, %v12803_v60  ;;  %v1039_v39 = vpack.c.bf16 %v9963_v38, %v1022_v11  ;;  %vm12806_vm8 = vnez %v12653_v5  ;;  %v2587_v15 = vsel %vm9979_vm0, %v9983_v43, 0.0  ;;  %vm12807_vm10 = vmmov %vm12799_vm12 }
  0x6a   : > { %12805 = vst [vmem:[#allocation79_spill] sm:$0xff] %v12804_v60  ;;  %v1940_v23 = vsel %vm12806_vm8, %v9435_v27, 0.0  ;;  %v10002_v20 = vpack.c.bf16 %v2587_v15, %v9989_v9  ;;  %vm12808_vm9 = vmmov %vm12807_vm10  ;;  %v1649_v27 = vpack.c.bf16 %v1623_v12, %v9785_v58  ;;  %v1942_v28 = vsel %vm12810_vm7, %v9466_v42, 0.0  ;;  %v12822_v12 = vld [vmem:[#allocation19_spill] sm:$0xff] }
  0x6b   : > { %vm12809_vm8 = vmmov %vm12808_vm9  ;;  %v1650_v54 = vpack.c.bf16 %v1625_v0, %v9787_v52  ;;  %v1971_v44 = vpack.c.bf16 %v9448_v32, %v1940_v23  ;;  %v1627_v45 = vsel %vm9741_vm5, %v9781_v13, 0.0  ;;  %v1972_v47 = vpack.c.bf16 %v9487_v53, %v1942_v28  ;;  %v10029_v32 = vld [vmem:[%s12437_s1 + $0xe] sm:$0x3]  ;;  %v12819_v13 = vld [vmem:[#allocation12_spill] sm:$0xff] }
  0x6c   : > { %vm12816_vm5 = vmmov %vm12809_vm8  ;;  %v12818_v53 = vld [vmem:[#allocation17_spill] sm:$0xff]  ;;  %v12821_v23 = vld [vmem:[#allocation14_spill] sm:$0xff] }
  0x6d   : > { %vm12817_vm11 = vmmov %vm12816_vm5 }
  0x6e   : > { %8433 = vmatmul.mubr.msk.bf16.gmra.mxu0 %vm12799_vm12, %v1647_v7  ;;  %vm12811_vm12 = vnez %v12661_v41  ;;  %v12812_v7 = vld [vmem:[#allocation59_spill] sm:$0xff] }
  0x6f   : > { %8436 = vmatprep.mubr.msk.bf16.mxu0 %vm12807_vm10, %v1648_v25  ;;  %v1944_v11 = vsel %vm12811_vm12, %v9482_v49, 0.0  ;;  %v1629_v58 = vsel %vm9745_vm4, %v12812_v7, 0.0  ;;  %v12813_v25 = vld [vmem:[#allocation11_spill] sm:$0xff]  ;;  %vm12815_vm10 = vmmov %vm12809_vm8  ;;  %v1651_v49 = vpack.c.bf16 %v1627_v45, %v9789_v17  ;;  %vm12820_vm4 = vnez %v12819_v13  ;;  %v12825_v17 = vld [vmem:[#allocation20_spill] sm:$0xff] }
  0x70   : > { %8423 = vmatmul.mubr.msk.bf16.gmra.mxu1 %vm12808_vm9, %v1039_v39  ;;  %vm12814_vm9 = vcmask 1041408   ;;  %v1946_v52 = vsel %vm12820_vm4, %v12818_v53, 0.0  ;;  %v1652_v39 = vpack.c.bf16 %v1629_v58, %v9791_v10  ;;  %v1973_v15 = vpack.c.bf16 %v12821_v23, %v1944_v11  ;;  %v12827_v45 = vld [vmem:[#allocation25_spill] sm:$0xff]  ;;  %v12833_v7 = vld [vmem:[#allocation22_spill] sm:$0xff]  ;;  %v12835_v53 = vld [vmem:[#allocation28_spill] sm:$0xff] }
  0x71   : > { %8462 = vmatprep.mubr.msk.bf16.mxu1 %vm12809_vm8, %v1970_v35  ;;  %v2657_v42 = vsel %vm12814_vm9, %v12813_v25, 0  ;;  %v12823_v35 = vld [vmem:[#allocation16_spill] sm:$0xff]  ;;  %v1974_v28 = vpack.c.bf16 %v12825_v17, %v1946_v52  ;;  %v12834_v25 = vld [vmem:[#allocation27_spill] sm:$0xff] }
  0x72   : > { %v12836_v52 = vld [vmem:[#allocation24_spill] sm:$0xff]  ;;  %v12845_v17 = vld [vmem:[#allocation43_spill] sm:$0xff] }
  0x76   : > { %8437 = vmatmul.mubr.msk.bf16.gmra.mxu0 %vm12809_vm8, %v1649_v27  ;;  %vm12824_vm8 = vnez %v12823_v35  ;;  %v1631_v27 = vsel %vm9749_vm3, %v9805_v19, 0.0 }
  0x77   : > { %8440 = vmatprep.mubr.msk.bf16.mxu0 %vm12815_vm10, %v1650_v54  ;;  %v1948_v0 = vsel %vm12824_vm8, %v12822_v12, 0.0  ;;  %v12826_v54 = vld [vmem:[#allocation60_spill] sm:$0xff]  ;;  %v1653_v19 = vpack.c.bf16 %v1631_v27, %v9826_v3  ;;  %v12839_v3 = vld [vmem:[#allocation26_spill] sm:$0xff]  ;;  %v312_v12 = vadd.s32 248, %v9330_v6  ;;  %v12844_v27 = vld [vmem:[#allocation39_spill] sm:$0xff] }
  0x78   : > { %8463 = vmatmul.mubr.msk.bf16.vlgmr.msra.gmra.mxu1 %vm12816_vm5, %v1971_v44  ;;  %v1633_v44 = vsel %vm9864_vm6, %v12826_v54, 0.0  ;;  %v1975_v58 = vpack.c.bf16 %v12833_v7, %v1948_v0  ;;  %vm12837_vm6 = vnez %v12836_v52  ;;  %v12846_v54 = vld [vmem:[#allocation32_spill] sm:$0xff]  ;;  %v3187_v52 = vld [vmem:[#allocation2 + $0x70] sm:$0xff] }
  0x79   : > { %8466 = vmatprep.mubr.msk.bf16.mxu1 %vm12817_vm11, %v1972_v47  ;;  %8529 = vmatpush3.bf16.msra.mxu1 %v2657_v42  ;;  %v12828_v47 = vld [vmem:[#allocation18_spill] sm:$0xff]  ;;  %vm12830_vm11 = vmmov %vm12815_vm10  ;;  %v1654_v11 = vpack.c.bf16 %v1633_v44, %v9828_v55  ;;  %v1952_v23 = vsel %vm12837_vm6, %v12835_v53, 0.0  ;;  %v12847_v44 = vld [vmem:[#allocation29_spill] sm:$0xff] }
  0x7a   : > { %9116 = vmatprep.subr.msk.bf16.mxu1 %vm12814_vm9, %v10029_v32  ;;  %vm12829_vm5 = vnez %v12828_v47  ;;  %vm12831_vm9 = vmmov %vm12815_vm10 }
  0x7b   : > { %v1950_v10 = vsel %vm12829_vm5, %v12827_v45, 0.0  ;;  %vm12832_vm8 = vmmov %vm12831_vm9  ;;  %v1639_v45 = vsel %vm9918_vm13, %v9889_v40, 0.0 }
  0x7c   : > { %v1976_v42 = vpack.c.bf16 %v12834_v25, %v1950_v10  ;;  %vm12843_vm3 = vmmov %vm12831_vm9  ;;  %v1641_v10 = vsel %vm9979_vm0, %v9905_v56, 0.0  ;;  %v1657_v7 = vpack.c.bf16 %v1639_v45, %v9887_v63  ;;  %v12856_v56 = vmov 0  ;;  %v12863_v63 = vld [vmem:[#allocation37_spill] sm:$0xff] }
  0x7d   : > { %v1658_v40 = vpack.c.bf16 %v1641_v10, %v9948_v59  ;;  %v12864_v59 = vld [vmem:[#allocation33_spill] sm:$0xff] }
  0x7e   : > { %8441 = vmatmul.mubr.msk.bf16.gmra.mxu0 %vm12830_vm11, %v1651_v49  ;;  %v1635_v49 = vsel %vm9881_vm1, %v9870_v61, 0.0  ;;  %vm12841_vm11 = vmmov %vm12831_vm9  ;;  %v10145_v45 = vld [vmem:[#allocation2 + $0x107] sm:$0xff] }
  0x7f   : > { %8444 = vmatprep.mubr.msk.bf16.mxu0 %vm12815_vm10, %v1652_v39  ;;  %v1637_v39 = vsel %vm9900_vm15, %v9885_v62, 0.0  ;;  %vm12842_vm10 = vmmov %vm12831_vm9  ;;  %v1655_v61 = vpack.c.bf16 %v1635_v49, %v9868_v18  ;;  %v1977_v62 = vpack.c.bf16 %v12844_v27, %v1952_v23  ;;  %vm12848_vm15 = vnez %v12847_v44  ;;  %v12849_v18 = vld [vmem:[#allocation35_spill] sm:$0xff]  ;;  %v12873_v27 = vld [vmem:[#allocation42_spill] sm:$0xff] }
  0x80   : > { %8467 = vmatmul.mubr.msk.bf16.gmra.mxu1 %vm12831_vm9, %v1973_v15  ;;  %v12838_v15 = vld [vmem:[#allocation30_spill] sm:$0xff]  ;;  %v1656_v0 = vpack.c.bf16 %v1637_v39, %v9872_v4  ;;  %v1956_v6 = vsel %vm12848_vm15, %v12846_v54, 0.0  ;;  %vm12854_vm1 = vmmov %vm12831_vm9  ;;  %vm12876_vm15 = vcmask 1041408   ;;  %v1968_v10 = vsel %vm9822_vm14, %v10145_v45, 0.0 }
  0x81   : > { %8470 = vmatprep.mubr.msk.bf16.mxu1 %vm12832_vm8, %v1974_v28  ;;  %vm12840_vm8 = vnez %v12839_v3  ;;  %vm12860_vm13 = vmmov %vm12854_vm1  ;;  %v7389_v54 = vld [vmem:[%s12437_s1 + $0x10] sm:$0x3] }
  0x82   : > { %v1954_v55 = vsel %vm12840_vm8, %v12838_v15, 0.0  ;;  %v12866_v15 = vld [vmem:[#allocation36_spill] sm:$0xff]  ;;  %vm12892_vm14 = vmmov %vm12854_vm1 }
  0x83   : > { %v1978_v28 = vpack.c.bf16 %v12845_v17, %v1954_v55 }
  0x86   : > { %8445 = vmatmul.mubr.msk.bf16.gmra.mxu0 %vm12841_vm11, %v1653_v19  ;;  %v534_v19 = vand.u32 15, %v312_v12  ;;  %vm12852_vm11 = vmmov %vm12831_vm9  ;;  %v12868_v12 = vld [vmem:[#allocation51_spill] sm:$0xff] }
  0x87   : > { %8448 = vmatprep.mubr.msk.bf16.mxu0 %vm12842_vm10, %v1654_v11  ;;  %v12850_v11 = vld [vmem:[#allocation31_spill] sm:$0xff]  ;;  %vm12853_vm10 = vmmov %vm12831_vm9 }
  0x88   : > { %8471 = vmatmul.mubr.msk.bf16.gmra.mxu1 %vm12831_vm9, %v1975_v58  ;;  %v12855_v58 = vld [vmem:[#allocation44_spill] sm:$0xff]  ;;  %vm10104_vm0 = vcmp.lt.s32.totalorder %v534_v19, 15 }
  0x89   : > { %8474 = vmatprep.mubr.msk.bf16.mxu1 %vm12843_vm3, %v1976_v42  ;;  %vm12851_vm3 = vnez %v12850_v11  ;;  %v1979_v25 = vpack.c.bf16 %v12855_v58, %v1956_v6  ;;  %v12857_v56 = vsel %vm10104_vm0, 4294967295, %v12856_v56  ;;  %v12859_v42 = vld [vmem:[#allocation50_spill] sm:$0xff]  ;;  %v1643_v23 = vsel %vm10104_vm0, %v9983_v43, 0.0  ;;  %v12870_v43 = vld [vmem:[#allocation4_spill] sm:$0xff]  ;;  %v12877_v6 = vld [vmem:[#allocation5_spill] sm:$0xff] }
  0x8a   : > { %v1958_v4 = vsel %vm12851_vm3, %v12849_v18, 0.0  ;;  %12858 = vst [vmem:[#allocation59_spill] sm:$0xff] %v12857_v56  ;;  %v1659_v39 = vpack.c.bf16 %v1643_v23, %v9989_v9  ;;  %vm12867_vm3 = vnez %v12866_v15  ;;  %v12882_v18 = vld [vmem:[#allocation9_spill] sm:$0xff]  ;;  %v12895_v23 = vld [vmem:[#allocation63_spill] sm:$0xff] }
  0x8b   : > { %v1980_v53 = vpack.c.bf16 %v12859_v42, %v1958_v4  ;;  %v1962_v55 = vsel %vm12867_vm3, %v9644_v33, 0.0  ;;  %vm12875_vm3 = vnez %v12730_v29  ;;  %v12884_v4 = vld [vmem:[#allocation13_spill] sm:$0xff] }
  0x8c   : > { %v1966_v33 = vsel %vm12875_vm3, %v9938_v36, 0.0  ;;  %vm12885_vm3 = vmmov %vm12854_vm1 }
  0x8e   : > { %8449 = vmatmul.mubr.msk.bf16.gmra.mxu0 %vm12852_vm11, %v1655_v61  ;;  %vm12861_vm11 = vmmov %vm12854_vm1 }
  0x8f   : > { %8452 = vmatprep.mubr.msk.bf16.mxu0 %vm12853_vm10, %v1656_v0  ;;  %vm12862_vm10 = vmmov %vm12854_vm1  ;;  %v1982_v0 = vpack.c.bf16 %v9843_v14, %v1962_v55  ;;  %v12904_v55 = vld [vmem:[#allocation40_spill] sm:$0xff] }
  0x90   : > { %8475 = vmatmul.mubr.msk.bf16.gmra.mxu1 %vm12831_vm9, %v1977_v62  ;;  %vm12865_vm9 = vnez %v12864_v59  ;;  %v2983_v62 = vsel %vm12876_vm15, %v9925_v46, 0  ;;  %v10152_v46 = vld [vmem:[#allocation2 + $0x10f] sm:$0xff] }
  0x91   : > { %8478 = vmatprep.mubr.msk.bf16.mxu1 %vm12854_vm1, %v1978_v28  ;;  %v1960_v49 = vsel %vm12865_vm9, %v12863_v63, 0.0  ;;  %vm12874_vm9 = vnez %v12873_v27  ;;  %v1984_v28 = vpack.c.bf16 %v9963_v38, %v1966_v33  ;;  %v1985_v19 = vpack.c.bf16 %v10152_v46, %v1968_v10  ;;  %v12897_v63 = vld [vmem:[#allocation23_spill] sm:$0xff]  ;;  %v2258_v33 = vld [vmem:[#allocation2 + $0xe8] sm:$0xff] }
  0x92   : > { %v1981_v61 = vpack.c.bf16 %v12868_v12, %v1960_v49  ;;  %v1964_v9 = vsel %vm12874_vm9, %v9681_v50, 0.0  ;;  %v12879_v50 = vld [vmem:[#allocation8_spill] sm:$0xff]  ;;  %vm12894_vm9 = vmmov %vm12854_vm1  ;;  %v12899_v49 = vld [vmem:[#allocation38_spill] sm:$0xff] }
  0x93   : > { %v1983_v17 = vpack.c.bf16 %v9862_v16, %v1964_v9  ;;  %v12906_v12 = vld [vmem:[#allocation45_spill] sm:$0xff] }
  0x94   : > { %v12914_v9 = vld [vmem:[#allocation49_spill] sm:$0xff] }
  0x96   : > { %8453 = vmatmul.mubr.msk.bf16.gmra.mxu0 %vm12860_vm13, %v1657_v7  ;;  %vm12869_vm13 = vmmov %vm12854_vm1  ;;  %v12887_v7 = vld [vmem:[#allocation61_spill] sm:$0xff] }
  0x97   : > { %8456 = vmatprep.mubr.msk.bf16.mxu0 %vm12861_vm11, %v1658_v40  ;;  %vm12871_vm11 = vmmov %vm12854_vm1  ;;  %v12888_v40 = vld [vmem:[#allocation15_spill] sm:$0xff] }
  0x98   : > { %8479 = vmatmul.mubr.msk.bf16.gmra.mxu1 %vm12854_vm1, %v1979_v25  ;;  %v12891_v25 = vld [vmem:[#allocation21_spill] sm:$0xff] }
  0x99   : > { %8482 = vmatprep.mubr.msk.bf16.mxu1 %vm12862_vm10, %v1980_v53  ;;  %vm12872_vm10 = vmmov %vm12854_vm1  ;;  %v12893_v53 = vld [vmem:[#allocation62_spill] sm:$0xff] }
  0x9e   : > { %8457 = vmatmul.mubr.msk.bf16.gmra.mxu0 %vm12869_vm13, %v1659_v39  ;;  %vm12878_vm13 = vmmov %vm12854_vm1  ;;  %v12901_v39 = vld [vmem:[#allocation64_spill] sm:$0xff] }
  0x9f   : > { %8496 = vmatprep.mubr.msk.bf16.mxu0 %vm12871_vm11, %v12870_v43  ;;  %vm12880_vm11 = vmmov %vm12854_vm1  ;;  %v12912_v43 = vld [vmem:[#allocation48_spill] sm:$0xff] }
  0xa0   : > { %8483 = vmatmul.mubr.msk.bf16.gmra.mxu1 %vm12854_vm1, %v1981_v61  ;;  %v12908_v61 = vld [vmem:[#allocation67_spill] sm:$0xff] }
  0xa1   : > { %8486 = vmatprep.mubr.msk.bf16.mxu1 %vm12872_vm10, %v1982_v0  ;;  %vm12881_vm10 = vmmov %vm12854_vm1  ;;  %v12910_v0 = vld [vmem:[#allocation68_spill] sm:$0xff] }
  0xa6   : > { %8497 = vmatmul.mubr.msk.bf16.vlgmr.msra.gmra.mxu0 %vm12878_vm13, %v12877_v6  ;;  %vm12883_vm13 = vmmov %vm12854_vm1  ;;  %v2261_v6 = vld [vmem:[#allocation2 + $0x100] sm:$0xff] }
  0xa7   : > { %8563 = vmatpush3.bf16.msra.mxu0 %v2983_v62  ;;  %8500 = vmatprep.mubr.msk.bf16.mxu0 %vm12880_vm11, %v12879_v50  ;;  %vm12886_vm11 = vmmov %vm12854_vm1  ;;  %v2259_v62 = vld [vmem:[#allocation2 + $0xf0] sm:$0xff]  ;;  %v12917_v50 = vld [vmem:[#allocation72_spill] sm:$0xff] }
  0xa8   : > { %8487 = vmatmul.mubr.msk.bf16.gmra.mxu1 %vm12854_vm1, %v1983_v17  ;;  %9117 = vmatprep.subr.msk.bf16.mxu0 %vm12876_vm15, %v7389_v54  ;;  %vm12889_vm15 = vmmov %vm12854_vm1  ;;  %v12916_v17 = vld [vmem:[#allocation69_spill] sm:$0xff]  ;;  %v10199_v10 = vpack.c.bf16 %v2259_v62, %v2258_v33 }
  0xa9   : > { %8490 = vmatprep.mubr.msk.bf16.mxu1 %vm12881_vm10, %v1984_v28  ;;  %vm12890_vm10 = vcmask 1041408   ;;  %v2260_v28 = vld [vmem:[#allocation2 + $0xf8] sm:$0xff] }
  0xaa   : > { %v3277_v58 = vsel %vm12890_vm10, %v10029_v32, 0  ;;  %v12902_v32 = vld [vmem:[#allocation66_spill] sm:$0xff]  ;;  %vm12909_vm10 = vmmov %vm12854_vm1 }
  0xae   : > { %8501 = vmatmul.mubr.msk.bf16.gmra.mxu0 %vm12883_vm13, %v12882_v18  ;;  %vm12896_vm13 = vmmov %vm12854_vm1  ;;  %v2852_v18 = vld [vmem:[#allocation2 + $0x27] sm:$0xff] }
  0xaf   : > { %8504 = vmatprep.mubr.msk.bf16.mxu0 %vm12885_vm3, %v12884_v4  ;;  %vm12898_vm3 = vmmov %vm12854_vm1  ;;  %v2262_v4 = vld [vmem:[#allocation2 + $0x108] sm:$0xff] }
  0xb0   : > { %8491 = vmatmul.mubr.msk.bf16.gmra.mxu1 %vm12886_vm11, %v1985_v19  ;;  %vm12900_vm11 = vmmov %vm12854_vm1  ;;  %v10201_v19 = vpack.c.bf16 %v2261_v6, %v2260_v28  ;;  %v2860_v28 = vld [vmem:[#allocation2 + $0x67] sm:$0xff]  ;;  %v10228_v6 = vld [vmem:[#allocation2 + $0x111] sm:$0xff] }
  0xb1   : > { %8530 = vmatprep.mubr.msk.bf16.mxu1 %vm12854_vm1, %v12887_v7  ;;  %v2263_v7 = vld [vmem:[#allocation2 + $0x110] sm:$0xff] }
  0xb6   : > { %8505 = vmatmul.mubr.msk.bf16.gmra.mxu0 %vm12889_vm15, %v12888_v40  ;;  %vm12903_vm15 = vmmov %vm12854_vm1  ;;  %v12921_v40 = vld [vmem:[#allocation73_spill] sm:$0xff] }
  0xb7   : > { %8508 = vmatprep.mubr.msk.bf16.mxu0 %vm12892_vm14, %v12891_v25  ;;  %vm12905_vm14 = vmmov %vm12854_vm1  ;;  %v2884_v25 = vsel %vm9367_vm2, %v2852_v18, 0.0 }
  0xb8   : > { %8531 = vmatmul.mubr.msk.bf16.vlgmr.msra.gmra.mxu1 %vm12894_vm9, %v12893_v53  ;;  %vm12907_vm9 = vmmov %vm12854_vm1  ;;  %v12923_v53 = vld [vmem:[#allocation75_spill] sm:$0xff] }
  0xb9   : > { %8534 = vmatprep.mubr.msk.bf16.mxu1 %vm12896_vm13, %v12895_v23  ;;  %8597 = vmatpush3.bf16.msra.mxu1 %v3277_v58  ;;  %vm12911_vm13 = vmmov %vm12854_vm1  ;;  %v2853_v58 = vld [vmem:[#allocation2 + $0x2f] sm:$0xff]  ;;  %v10213_v23 = vpack.c.bf16 %v2263_v7, %v2262_v4 }
  0xba   : > { %v2861_v4 = vld [vmem:[#allocation2 + $0x6f] sm:$0xff] }
  0xbb   : > { %v10239_v7 = vld [vmem:[#allocation2 + $0x109] sm:$0xff] }
  0xbe   : > { %8509 = vmatmul.mubr.msk.bf16.gmra.mxu0 %vm12898_vm3, %v12897_v63  ;;  %vm12913_vm3 = vmmov %vm12854_vm1  ;;  %v2916_v63 = vpack.c.bf16 %v2853_v58, %v2884_v25  ;;  %v3178_v25 = vld [vmem:[#allocation2 + $0x28] sm:$0xff] }
  0xbf   : > { %8512 = vmatprep.mubr.msk.bf16.mxu0 %vm12900_vm11, %v12899_v49  ;;  %vm12915_vm11 = vmmov %vm12854_vm1  ;;  %v2854_v49 = vld [vmem:[#allocation2 + $0x37] sm:$0xff] }
  0xc0   : > { %8535 = vmatmul.mubr.msk.bf16.gmra.mxu1 %vm12854_vm1, %v12901_v39  ;;  %v2856_v39 = vld [vmem:[#allocation2 + $0x47] sm:$0xff] }
  0xc1   : > { %8538 = vmatprep.mubr.msk.bf16.mxu1 %vm12903_vm15, %v12902_v32  ;;  %vm12918_vm15 = vmmov %vm12854_vm1  ;;  %v2855_v32 = vld [vmem:[#allocation2 + $0x3f] sm:$0xff] }
  0xc6   : > { %8513 = vmatmul.mubr.msk.bf16.gmra.mxu0 %vm12905_vm14, %v12904_v55  ;;  %vm12919_vm14 = vmmov %vm12854_vm1 }
  0xc7   : > { %8516 = vmatprep.mubr.msk.bf16.mxu0 %vm12907_vm9, %v12906_v12  ;;  %vm12920_vm9 = vmmov %vm12854_vm1  ;;  %v12928_v12 = vld [vmem:[#allocation77_spill] sm:$0xff] }
  0xc8   : > { %8539 = vmatmul.mubr.msk.bf16.gmra.mxu1 %vm12909_vm10, %v12908_v61  ;;  %vm12922_vm10 = vmmov %vm12854_vm1  ;;  %v2857_v61 = vld [vmem:[#allocation2 + $0x4f] sm:$0xff] }
  0xc9   : > { %8542 = vmatprep.mubr.msk.bf16.mxu1 %vm12911_vm13, %v12910_v0  ;;  %vm12924_vm13 = vmmov %vm12854_vm1  ;;  %v2888_v0 = vsel %vm12810_vm7, %v2856_v39, 0.0 }
  0xca   : > { %v2918_v33 = vpack.c.bf16 %v2857_v61, %v2888_v0 }
  0xce   : > { %8517 = vmatmul.mubr.msk.bf16.gmra.mxu0 %vm12913_vm3, %v12912_v43  ;;  %vm12925_vm3 = vmmov %vm12854_vm1  ;;  %v12930_v43 = vld [vmem:[#allocation78_spill] sm:$0xff] }
  0xcf   : > { %8520 = vmatprep.mubr.msk.bf16.mxu0 %vm12915_vm11, %v12914_v9  ;;  %vm12926_vm11 = vmmov %vm12854_vm1 }
  0xd0   : > { %8543 = vmatmul.mubr.msk.bf16.gmra.mxu1 %vm12854_vm1, %v12916_v17  ;;  %vm12927_vm1 = vnez %v12653_v5  ;;  %v2858_v17 = vld [vmem:[#allocation2 + $0x57] sm:$0xff] }
  0xd1   : > { %8546 = vmatprep.mubr.msk.bf16.mxu1 %vm12918_vm15, %v12917_v50  ;;  %v2886_v55 = vsel %vm12927_vm1, %v2854_v49, 0.0  ;;  %vm12929_vm15 = vmmov %vm12925_vm3  ;;  %v2859_v50 = vld [vmem:[#allocation2 + $0x5f] sm:$0xff]  ;;  %v2890_v18 = vsel %vm12811_vm12, %v2858_v17, 0.0 }
  0xd2   : > { %v2917_v9 = vpack.c.bf16 %v2855_v32, %v2886_v55  ;;  %v2919_v58 = vpack.c.bf16 %v2859_v50, %v2890_v18  ;;  %v2864_v32 = vld [vmem:[#allocation2 + $0x87] sm:$0xff] }
  0xd3   : > { %v3182_v18 = vld [vmem:[#allocation2 + $0x48] sm:$0xff] }
  0xd6   : > { %8521 = vmatmul.mubr.msk.bf16.gmra.mxu0 %vm12919_vm14, %v10199_v10  ;;  %vm12931_vm14 = vmmov %vm12925_vm3 }
  0xd7   : > { %8524 = vmatprep.mubr.msk.bf16.mxu0 %vm12920_vm9, %v10201_v19  ;;  %vm12932_vm9 = vcmask 1041408  }
  0xd8   : > { %8547 = vmatmul.mubr.msk.bf16.gmra.mxu1 %vm12922_vm10, %v12921_v40  ;;  %v3603_v62 = vsel %vm12932_vm9, %v7389_v54, 0  ;;  %vm12933_vm10 = vmmov %vm12925_vm3  ;;  %v2892_v54 = vsel %vm12820_vm4, %v2860_v28, 0.0  ;;  %v2589_v40 = vsel %vm10104_vm0, %v10228_v6, 0.0  ;;  %vm12938_vm9 = vnez %v12823_v35  ;;  %v3186_v35 = vld [vmem:[#allocation2 + $0x68] sm:$0xff] }
  0xd9   : > { %8550 = vmatprep.mubr.msk.bf16.mxu1 %vm12924_vm13, %v12923_v53  ;;  %vm12934_vm13 = vmmov %vm12925_vm3  ;;  %v3179_v53 = vld [vmem:[#allocation2 + $0x30] sm:$0xff]  ;;  %v2605_v49 = vpack.c.bf16 %v2589_v40, %v10239_v7 }
  0xda   : > { %v3210_v39 = vpack.c.bf16 %v3179_v53, %v3178_v25  ;;  %v2866_v53 = vld [vmem:[#allocation2 + $0x97] sm:$0xff] }
  0xde   : > { %8525 = vmatmul.mubr.msk.bf16.gmra.mxu0 %vm12925_vm3, %v10213_v23 }
  0xdf   : > { %8564 = vmatprep.mubr.msk.bf16.mxu0 %vm12926_vm11, %v2916_v63  ;;  %vm12935_vm11 = vmmov %vm12925_vm3  ;;  %v2920_v63 = vpack.c.bf16 %v2861_v4, %v2892_v54  ;;  %v3183_v4 = vld [vmem:[#allocation2 + $0x50] sm:$0xff] }
  0xe0   : > { %8551 = vmatmul.mubr.msk.bf16.gmra.mxu1 %vm12929_vm15, %v12928_v12  ;;  %vm12936_vm15 = vmmov %vm12925_vm3 }
  0xe1   : > { %8554 = vmatprep.mubr.msk.bf16.mxu1 %vm12931_vm14, %v12930_v43  ;;  %vm12937_vm14 = vmmov %vm12925_vm3  ;;  %v2865_v43 = vld [vmem:[#allocation2 + $0x8f] sm:$0xff] }
  0xe6   : > { %8565 = vmatmul.mubr.msk.bf16.vlgmr.msra.gmra.mxu0 %vm12933_vm10, %v2917_v9  ;;  %vm12939_vm10 = vmmov %vm12925_vm3  ;;  %v2896_v9 = vsel %vm12829_vm5, %v2864_v32, 0.0 }
  0xe7   : > { %8631 = vmatpush3.bf16.msra.mxu0 %v3603_v62  ;;  %8568 = vmatprep.mubr.msk.bf16.mxu0 %vm12934_vm13, %v2918_v33  ;;  %vm12940_vm13 = vmmov %vm12925_vm3  ;;  %v3180_v33 = vld [vmem:[#allocation2 + $0x38] sm:$0xff]  ;;  %v3181_v62 = vld [vmem:[#allocation2 + $0x40] sm:$0xff]  ;;  %v2922_v54 = vpack.c.bf16 %v2865_v43, %v2896_v9 }
  0xe8   : > { %8555 = vmatmul.mubr.msk.bf16.gmra.mxu1 %vm12925_vm3, %v9958_v1  ;;  %v2862_v1 = vld [vmem:[#allocation2 + $0x77] sm:$0xff]  ;;  %v3211_v25 = vpack.c.bf16 %v3181_v62, %v3180_v33  ;;  %v2869_v9 = vld [vmem:[#allocation2 + $0xaf] sm:$0xff] }
  0xe9   : > { %8558 = vmatprep.mubr.msk.bf16.mxu1 %vm12935_vm11, %v10002_v20  ;;  %v2863_v20 = vld [vmem:[#allocation2 + $0x7f] sm:$0xff]  ;;  %v2894_v12 = vsel %vm12938_vm9, %v2862_v1, 0.0  ;;  %vm12942_vm11 = vmmov %vm12925_vm3 }
  0xea   : > { %v2921_v50 = vpack.c.bf16 %v2863_v20, %v2894_v12  ;;  %v2898_v20 = vsel %vm12837_vm6, %v2866_v53, 0.0 }
  0xec   : > { %v8362_v55 = vpop.f32.mrf.mxu0 }
  0xee   : > { %8569 = vmatmul.mubr.msk.bf16.gmra.mxu0 %vm12936_vm15, %v2919_v58  ;;  %v10249_v61 = vpop.f32.mrf.mxu1  ;;  %v1177_v0 = vpop.f32.mrf.mxu0  ;;  %vm12943_vm15 = vmmov %vm12925_vm3 }
  0xef   : > { %8572 = vmatprep.mubr.msk.bf16.mxu0 %vm12937_vm14, %v2920_v63  ;;  %v3212_v63 = vpack.c.bf16 %v3183_v4, %v3182_v18  ;;  %vm12944_vm14 = vmmov %vm12925_vm3  ;;  %v3184_v18 = vld [vmem:[#allocation2 + $0x58] sm:$0xff] }
  0xf0   : > { %8559 = vmatmul.mubr.msk.bf16.gmra.mxu1 %vm12939_vm10, %v2605_v49  ;;  %v10255_v17 = vpop.f32.mrf.mxu1  ;;  %v8363_v28 = vpop.f32.mrf.mxu0  ;;  %v2868_v49 = vld [vmem:[#allocation2 + $0xa7] sm:$0xff]  ;;  %vm12945_vm10 = vmmov %vm12925_vm3 }
  0xf1   : > { %8598 = vmatprep.mubr.msk.bf16.mxu1 %vm12940_vm13, %v3210_v39  ;;  %v2867_v39 = vld [vmem:[#allocation2 + $0x9f] sm:$0xff]  ;;  %v2900_v33 = vsel %vm12840_vm8, %v2868_v49, 0.0  ;;  %v3214_v49 = vpack.c.bf16 %v3187_v52, %v3186_v35  ;;  %vm12946_vm13 = vmmov %vm12925_vm3 }
  0xf2   : > { %v10257_v40 = vpop.f32.mrf.mxu1  ;;  %v1180_v58 = vpop.f32.mrf.mxu0  ;;  %v2923_v47 = vpack.c.bf16 %v2867_v39, %v2898_v20  ;;  %v2924_v13 = vpack.c.bf16 %v2869_v9, %v2900_v33  ;;  %v9201_v39 = vld [vmem:[#allocation2 + $0xb7] sm:$0xff] }
  0xf4   : > { %v10259_v1 = vpop.f32.mrf.mxu1  ;;  %v8366_v32 = vpop.f32.mrf.mxu0 }
  0xf5   : > { %12941 = vst [vmem:[#allocation11_spill] sm:$0xff] %v10259_v1 }
  0xf6   : > { %8573 = vmatmul.mubr.msk.bf16.gmra.mxu0 %vm12925_vm3, %v2921_v50  ;;  %v8396_v12 = vpop.f32.mrf.mxu1  ;;  %v1193_v43 = vpop.f32.mrf.mxu0  ;;  %v3185_v50 = vld [vmem:[#allocation2 + $0x60] sm:$0xff]  ;;  %vm12947_vm3 = vnez %v12847_v44 }
  0xf7   : > { %8576 = vmatprep.mubr.msk.bf16.mxu0 %vm12942_vm11, %v2922_v54  ;;  %v10268_v62 = vadd.f32 %v8396_v12, %v8362_v55  ;;  %v3213_v21 = vpack.c.bf16 %v3185_v50, %v3184_v18  ;;  %v2872_v55 = vld [vmem:[#allocation2 + $0xc7] sm:$0xff]  ;;  %vm12948_vm11 = vmmov %vm12945_vm10 }
  0xf8   : > { %8599 = vmatmul.mubr.msk.bf16.vlgmr.msra.gmra.mxu1 %vm12943_vm15, %v3211_v25  ;;  %v1389_v4 = vpop.f32.mrf.mxu1  ;;  %v8367_v54 = vpop.f32.mrf.mxu0  ;;  %vm12949_vm15 = vnez %v12850_v11  ;;  %v3190_v50 = vld [vmem:[#allocation2 + $0x88] sm:$0xff] }
  0xf9   : > { %8602 = vmatprep.mubr.msk.bf16.mxu1 %vm12944_vm14, %v3212_v63  ;;  %v10271_v53 = vadd.f32 %v1389_v4, %v1177_v0  ;;  %v2902_v0 = vsel %vm12947_vm3, %v9201_v39, 0.0  ;;  %v2904_v35 = vsel %vm12949_vm15, %v2872_v55, 0.0  ;;  %vm12950_vm14 = vmmov %vm12945_vm10  ;;  %v3191_v4 = vld [vmem:[#allocation2 + $0x90] sm:$0xff]  ;;  %vm12954_vm15 = vnez %v12866_v15 }
  0xfa   : > { %v8397_v25 = vpop.f32.mrf.mxu1  ;;  %v1196_v41 = vpop.f32.mrf.mxu0  ;;  %v2925_v18 = vpack.c.bf16 %v12859_v42, %v2902_v0  ;;  %v9202_v42 = vld [vmem:[#allocation2 + $0xd7] sm:$0xff]  ;;  %vm12955_vm3 = vmmov %vm12945_vm10 }
  0xfb   : > { %v10273_v5 = vadd.f32 %v8397_v25, %v8363_v28  ;;  %v2873_v28 = vld [vmem:[#allocation2 + $0xcf] sm:$0xff] }
  0xfc   : > { %v1392_v12 = vpop.f32.mrf.mxu1  ;;  %v8370_v3 = vpop.f32.mrf.mxu0 }
  0xfd   : > { %v10276_v63 = vadd.f32 %v1392_v12, %v1180_v58  ;;  %v3189_v58 = vld [vmem:[#allocation2 + $0x80] sm:$0xff] }
  0xfe   : > { %8577 = vmatmul.mubr.msk.bf16.gmra.mxu0 %vm12945_vm10, %v2923_v47  ;;  %v8400_v20 = vpop.f32.mrf.mxu1  ;;  %v1209_v9 = vpop.f32.mrf.mxu0  ;;  %v3188_v47 = vld [vmem:[#allocation2 + $0x78] sm:$0xff] }
  0xff   : > { %8580 = vmatprep.mubr.msk.bf16.mxu0 %vm12946_vm13, %v2924_v13  ;;  %v10284_v52 = vadd.f32 %v8400_v20, %v8366_v32  ;;  %v3215_v44 = vpack.c.bf16 %v3189_v58, %v3188_v47  ;;  %v3216_v32 = vpack.c.bf16 %v3191_v4, %v3190_v50  ;;  %vm12951_vm13 = vmmov %vm12945_vm10  ;;  %v3193_v58 = vld [vmem:[#allocation2 + $0xa0] sm:$0xff]  ;;  %v3194_v4 = vld [vmem:[#allocation2 + $0xa8] sm:$0xff] }
 0x100   : > { %8603 = vmatmul.mubr.msk.bf16.gmra.mxu1 %vm12948_vm11, %v3213_v21  ;;  %v1405_v33 = vpop.f32.mrf.mxu1  ;;  %v8371_v13 = vpop.f32.mrf.mxu0  ;;  %v2926_v21 = vpack.c.bf16 %v2873_v28, %v2904_v35  ;;  %vm12952_vm11 = vnez %v12864_v59  ;;  %v9203_v35 = vld [vmem:[#allocation2 + $0xe7] sm:$0xff] }
 0x101   : > { %8606 = vmatprep.mubr.msk.bf16.mxu1 %vm12950_vm14, %v3214_v49  ;;  %v10288_v25 = vadd.f32 %v1405_v33, %v1193_v43  ;;  %v2906_v43 = vsel %vm12952_vm11, %v9202_v42, 0.0  ;;  %vm12953_vm14 = vmmov %vm12945_vm10 }
 0x102   : > { %v8401_v12 = vpop.f32.mrf.mxu1  ;;  %v1212_v39 = vpop.f32.mrf.mxu0  ;;  %v2927_v50 = vpack.c.bf16 %v9843_v14, %v2906_v43  ;;  %vm12960_vm11 = vmmov %vm12955_vm3 }
 0x103   : > { %v10290_v11 = vadd.f32 %v8401_v12, %v8367_v54  ;;  %v2908_v54 = vsel %vm12954_vm15, %v9203_v35, 0.0  ;;  %vm12959_vm15 = vnez %v12730_v29 }
 0x104   : > { %v1408_v55 = vpop.f32.mrf.mxu1  ;;  %v8374_v20 = vpop.f32.mrf.mxu0 }
 0x105   : > { %v10293_v49 = vadd.f32 %v1408_v55, %v1196_v41  ;;  %v3192_v41 = vld [vmem:[#allocation2 + $0x98] sm:$0xff] }
 0x106   : > { %8581 = vmatmul.mubr.msk.bf16.gmra.mxu0 %vm12945_vm10, %v2925_v18  ;;  %v8404_v0 = vpop.f32.mrf.mxu1  ;;  %v1225_v28 = vpop.f32.mrf.mxu0  ;;  %v3217_v15 = vpack.c.bf16 %v3193_v58, %v3192_v41  ;;  %vm12956_vm10 = vmmov %vm12955_vm3 }
 0x107   : > { %8584 = vmatprep.mubr.msk.bf16.mxu0 %vm12951_vm13, %v2926_v21  ;;  %v10301_v47 = vadd.f32 %v8404_v0, %v8370_v3  ;;  %v3195_v21 = vld [vmem:[#allocation2 + $0xb0] sm:$0xff]  ;;  %vm12957_vm13 = vnez %v12873_v27  ;;  %v3475_v27 = vld [vmem:[#allocation2 + $0x41] sm:$0xff] }
 0x108   : > { %8607 = vmatmul.mubr.msk.bf16.gmra.mxu1 %vm12953_vm14, %v3215_v44  ;;  %v1421_v33 = vpop.f32.mrf.mxu1  ;;  %v8375_v18 = vpop.f32.mrf.mxu0  ;;  %v2928_v44 = vpack.c.bf16 %v9862_v16, %v2908_v54  ;;  %v3218_v3 = vpack.c.bf16 %v3195_v21, %v3194_v4  ;;  %v2910_v14 = vsel %vm12957_vm13, %v9938_v36, 0.0  ;;  %vm12958_vm14 = vmmov %vm12955_vm3  ;;  %v3197_v54 = vld [vmem:[#allocation2 + $0xc0] sm:$0xff]  ;;  %v3199_v36 = vld [vmem:[#allocation2 + $0xd0] sm:$0xff] }
 0x109   : > { %8610 = vmatprep.mubr.msk.bf16.mxu1 %vm12955_vm3, %v3216_v32  ;;  %v10305_v12 = vadd.f32 %v1421_v33, %v1209_v9  ;;  %v2929_v33 = vpack.c.bf16 %v9963_v38, %v2910_v14  ;;  %vm12966_vm13 = vmmov %vm12955_vm3 }
 0x10a   : > { %v8405_v55 = vpop.f32.mrf.mxu1  ;;  %v1228_v42 = vpop.f32.mrf.mxu0 }
 0x10b   : > { %v10308_v35 = vadd.f32 %v8405_v55, %v8371_v13  ;;  %v2912_v13 = vsel %vm12959_vm15, %v10145_v45, 0.0 }
 0x10c   : > { %v1424_v0 = vpop.f32.mrf.mxu1  ;;  %v8378_v32 = vpop.f32.mrf.mxu0 }
 0x10d   : > { %v10311_v59 = vadd.f32 %v1424_v0, %v1212_v39  ;;  %v3196_v39 = vld [vmem:[#allocation2 + $0xb8] sm:$0xff] }
 0x10e   : > { %8585 = vmatmul.mubr.msk.bf16.gmra.mxu0 %vm12955_vm3, %v2927_v50  ;;  %v8408_v9 = vpop.f32.mrf.mxu1  ;;  %v1241_v16 = vpop.f32.mrf.mxu0  ;;  %v3198_v50 = vld [vmem:[#allocation2 + $0xc8] sm:$0xff]  ;;  %v3219_v45 = vpack.c.bf16 %v3197_v54, %v3196_v39  ;;  %v3473_v0 = vld [vmem:[#allocation2 + $0x31] sm:$0xff] }
 0x10f   : > { %8588 = vmatprep.mubr.msk.bf16.mxu0 %vm12956_vm10, %v2928_v44  ;;  %v10321_v43 = vadd.f32 %v8408_v9, %v8374_v20  ;;  %v2882_v20 = vld [vmem:[#allocation2 + $0x117] sm:$0xff]  ;;  %vm12962_vm10 = vnez %v12770_v48 }
 0x110   : > { %8611 = vmatmul.mubr.msk.bf16.gmra.mxu1 %vm12958_vm14, %v3217_v15  ;;  %v1437_v41 = vpop.f32.mrf.mxu1  ;;  %v8379_v58 = vpop.f32.mrf.mxu0  ;;  %v2930_v15 = vpack.c.bf16 %v10152_v46, %v2912_v13  ;;  %v2914_v46 = vsel %vm12962_vm10, %v2882_v20, 0.0  ;;  %vm12963_vm14 = vmmov %vm12955_vm3  ;;  %v12964_v39 = vld [vmem:[#allocation34_spill] sm:$0xff] }
 0x111   : > { %8614 = vmatprep.mubr.msk.bf16.mxu1 %vm12960_vm11, %v3218_v3  ;;  %v10325_v4 = vadd.f32 %v1437_v41, %v1225_v28  ;;  %v3220_v3 = vpack.c.bf16 %v3199_v36, %v3198_v50  ;;  %vm12961_vm11 = vmmov %vm12955_vm3  ;;  %v2883_v28 = vld [vmem:[#allocation2 + $0x11f] sm:$0xff]  ;;  %vm12965_vm15 = vnez %v12964_v39 }
 0x112   : > { %v8409_v21 = vpop.f32.mrf.mxu1  ;;  %v10328_v44 = vpop.f32.mrf.mxu0  ;;  %v3505_v54 = vsel %vm12965_vm15, %v3473_v0, 0.0  ;;  %v3477_v0 = vld [vmem:[#allocation2 + $0x51] sm:$0xff] }
 0x113   : > { %v10330_v55 = vadd.f32 %v8409_v21, %v8375_v18  ;;  %v3472_v18 = vld [vmem:[#allocation2 + $0x29] sm:$0xff] }
 0x114   : > { %v1440_v9 = vpop.f32.mrf.mxu1  ;;  %v8382_v29 = vpop.f32.mrf.mxu0  ;;  %v3536_v20 = vpack.c.bf16 %v3505_v54, %v3472_v18  ;;  %v3476_v54 = vld [vmem:[#allocation2 + $0x49] sm:$0xff] }
 0x115   : > { %v10333_v38 = vadd.f32 %v1440_v9, %v1228_v42  ;;  %v3200_v42 = vld [vmem:[#allocation2 + $0xd8] sm:$0xff] }
 0x116   : > { %8589 = vmatmul.mubr.msk.bf16.gmra.mxu0 %vm12961_vm11, %v2929_v33  ;;  %v8412_v14 = vpop.f32.mrf.mxu1  ;;  %v1257_v13 = vpop.f32.mrf.mxu0  ;;  %v3201_v33 = vld [vmem:[#allocation2 + $0xe0] sm:$0xff]  ;;  %vm12970_vm11 = vmmov %vm12955_vm3 }
 0x117   : > { %8592 = vmatprep.mubr.msk.bf16.mxu0 %vm12955_vm3, %v2930_v15  ;;  %v10341_v41 = vadd.f32 %v8412_v14, %v8378_v32  ;;  %v2931_v15 = vpack.c.bf16 %v2883_v28, %v2914_v46  ;;  %v12971_v28 = vld [vmem:[#allocation41_spill] sm:$0xff]  ;;  %vm12976_vm15 = vmmov %vm12970_vm11 }
 0x118   : > { %8615 = vmatmul.mubr.msk.bf16.gmra.mxu1 %vm12963_vm14, %v3219_v45  ;;  %v1453_v50 = vpop.f32.mrf.mxu1  ;;  %v8383_v36 = vpop.f32.mrf.mxu0  ;;  %v3221_v45 = vpack.c.bf16 %v3201_v33, %v3200_v42  ;;  %vm12973_vm14 = vmmov %vm12970_vm11  ;;  %v12974_v42 = vld [vmem:[#allocation46_spill] sm:$0xff] }
 0x119   : > { %8618 = vmatprep.mubr.msk.bf16.mxu1 %vm12966_vm13, %v3220_v3  ;;  %v10344_v21 = vadd.f32 %v1453_v50, %v1241_v16  ;;  %vm12969_vm13 = vmmov %vm12955_vm3  ;;  %v3474_v3 = vld [vmem:[#allocation2 + $0x39] sm:$0xff]  ;;  %vm12972_vm3 = vnez %v12971_v28  ;;  %vm12975_vm10 = vnez %v12974_v42 }
 0x11a   : > { %v8413_v9 = vpop.f32.mrf.mxu1  ;;  %v10346_v48 = vpop.f32.mrf.mxu0  ;;  %v3507_v16 = vsel %vm12972_vm3, %v3475_v27, 0.0 }
 0x11b   : > { %12967 = vst [vmem:[#allocation17_spill] sm:$0xff] %v10346_v48  ;;  %v10348_v1 = vadd.f32 %v8413_v9, %v8379_v58  ;;  %v3509_v58 = vsel %vm12975_vm10, %v3477_v0, 0.0 }
 0x11c   : > { %v10350_v32 = vpop.f32.mrf.mxu1  ;;  %v8386_v14 = vpop.f32.mrf.mxu0  ;;  %v3538_v28 = vpack.c.bf16 %v3509_v58, %v3476_v54 }
 0x11d   : > { %12968 = vst [vmem:[#allocation14_spill] sm:$0xff] %v10350_v32  ;;  %v3481_v32 = vld [vmem:[#allocation2 + $0x71] sm:$0xff] }
 0x11e   : > { %8593 = vmatmul.mubr.msk.bf16.gmra.mxu0 %vm12969_vm13, %v2931_v15  ;;  %v8416_v46 = vpop.f32.mrf.mxu1  ;;  %v1273_v18 = vpop.f32.mrf.mxu0  ;;  %vm12979_vm13 = vmmov %vm12970_vm11 }
 0x11f   : > { %8632 = vmatprep.mubr.msk.bf16.mxu0 %vm12970_vm11, %v3536_v20  ;;  %v10359_v33 = vadd.f32 %v8416_v46, %v8382_v29  ;;  %v3537_v20 = vpack.c.bf16 %v3507_v16, %v3474_v3  ;;  %v3480_v16 = vld [vmem:[#allocation2 + $0x69] sm:$0xff] }
 0x120   : > { %8619 = vmatmul.mubr.msk.bf16.gmra.mxu1 %vm12973_vm14, %v3221_v45  ;;  %v1469_v50 = vpop.f32.mrf.mxu1  ;;  %v8387_v15 = vpop.f32.mrf.mxu0  ;;  %v3479_v45 = vld [vmem:[#allocation2 + $0x61] sm:$0xff]  ;;  %vm12982_vm14 = vmmov %vm12979_vm13 }
 0x121   : > { %8622 = vmatprep.mubr.msk.bf16.mxu1 %vm12976_vm15, %v10199_v10  ;;  %v10363_v9 = vadd.f32 %v1469_v50, %v1257_v13  ;;  %vm12980_vm15 = vmmov %vm12970_vm11  ;;  %v3478_v13 = vld [vmem:[#allocation2 + $0x59] sm:$0xff]  ;;  %vm12981_vm11 = vnez %v12739_v22  ;;  %v12983_v46 = vld [vmem:[#allocation53_spill] sm:$0xff] }
 0x122   : > { %v8417_v27 = vpop.f32.mrf.mxu1  ;;  %v10365_v39 = vpop.f32.mrf.mxu0  ;;  %v3511_v0 = vsel %vm12981_vm11, %v3479_v45, 0.0  ;;  %vm12984_vm10 = vnez %v12983_v46  ;;  %v3209_v50 = vld [vmem:[#allocation2 + $0x120] sm:$0xff]  ;;  %vm12989_vm11 = vnez %v12749_v51 }
 0x123   : > { %12977 = vst [vmem:[#allocation19_spill] sm:$0xff] %v10365_v39  ;;  %v10367_v48 = vadd.f32 %v8417_v27, %v8383_v36  ;;  %v3513_v54 = vsel %vm12984_vm10, %v3481_v32, 0.0  ;;  %v3539_v45 = vpack.c.bf16 %v3511_v0, %v3478_v13 }
 0x124   : > { %v10369_v42 = vpop.f32.mrf.mxu1  ;;  %v3540_v22 = vpack.c.bf16 %v3513_v54, %v3480_v16 }
 0x125   : > { %12978 = vst [vmem:[#allocation20_spill] sm:$0xff] %v10369_v42 }
 0x126   : > { %v8430_v29 = vpop.f32.mrf.mxu0  ;;  %8633 = vmatmul.mubr.msk.bf16.vlgmr.msra.gmra.mxu0 %vm12979_vm13, %v3537_v20 }
 0x127   : > { %v10373_v10 = vadd.f32 %v8430_v29, %v10268_v62  ;;  %8636 = vmatprep.mubr.msk.bf16.mxu0 %vm12980_vm15, %v3538_v28  ;;  %v3208_v28 = vld [vmem:[#allocation2 + $0x118] sm:$0xff]  ;;  %vm12985_vm15 = vmmov %vm12979_vm13 }
 0x128   : > { %v8420_v3 = vpop.f32.mrf.mxu1  ;;  %8623 = vmatmul.mubr.msk.bf16.gmra.mxu1 %vm12982_vm14, %v10201_v19  ;;  %v1747_v36 = vpop.f32.mrf.mxu0  ;;  %v3225_v32 = vpack.c.bf16 %v3209_v50, %v3208_v28  ;;  %vm12986_vm14 = vmmov %vm12979_vm13 }
 0x129   : > { %v10382_v58 = vadd.f32 %v8420_v3, %v8386_v14  ;;  %v1874_v62 = vadd.f32 %v1747_v36, %v10271_v53  ;;  %8626 = vmatprep.mubr.msk.bf16.mxu1 %vm12979_vm13, %v10213_v23  ;;  %v3483_v14 = vld [vmem:[#allocation2 + $0x81] sm:$0xff]  ;;  %v3485_v23 = vld [vmem:[#allocation2 + $0x91] sm:$0xff]  ;;  %vm12987_vm13 = vnez %v12745_v30  ;;  %vm12988_vm10 = vmmov %vm12986_vm14 }
 0x12a   : > { %v1485_v20 = vpop.f32.mrf.mxu1  ;;  %v8431_v27 = vpop.f32.mrf.mxu0  ;;  %v3515_v13 = vsel %vm12987_vm13, %v3483_v14, 0.0  ;;  %v3489_v14 = vld [vmem:[#allocation2 + $0xb1] sm:$0xff] }
 0x12b   : > { %v10387_v29 = vadd.f32 %v1485_v20, %v1273_v18  ;;  %v1877_v19 = vadd.f32 %v8431_v27, %v10273_v5  ;;  %v3482_v5 = vld [vmem:[#allocation2 + $0x79] sm:$0xff] }
 0x12c   : > { %v8421_v39 = vpop.f32.mrf.mxu1  ;;  %v1750_v46 = vpop.f32.mrf.mxu0 }
 0x12d   : > { %v10390_v3 = vadd.f32 %v8421_v39, %v8387_v15  ;;  %v10393_v53 = vadd.f32 %v1750_v46, %v10276_v63  ;;  %v3484_v63 = vld [vmem:[#allocation2 + $0x89] sm:$0xff]  ;;  %v3517_v15 = vsel %vm12989_vm11, %v3485_v23, 0.0  ;;  %vm12992_vm11 = vnez %v12755_v37 }
 0x12e   : > { %v10395_v36 = vpop.f32.mrf.mxu1  ;;  %v8434_v42 = vpop.f32.mrf.mxu0  ;;  %8637 = vmatmul.mubr.msk.bf16.gmra.mxu0 %vm12985_vm15, %v3539_v45  ;;  %v3542_v50 = vpack.c.bf16 %v3517_v15, %v3484_v63  ;;  %v3487_v45 = vld [vmem:[#allocation2 + $0xa1] sm:$0xff]  ;;  %vm12990_vm15 = vmmov %vm12988_vm10 }
 0x12f   : > { %v1880_v18 = vadd.f32 %v8434_v42, %v10284_v52  ;;  %8640 = vmatprep.mubr.msk.bf16.mxu0 %vm12986_vm14, %v3540_v22  ;;  %v3541_v22 = vpack.c.bf16 %v3515_v13, %v3482_v5  ;;  %vm12991_vm14 = vnez %v12752_v24 }
 0x130   : > { %v8424_v0 = vpop.f32.mrf.mxu1  ;;  %8627 = vmatmul.mubr.msk.bf16.gmra.mxu1 %vm12988_vm10, %v3225_v32  ;;  %v1763_v39 = vpop.f32.mrf.mxu0  ;;  %v3519_v5 = vsel %vm12991_vm14, %v3487_v45, 0.0  ;;  %v3491_v45 = vld [vmem:[#allocation2 + $0xc1] sm:$0xff]  ;;  %vm12995_vm14 = vnez %v12779_v26 }
 0x131   : > { %v10406_v16 = vadd.f32 %v8424_v0, %v10249_v61  ;;  %v1878_v46 = vadd.f32 %v1763_v39, %v10288_v25  ;;  %v3488_v0 = vld [vmem:[#allocation2 + $0xa9] sm:$0xff] }
 0x132   : > { %v1501_v52 = vpop.f32.mrf.mxu1  ;;  %v8435_v42 = vpop.f32.mrf.mxu0 }
 0x133   : > { %v10410_v54 = vadd.f32 %v1501_v52, %v10255_v17  ;;  %v1881_v28 = vadd.f32 %v8435_v42, %v10290_v11  ;;  %v3486_v11 = vld [vmem:[#allocation2 + $0x99] sm:$0xff] }
 0x134   : > { %v8425_v20 = vpop.f32.mrf.mxu1  ;;  %v1766_v27 = vpop.f32.mrf.mxu0  ;;  %v3543_v52 = vpack.c.bf16 %v3519_v5, %v3486_v11 }
 0x135   : > { %v10414_v32 = vadd.f32 %v8425_v20, %v10257_v40  ;;  %v10417_v61 = vadd.f32 %v1766_v27, %v10293_v49  ;;  %v3521_v49 = vsel %vm12992_vm11, %v3489_v14, 0.0  ;;  %vm12994_vm11 = vnez %v12758_v57  ;;  %v3495_v57 = vld [vmem:[#allocation2 + $0xe1] sm:$0xff] }
 0x136   : > { %v10419_v25 = vpop.f32.mrf.mxu1  ;;  %v8438_v23 = vpop.f32.mrf.mxu0  ;;  %8641 = vmatmul.mubr.msk.bf16.gmra.mxu0 %vm12988_vm10, %v3541_v22 }
 0x137   : > { %v10423_v17 = vadd.f32 %v8438_v23, %v10301_v47  ;;  %8644 = vmatprep.mubr.msk.bf16.mxu0 %vm12990_vm15, %v3542_v50  ;;  %v3544_v50 = vpack.c.bf16 %v3521_v49, %v3488_v0  ;;  %vm12993_vm15 = vmmov %vm12988_vm10 }
 0x138   : > { %v8464_v40 = vpop.f32.mrf.mxu1  ;;  %v1779_v13 = vpop.f32.mrf.mxu0 }
 0x139   : > { %v10431_v39 = vadd.f32 %v8464_v40, %v10373_v10  ;;  %v1882_v63 = vadd.f32 %v1779_v13, %v10305_v12  ;;  %v3493_v10 = vld [vmem:[#allocation2 + $0xd1] sm:$0xff]  ;;  %v3492_v13 = vld [vmem:[#allocation2 + $0xc9] sm:$0xff] }
 0x13a   : > { %v2073_v15 = vpop.f32.mrf.mxu1  ;;  %v8439_v47 = vpop.f32.mrf.mxu0  ;;  %v9129_v12 = vld [vmem:[%s12439_s3 + $0x78] sm:$0xff]   ;;  %v3525_v0 = vsel %vm12995_vm14, %v3493_v10, 0.0  ;;  %vm12997_vm14 = vnez %v12782_v8 }
 0x13b   : > { %v10434_v42 = vadd.f32 %v2073_v15, %v1874_v62  ;;  %v1885_v22 = vadd.f32 %v8439_v47, %v10308_v35  ;;  %8664 = vmatprep.subr.bf16.mxu1 %v9129_v12 }
 0x13c   : > { %v8465_v20 = vpop.f32.mrf.mxu1  ;;  %v1782_v27 = vpop.f32.mrf.mxu0  ;;  %8665 = vmatpush3.bf16.msra.mxu1 %v9129_v12 }
 0x13d   : > { %v10437_v23 = vadd.f32 %v8465_v20, %v1877_v19  ;;  %v10440_v14 = vadd.f32 %v1782_v27, %v10311_v59  ;;  %v3490_v19 = vld [vmem:[#allocation2 + $0xb9] sm:$0xff]  ;;  %v3523_v59 = vsel %vm12994_vm11, %v3491_v45, 0.0  ;;  %v3546_v27 = vpack.c.bf16 %v3525_v0, %v3492_v13 }
 0x13e   : > { %v10445_v40 = vpop.f32.mrf.mxu1  ;;  %v8442_v62 = vpop.f32.mrf.mxu0  ;;  %8645 = vmatmul.mubr.msk.bf16.gmra.mxu0 %vm12988_vm10, %v3543_v52  ;;  %v3545_v52 = vpack.c.bf16 %v3523_v59, %v3490_v19  ;;  %v3494_v19 = vld [vmem:[#allocation2 + $0xd9] sm:$0xff]  ;;  %vm12998_vm11 = vnez %v12787_v31 }
 0x13f   : > { %v10449_v35 = vadd.f32 %v8442_v62, %v10321_v43  ;;  %8648 = vmatprep.mubr.msk.bf16.mxu0 %vm12993_vm15, %v3544_v50  ;;  %vm12996_vm15 = vmmov %vm12988_vm10 }
 0x140   : > { %v8468_v11 = vpop.f32.mrf.mxu1  ;;  %v1795_v5 = vpop.f32.mrf.mxu0 }
 0x141   : > { %v10456_v49 = vadd.f32 %v8468_v11, %v1880_v18  ;;  %v1886_v15 = vadd.f32 %v1795_v5, %v10325_v4  ;;  %v3497_v18 = vld [vmem:[#allocation2 + $0xf1] sm:$0xff]  ;;  %v3496_v11 = vld [vmem:[#allocation2 + $0xe9] sm:$0xff] }
 0x142   : > { %v2089_v43 = vpop.f32.mrf.mxu1  ;;  %v8443_v47 = vpop.f32.mrf.mxu0  ;;  %v9130_v4 = vld [vmem:[%s12439_s3 + $0x70] sm:$0xff]   ;;  %v3529_v5 = vsel %vm12998_vm11, %v3497_v18, 0.0  ;;  %vm13000_vm11 = vnez %v12792_v2 }
 0x143   : > { %v10459_v50 = vadd.f32 %v2089_v43, %v1878_v46  ;;  %v1889_v20 = vadd.f32 %v8443_v47, %v10330_v55  ;;  %8666 = vmatprep.subr.bf16.mxu1 %v9130_v4 }
 0x144   : > { %v8469_v45 = vpop.f32.mrf.mxu1  ;;  %v1798_v62 = vpop.f32.mrf.mxu0  ;;  %8667 = vmatpush3.bf16.msra.mxu1 %v9130_v4 }
 0x145   : > { %v10462_v37 = vadd.f32 %v8469_v45, %v1881_v28  ;;  %v10465_v10 = vadd.f32 %v1798_v62, %v10333_v38  ;;  %v3527_v28 = vsel %vm12997_vm14, %v3495_v57, 0.0  ;;  %vm13001_vm14 = vnez %v12804_v60 }
 0x146   : > { %v10470_v12 = vpop.f32.mrf.mxu1  ;;  %v8446_v46 = vpop.f32.mrf.mxu0  ;;  %8649 = vmatmul.mubr.msk.bf16.gmra.mxu0 %vm12988_vm10, %v3545_v52  ;;  %v3547_v47 = vpack.c.bf16 %v3527_v28, %v3494_v19  ;;  %v3533_v28 = vsel %vm13001_vm14, %v10228_v6, 0.0 }
 0x147   : > { %v1892_v55 = vadd.f32 %v8446_v46, %v10341_v41  ;;  %8652 = vmatprep.mubr.msk.bf16.mxu0 %vm12996_vm15, %v3546_v27  ;;  %v3548_v27 = vpack.c.bf16 %v3529_v5, %v3496_v11  ;;  %v3499_v46 = vld [vmem:[#allocation2 + $0x101] sm:$0xff]  ;;  %vm12999_vm15 = vmmov %vm12988_vm10 }
 0x148   : > { %v8472_v38 = vpop.f32.mrf.mxu1  ;;  %v1811_v59 = vpop.f32.mrf.mxu0  ;;  %v3531_v4 = vsel %vm13000_vm11, %v3499_v46, 0.0  ;;  %v3503_v46 = vld [vmem:[#allocation2 + $0x121] sm:$0xff] }
 0x149   : > { %v10480_v13 = vadd.f32 %v8472_v38, %v10423_v17  ;;  %v1890_v0 = vadd.f32 %v1811_v59, %v10344_v21  ;;  %v9131_v17 = vld [vmem:[%s12439_s3 + $0x68] sm:$0xff]  }
 0x14a   : > { %v2105_v41 = vpop.f32.mrf.mxu1  ;;  %v8447_v43 = vpop.f32.mrf.mxu0  ;;  %8668 = vmatprep.subr.bf16.mxu1 %v9131_v17 }
 0x14b   : > { %v10483_v52 = vadd.f32 %v2105_v41, %v1882_v63  ;;  %v1893_v57 = vadd.f32 %v8447_v43, %v10348_v1  ;;  %v3498_v1 = vld [vmem:[#allocation2 + $0xf9] sm:$0xff]  ;;  %8669 = vmatpush3.bf16.msra.mxu1 %v9131_v17 }
 0x14c   : > { %v8473_v45 = vpop.f32.mrf.mxu1  ;;  %v10486_v62 = vpop.f32.mrf.mxu0  ;;  %v3549_v5 = vpack.c.bf16 %v3531_v4, %v3498_v1 }
 0x14d   : > { %v10488_v31 = vadd.f32 %v8473_v45, %v1885_v22 }
 0x14e   : > { %v10493_v18 = vpop.f32.mrf.mxu1  ;;  %v8450_v21 = vpop.f32.mrf.mxu0  ;;  %8653 = vmatmul.mubr.msk.bf16.gmra.mxu0 %vm12988_vm10, %v3547_v47  ;;  %v3550_v47 = vpack.c.bf16 %v3533_v28, %v10239_v7  ;;  %v3535_v7 = vsel %vm10104_vm0, %v3503_v46, 0.0 }
 0x14f   : > { %v1896_v63 = vadd.f32 %v8450_v21, %v10359_v33  ;;  %8656 = vmatprep.mubr.msk.bf16.mxu0 %vm12999_vm15, %v3548_v27  ;;  %vm13002_vm15 = vmmov %vm12988_vm10 }
 0x150   : > { %v8476_v22 = vpop.f32.mrf.mxu1  ;;  %v1827_v19 = vpop.f32.mrf.mxu0 }
 0x151   : > { %v10504_v38 = vadd.f32 %v8476_v22, %v10449_v35  ;;  %v1894_v59 = vadd.f32 %v1827_v19, %v10363_v9  ;;  %v9132_v35 = vld [vmem:[%s12439_s3 + $0x60] sm:$0xff]  }
 0x152   : > { %v2121_v33 = vpop.f32.mrf.mxu1  ;;  %v8451_v11 = vpop.f32.mrf.mxu0  ;;  %8670 = vmatprep.subr.bf16.mxu1 %v9132_v35 }
 0x153   : > { %v10507_v41 = vadd.f32 %v2121_v33, %v1886_v15  ;;  %v1897_v43 = vadd.f32 %v8451_v11, %v10367_v48  ;;  %v3502_v48 = vld [vmem:[#allocation2 + $0x119] sm:$0xff]  ;;  %8671 = vmatpush3.bf16.msra.mxu1 %v9132_v35 }
 0x154   : > { %v8477_v27 = vpop.f32.mrf.mxu1  ;;  %v10511_v45 = vpop.f32.mrf.mxu0  ;;  %v3551_v28 = vpack.c.bf16 %v3535_v7, %v3502_v48 }
 0x155   : > { %v10513_v6 = vadd.f32 %v8477_v27, %v1889_v20 }
 0x156   : > { %v10518_v9 = vpop.f32.mrf.mxu1  ;;  %v8454_v17 = vpop.f32.mrf.mxu0  ;;  %8657 = vmatmul.mubr.msk.bf16.gmra.mxu0 %vm12988_vm10, %v3549_v5 }
 0x157   : > { %v1900_v15 = vadd.f32 %v8454_v17, %v10382_v58  ;;  %8660 = vmatprep.mubr.msk.bf16.mxu0 %vm13002_vm15, %v3550_v47  ;;  %v9134_v47 = vld [vmem:[%s12439_s3 + $0x38] sm:$0xff]   ;;  %vm9215_vm15 = vmmov 1  }
 0x158   : > { %v8480_v20 = vpop.f32.mrf.mxu1  ;;  %v1843_v21 = vpop.f32.mrf.mxu0  ;;  %8712 = vmatprep.subr.bf16.mxu0 %v9134_v47 }
 0x159   : > { %v10525_v1 = vadd.f32 %v8480_v20, %v1892_v55  ;;  %v1898_v4 = vadd.f32 %v1843_v21, %v10387_v29  ;;  %v9133_v29 = vld [vmem:[%s12439_s3 + $0x58] sm:$0xff]   ;;  %8713 = vmatpush3.bf16.msra.mxu0 %v9134_v47 }
 0x15a   : > { %v2137_v22 = vpop.f32.mrf.mxu1  ;;  %v8455_v19 = vpop.f32.mrf.mxu0  ;;  %8672 = vmatprep.subr.bf16.mxu1 %v9133_v29 }
 0x15b   : > { %v10528_v33 = vadd.f32 %v2137_v22, %v1890_v0  ;;  %v1901_v58 = vadd.f32 %v8455_v19, %v10390_v3  ;;  %8673 = vmatpush3.bf16.msra.mxu1 %v9133_v29 }
 0x15c   : > { %v8481_v11 = vpop.f32.mrf.mxu1  ;;  %v10531_v5 = vpop.f32.mrf.mxu0 }
 0x15d   : > { %v10536_v27 = vadd.f32 %v8481_v11, %v1893_v57  ;;  %v9135_v57 = vld [vmem:[%s12439_s3 + $0x30] sm:$0xff]  }
 0x15e   : > { %v10541_v55 = vpop.f32.mrf.mxu1  ;;  %v8458_v46 = vpop.f32.mrf.mxu0  ;;  %8661 = vmatmul.mubr.msk.bf16.gmra.mxu0 %vm12988_vm10, %v3551_v28  ;;  %8714 = vmatprep.subr.bf16.mxu0 %v9135_v57  ;;  %v9137_v28 = vld [vmem:[%s12439_s3 + $0x28] sm:$0xff]   ;;  %vm10645_vm10 = vmpackc.low %vm9215_vm15, %vm9367_vm2 }
 0x15f   : > { %13003 = vst [vmem:[#allocation60_spill] sm:$0xff] %v10541_v55  ;;  %v1904_v3 = vadd.f32 %v8458_v46, %v10406_v16  ;;  %8715 = vmatpush3.bf16.msra.mxu0 %v9135_v57  ;;  %vm10967_vm2 = vmpackc.low %vm9215_vm15, %vm12927_vm1 }
 0x160   : > { %v8484_v0 = vpop.f32.mrf.mxu1  ;;  %v1859_v35 = vpop.f32.mrf.mxu0  ;;  %8716 = vmatprep.subr.bf16.mxu0 %v9137_v28  ;;  %vm10986_vm1 = vmpackc.low %vm9215_vm15, %vm12810_vm7 }
 0x161   : > { %v10548_v17 = vadd.f32 %v8484_v0, %v1896_v63  ;;  %v1902_v48 = vadd.f32 %v1859_v35, %v10410_v54  ;;  %v9136_v54 = vld [vmem:[%s12439_s3 + $0x50] sm:$0xff]   ;;  %vm11031_vm7 = vmpackc.low %vm9215_vm15, %vm12811_vm12 }
 0x162   : > { %v2153_v7 = vpop.f32.mrf.mxu1  ;;  %v8459_v20 = vpop.f32.mrf.mxu0  ;;  %8674 = vmatprep.subr.bf16.mxu1 %v9136_v54  ;;  %vm11055_vm12 = vmpackc.low %vm9215_vm15, %vm12820_vm4 }
 0x163   : > { %v10551_v21 = vadd.f32 %v2153_v7, %v1894_v59  ;;  %v1905_v16 = vadd.f32 %v8459_v20, %v10414_v32  ;;  %8717 = vmatpush3.bf16.msra.mxu0 %v9137_v28  ;;  %8675 = vmatpush3.bf16.msra.mxu1 %v9136_v54  ;;  %vm11098_vm4 = vmpackc.low %vm9215_vm15, %vm12938_vm9 }
 0x164   : > { %v8485_v22 = vpop.f32.mrf.mxu1  ;;  %v10554_v19 = vpop.f32.mrf.mxu0  ;;  %vm11122_vm9 = vmpackc.low %vm9215_vm15, %vm12829_vm5 }
 0x165   : > { %13004 = vst [vmem:[#allocation25_spill] sm:$0xff] %v10554_v19  ;;  %v10559_v11 = vadd.f32 %v8485_v22, %v1897_v43  ;;  %v9138_v43 = vld [vmem:[%s12439_s3 + $0x20] sm:$0xff]   ;;  %vm11165_vm5 = vmpackc.low %vm9215_vm15, %vm12837_vm6 }
 0x166   : > { %v10564_v63 = vpop.f32.mrf.mxu1  ;;  %v8498_v59 = vpop.f32.mrf.mxu0  ;;  %8718 = vmatprep.subr.bf16.mxu0 %v9138_v43  ;;  %vm11188_vm6 = vmpackc.low %vm9215_vm15, %vm12840_vm8 }
 0x167   : > { %13005 = vst [vmem:[#allocation22_spill] sm:$0xff] %v10564_v63  ;;  %v10567_v32 = vadd.f32 %v8498_v59, %v10431_v39  ;;  %8719 = vmatpush3.bf16.msra.mxu0 %v9138_v43 }
 0x168   : > { %v8488_v47 = vpop.f32.mrf.mxu1  ;;  %v2367_v29 = vpop.f32.mrf.mxu0 }
 0x169   : > { %v10572_v46 = vadd.f32 %v8488_v47, %v1900_v15  ;;  %v10575_v0 = vadd.f32 %v2367_v29, %v10434_v42  ;;  %v9139_v15 = vld [vmem:[%s12439_s3 + $0x48] sm:$0xff]   ;;  %v9140_v42 = vld [vmem:[%s12439_s3 + $0x18] sm:$0xff]   ;;  %v9141_v29 = vld [vmem:[%s12439_s3 + $0x10] sm:$0xff]  }
 0x16a   : > { %v2169_v35 = vpop.f32.mrf.mxu1  ;;  %v8499_v57 = vpop.f32.mrf.mxu0  ;;  %8676 = vmatprep.subr.bf16.mxu1 %v9139_v15  ;;  %8720 = vmatprep.subr.bf16.mxu0 %v9140_v42 }
 0x16b   : > { %v10577_v7 = vadd.f32 %v2169_v35, %v1898_v4  ;;  %v10580_v39 = vadd.f32 %v8499_v57, %v10437_v23  ;;  %8677 = vmatpush3.bf16.msra.mxu1 %v9139_v15  ;;  %8721 = vmatpush3.bf16.msra.mxu0 %v9140_v42  ;;  %v9204_v42 = vld [vmem:[#allocation3] sm:$0xff] }
 0x16c   : > { %v8489_v20 = vpop.f32.mrf.mxu1  ;;  %v10582_v22 = vpop.f32.mrf.mxu0  ;;  %8722 = vmatprep.subr.bf16.mxu0 %v9141_v29 }
 0x16d   : > { %v10590_v28 = vadd.f32 %v8489_v20, %v1901_v58  ;;  %v9142_v58 = vld [vmem:[%s12439_s3 + $0x40] sm:$0xff]  }
 0x16e   : > { %v10592_v54 = vpop.f32.mrf.mxu1  ;;  %v8502_v4 = vpop.f32.mrf.mxu0  ;;  %8678 = vmatprep.subr.bf16.mxu1 %v9142_v58 }
 0x16f   : > { %13006 = vst [vmem:[#allocation27_spill] sm:$0xff] %v10592_v54  ;;  %v10595_v23 = vadd.f32 %v8502_v4, %v10456_v49  ;;  %8723 = vmatpush3.bf16.msra.mxu0 %v9141_v29  ;;  %8679 = vmatpush3.bf16.msra.mxu1 %v9142_v58  ;;  %v4067_v4 = vpack.c.bf16 %v9204_v42, %v9204_v42  ;;  %v9144_v58 = vld [vmem:[%s12439_s3] sm:$0xff]  }
 0x170   : > { %v8492_v59 = vpop.f32.mrf.mxu1  ;;  %v2383_v47 = vpop.f32.mrf.mxu0  ;;  %v3940_v42 = vld [vmem:[#allocation3 + $0xf] sm:$0xff] }
 0x171   : > { %v10603_v43 = vadd.f32 %v8492_v59, %v1904_v3  ;;  %v10606_v35 = vadd.f32 %v2383_v47, %v10459_v50  ;;  %v9143_v50 = vld [vmem:[%s12439_s3 + $0x8] sm:$0xff]   ;;  %8680 = vmatprep.mubr.bf16.mxu1 %v4067_v4 }
 0x172   : > { %v2185_v57 = vpop.f32.mrf.mxu1  ;;  %v8503_v49 = vpop.f32.mrf.mxu0  ;;  %8724 = vmatprep.subr.bf16.mxu0 %v9143_v50 }
 0x173   : > { %v10608_v20 = vadd.f32 %v2185_v57, %v1902_v48  ;;  %v10611_v15 = vadd.f32 %v8503_v49, %v10462_v37  ;;  %8725 = vmatpush3.bf16.msra.mxu0 %v9143_v50  ;;  %v3939_v49 = vld [vmem:[#allocation3 + $0x7] sm:$0xff] }
 0x174   : > { %v8493_v56 = vpop.f32.mrf.mxu1  ;;  %v10613_v60 = vpop.f32.mrf.mxu0  ;;  %8726 = vmatprep.subr.bf16.mxu0 %v9144_v58  ;;  %v7440_v4 = vpack.c.bf16 %v3940_v42, %v3939_v49 }
 0x175   : > { %v10618_v3 = vadd.f32 %v8493_v56, %v1905_v16 }
 0x176   : > { %v10620_v59 = vpop.f32.mrf.mxu1  ;;  %v8506_v48 = vpop.f32.mrf.mxu0  ;;  %8728 = vmatprep.mubr.msk.bf16.mxu0 %vm10645_vm10, %v7440_v4  ;;  %v10669_v4 = vld [vmem:[%s12439_s3 + $0xb8] sm:$0xff]  }
 0x177   : > { %13007 = vst [vmem:[#allocation28_spill] sm:$0xff] %v10620_v59  ;;  %v10623_v37 = vadd.f32 %v8506_v48, %v10480_v13  ;;  %8727 = vmatpush3.bf16.msra.mxu0 %v9144_v58  ;;  %13014 = vst [vmem:[#allocation35_spill] sm:$0xff] %v10669_v4  ;;  %8760 = vmatprep.subr.bf16.mxu1 %v10669_v4 }
 0x178   : > { %v10625_v47 = vpop.f32.mrf.mxu1  ;;  %v2399_v29 = vpop.f32.mrf.mxu0 }
 0x179   : > { %v10631_v57 = vadd.f32 %v2399_v29, %v10483_v52  ;;  %v13008_v52 = vmov 0 }
 0x17a   : > { %v10633_v56 = vpop.f32.mrf.mxu1  ;;  %v8507_v16 = vpop.f32.mrf.mxu0  ;;  %v13009_v52 = vsel %vm10645_vm10, 4294967295, %v13008_v52 }
 0x17b   : > { %v10636_v13 = vadd.f32 %v8507_v16, %v10488_v31  ;;  %13010 = vst [vmem:[#allocation30_spill] sm:$0xff] %v13009_v52 }
 0x17c   : > { %v10638_v50 = vpop.f32.mrf.mxu1  ;;  %v10640_v48 = vpop.f32.mrf.mxu0 }
 0x17e   : > { %v10651_v29 = vpop.f32.mrf.mxu1  ;;  %v8510_v31 = vpop.f32.mrf.mxu0 }
 0x17f   : > { %v10654_v58 = vadd.f32 %v8510_v31, %v10504_v38 }
 0x180   : > { %v10656_v16 = vpop.f32.mrf.mxu1  ;;  %v2415_v49 = vpop.f32.mrf.mxu0 }
 0x181   : > { %13011 = vst [vmem:[#allocation39_spill] sm:$0xff] %v10654_v58  ;;  %v10659_v42 = vadd.f32 %v2415_v49, %v10507_v41 }
 0x182   : > { %v10661_v34 = vpop.f32.mrf.mxu1  ;;  %v8511_v2 = vpop.f32.mrf.mxu0 }
 0x183   : > { %13012 = vst [vmem:[#allocation43_spill] sm:$0xff] %v10659_v42  ;;  %v10664_v8 = vadd.f32 %v8511_v2, %v10513_v6 }
 0x184   : > { %v10671_v26 = vpop.f32.mrf.mxu1  ;;  %v10673_v38 = vpop.f32.mrf.mxu0 }
 0x185   : > { %13013 = vst [vmem:[#allocation32_spill] sm:$0xff] %v10664_v8  ;;  %13015 = vst [vmem:[#allocation44_spill] sm:$0xff] %v10673_v38 }
 0x186   : > { %v10676_v31 = vpop.f32.mrf.mxu1  ;;  %v8514_v41 = vpop.f32.mrf.mxu0 }
 0x187   : > { %v10679_v49 = vadd.f32 %v8514_v41, %v10525_v1 }
 0x188   : > { %v10681_v24 = vpop.f32.mrf.mxu1  ;;  %v2431_v2 = vpop.f32.mrf.mxu0 }
 0x189   : > { %13016 = vst [vmem:[#allocation50_spill] sm:$0xff] %v10679_v49  ;;  %v10684_v6 = vadd.f32 %v2431_v2, %v10528_v33 }
 0x18a   : > { %v10686_v51 = vpop.f32.mrf.mxu1  ;;  %v8515_v30 = vpop.f32.mrf.mxu0 }
 0x18b   : > { %13017 = vst [vmem:[#allocation37_spill] sm:$0xff] %v10684_v6  ;;  %v10689_v52 = vadd.f32 %v8515_v30, %v10536_v27 }
 0x18c   : > { %v10691_v59 = vpop.f32.mrf.mxu1  ;;  %v10693_v19 = vpop.f32.mrf.mxu0 }
 0x18d   : > { %13018 = vst [vmem:[#allocation51_spill] sm:$0xff] %v10689_v52  ;;  %13019 = vst [vmem:[#allocation4_spill] sm:$0xff] %v10691_v59 }
 0x18e   : > { %13020 = vst [vmem:[#allocation5_spill] sm:$0xff] %v10693_v19  ;;  %v10695_v8 = vpop.f32.mrf.mxu1  ;;  %v8518_v1 = vpop.f32.mrf.mxu0 }
 0x18f   : > { %13021 = vst [vmem:[#allocation8_spill] sm:$0xff] %v10695_v8  ;;  %v10698_v41 = vadd.f32 %v8518_v1, %v10548_v17 }
 0x190   : > { %v10700_v49 = vpop.f32.mrf.mxu1  ;;  %v2447_v33 = vpop.f32.mrf.mxu0 }
 0x191   : > { %13022 = vst [vmem:[#allocation9_spill] sm:$0xff] %v10698_v41  ;;  %13023 = vst [vmem:[#allocation13_spill] sm:$0xff] %v10700_v49  ;;  %v10703_v2 = vadd.f32 %v2447_v33, %v10551_v21 }
 0x192   : > { %v10705_v6 = vpop.f32.mrf.mxu1  ;;  %v8519_v30 = vpop.f32.mrf.mxu0 }
 0x193   : > { %13024 = vst [vmem:[#allocation61_spill] sm:$0xff] %v10703_v2  ;;  %13025 = vst [vmem:[#allocation15_spill] sm:$0xff] %v10705_v6  ;;  %v10708_v27 = vadd.f32 %v8519_v30, %v10559_v11 }
 0x194   : > { %v10710_v52 = vpop.f32.mrf.mxu1  ;;  %v10712_v19 = vpop.f32.mrf.mxu0 }
 0x195   : > { %13026 = vst [vmem:[#allocation21_spill] sm:$0xff] %v10708_v27  ;;  %13027 = vst [vmem:[#allocation62_spill] sm:$0xff] %v10710_v52 }
 0x196   : > { %13028 = vst [vmem:[#allocation63_spill] sm:$0xff] %v10712_v19  ;;  %v10714_v42 = vpop.f32.mrf.mxu1  ;;  %v8522_v17 = vpop.f32.mrf.mxu0 }
 0x197   : > { %13029 = vst [vmem:[#allocation23_spill] sm:$0xff] %v10714_v42  ;;  %v10717_v1 = vadd.f32 %v8522_v17, %v10572_v46  ;;  %v10736_v46 = vld [vmem:[%s12439_s3 + $0xf8] sm:$0xff]  }
 0x198   : > { %v10719_v41 = vpop.f32.mrf.mxu1  ;;  %v2463_v21 = vpop.f32.mrf.mxu0  ;;  %13037 = vst [vmem:[#allocation48_spill] sm:$0xff] %v10736_v46  ;;  %8808 = vmatprep.subr.bf16.mxu0 %v10736_v46 }
 0x199   : > { %13030 = vst [vmem:[#allocation38_spill] sm:$0xff] %v10717_v1  ;;  %13031 = vst [vmem:[#allocation64_spill] sm:$0xff] %v10719_v41  ;;  %v10722_v33 = vadd.f32 %v2463_v21, %v10577_v7 }
 0x19a   : > { %v10724_v2 = vpop.f32.mrf.mxu1  ;;  %v8523_v11 = vpop.f32.mrf.mxu0 }
 0x19b   : > { %13032 = vst [vmem:[#allocation66_spill] sm:$0xff] %v10722_v33  ;;  %13033 = vst [vmem:[#allocation40_spill] sm:$0xff] %v10724_v2  ;;  %v10727_v30 = vadd.f32 %v8523_v11, %v10590_v28 }
 0x19c   : > { %v10729_v27 = vpop.f32.mrf.mxu1  ;;  %v10731_v19 = vpop.f32.mrf.mxu0 }
 0x19d   : > { %13034 = vst [vmem:[#allocation45_spill] sm:$0xff] %v10727_v30  ;;  %13035 = vst [vmem:[#allocation67_spill] sm:$0xff] %v10729_v27 }
 0x19e   : > { %13036 = vst [vmem:[#allocation68_spill] sm:$0xff] %v10731_v19  ;;  %v10738_v17 = vpop.f32.mrf.mxu1  ;;  %v8526_v1 = vpop.f32.mrf.mxu0 }
 0x19f   : > { %13038 = vst [vmem:[#allocation49_spill] sm:$0xff] %v10738_v17  ;;  %v10742_v7 = vadd.f32 %v8526_v1, %v10603_v43 }
 0x1a0   : > { %v10744_v21 = vpop.f32.mrf.mxu1  ;;  %v2479_v28 = vpop.f32.mrf.mxu0 }
 0x1a1   : > { %13039 = vst [vmem:[#allocation69_spill] sm:$0xff] %v10742_v7  ;;  %13040 = vst [vmem:[#allocation72_spill] sm:$0xff] %v10744_v21  ;;  %v10747_v11 = vadd.f32 %v2479_v28, %v10608_v20 }
 0x1a2   : > { %v10749_v30 = vpop.f32.mrf.mxu1  ;;  %v8527_v33 = vpop.f32.mrf.mxu0 }
 0x1a3   : > { %13041 = vst [vmem:[#allocation73_spill] sm:$0xff] %v10747_v11  ;;  %13042 = vst [vmem:[#allocation75_spill] sm:$0xff] %v10749_v30  ;;  %v10752_v19 = vadd.f32 %v8527_v33, %v10618_v3 }
 0x1a4   : > { %v10754_v27 = vpop.f32.mrf.mxu1  ;;  %v10756_v17 = vpop.f32.mrf.mxu0 }
 0x1a5   : > { %13043 = vst [vmem:[#allocation77_spill] sm:$0xff] %v10752_v19  ;;  %13044 = vst [vmem:[#allocation78_spill] sm:$0xff] %v10754_v27 }
 0x1a6   : > { %13045 = vst [vmem:[#allocation80_spill] sm:$0xff] %v10756_v17  ;;  %v10758_v2 = vpop.f32.mrf.mxu1  ;;  %v8566_v43 = vpop.f32.mrf.mxu0 }
 0x1a7   : > { %13046 = vst [vmem:[#allocation81_spill] sm:$0xff] %v10758_v2 }
 0x1a8   : > { %v10760_v1 = vpop.f32.mrf.mxu1  ;;  %v3019_v7 = vpop.f32.mrf.mxu0 }
 0x1a9   : > { %13047 = vst [vmem:[#allocation82_spill] sm:$0xff] %v10760_v1 }
 0x1aa   : > { %v10762_v21 = vpop.f32.mrf.mxu1  ;;  %v10764_v20 = vpop.f32.mrf.mxu0 }
 0x1ab   : > { %13048 = vst [vmem:[#allocation83_spill] sm:$0xff] %v10762_v21 }
 0x1ac   : > { %v10766_v28 = vpop.f32.mrf.mxu1  ;;  %v10768_v11 = vpop.f32.mrf.mxu0 }
 0x1ad   : > { %13049 = vst [vmem:[#allocation84_spill] sm:$0xff] %v10766_v28 }
 0x1ae   : > { %v10770_v3 = vpop.f32.mrf.mxu1  ;;  %v10772_v33 = vpop.f32.mrf.mxu0 }
 0x1af   : > { %13050 = vst [vmem:[#allocation85_spill] sm:$0xff] %v10770_v3 }
 0x1b0   : > { %v10774_v19 = vpop.f32.mrf.mxu1  ;;  %v10776_v17 = vpop.f32.mrf.mxu0 }
 0x1b1   : > { %13051 = vst [vmem:[#allocation86_spill] sm:$0xff] %v10774_v19 }
 0x1b2   : > { %v10778_v2 = vpop.f32.mrf.mxu1  ;;  %v10780_v1 = vpop.f32.mrf.mxu0 }
 0x1b3   : > { %13052 = vst [vmem:[#allocation87_spill] sm:$0xff] %v10778_v2 }
 0x1b4   : > { %v10782_v27 = vpop.f32.mrf.mxu1  ;;  %v10784_v21 = vpop.f32.mrf.mxu0 }
 0x1b5   : > { %13053 = vst [vmem:[#allocation88_spill] sm:$0xff] %v10782_v27 }
 0x1b6   : > { %v10786_v30 = vpop.f32.mrf.mxu1  ;;  %v10788_v28 = vpop.f32.mrf.mxu0 }
 0x1b7   : > { %13054 = vst [vmem:[#allocation89_spill] sm:$0xff] %v10786_v30 }
 0x1b8   : > { %v8600_v46 = vpop.f32.mrf.mxu1  ;;  %v10790_v3 = vpop.f32.mrf.mxu0 }
 0x1b9   : > { %13055 = vst [vmem:[#allocation90_spill] sm:$0xff] %v10790_v3 }
 0x1ba   : > { %v3313_v41 = vpop.f32.mrf.mxu1  ;;  %v10792_v42 = vpop.f32.mrf.mxu0 }
 0x1bb   : > { %13056 = vst [vmem:[#allocation91_spill] sm:$0xff] %v10792_v42 }
 0x1bc   : > { %v8601_v19 = vpop.f32.mrf.mxu1  ;;  %v10794_v52 = vpop.f32.mrf.mxu0 }
 0x1bd   : > { %13057 = vst [vmem:[#allocation92_spill] sm:$0xff] %v10794_v52 }
 0x1be   : > { %v3316_v2 = vpop.f32.mrf.mxu1  ;;  %v10796_v6 = vpop.f32.mrf.mxu0 }
 0x1bf   : > { %13058 = vst [vmem:[#allocation93_spill] sm:$0xff] %v10796_v6 }
 0x1c0   : > { %v10798_v38 = vpop.f32.mrf.mxu1  ;;  %v10800_v27 = vpop.f32.mrf.mxu0 }
 0x1c1   : > { %13059 = vst [vmem:[#allocation94_spill] sm:$0xff] %v10800_v27 }
 0x1c2   : > { %v10802_v49 = vpop.f32.mrf.mxu1  ;;  %v10804_v30 = vpop.f32.mrf.mxu0 }
 0x1c3   : > { %13060 = vst [vmem:[#allocation95_spill] sm:$0xff] %v10804_v30 }
 0x1c4   : > { %v10806_v58 = vpop.f32.mrf.mxu1  ;;  %v10808_v54 = vpop.f32.mrf.mxu0 }
 0x1c5   : > { %13061 = vst [vmem:[#allocation96_spill] sm:$0xff] %v10808_v54 }
 0x1c6   : > { %v10810_v4 = vpop.f32.mrf.mxu1  ;;  %v10812_v42 = vpop.f32.mrf.mxu0 }
 0x1c7   : > { %13062 = vst [vmem:[#allocation97_spill] sm:$0xff] %v10812_v42 }
 0x1c8   : > { %v10814_v52 = vpop.f32.mrf.mxu1  ;;  %v10816_v8 = vpop.f32.mrf.mxu0 }
 0x1c9   : > { %13063 = vst [vmem:[#allocation98_spill] sm:$0xff] %v10814_v52  ;;  %13064 = vst [vmem:[#allocation99_spill] sm:$0xff] %v10816_v8 }
 0x1ca   : > { %v10818_v6 = vpop.f32.mrf.mxu1  ;;  %v10820_v63 = vpop.f32.mrf.mxu0 }
 0x1cb   : > { %13065 = vst [vmem:[#allocation100_spill] sm:$0xff] %v10818_v6  ;;  %13066 = vst [vmem:[#allocation101_spill] sm:$0xff] %v10820_v63 }
 0x1cc   : > { %v10822_v27 = vpop.f32.mrf.mxu1  ;;  %v10824_v55 = vpop.f32.mrf.mxu0 }
 0x1cd   : > { %13067 = vst [vmem:[#allocation102_spill] sm:$0xff] %v10822_v27  ;;  %13068 = vst [vmem:[#allocation103_spill] sm:$0xff] %v10824_v55 }
 0x1ce   : > { %v10826_v30 = vpop.f32.mrf.mxu0  ;;  %v10828_v3 = vpop.f32.mrf.mxu1 }
 0x1cf   : > { %13069 = vst [vmem:[#allocation104_spill] sm:$0xff] %v10826_v30  ;;  %13070 = vst [vmem:[#allocation105_spill] sm:$0xff] %v10828_v3 }
 0x1d0   : > { %v10830_v54 = vpop.f32.mrf.mxu0  ;;  %v10834_v42 = vpop.f32.mrf.mxu1 }
 0x1d1   : > { %13071 = vst [vmem:[#allocation106_spill] sm:$0xff] %v10830_v54 }
 0x1d2   : > { %v10832_v59 = vpop.f32.mrf.mxu0  ;;  %v10840_v6 = vpop.f32.mrf.mxu1 }
 0x1d3   : > { %13072 = vst [vmem:[#allocation107_spill] sm:$0xff] %v10832_v59  ;;  %13075 = vst [vmem:[#allocation110_spill] sm:$0xff] %v10840_v6 }
 0x1d4   : > { %v10836_v52 = vpop.f32.mrf.mxu0  ;;  %v10846_v55 = vpop.f32.mrf.mxu1 }
 0x1d5   : > { %13073 = vst [vmem:[#allocation108_spill] sm:$0xff] %v10836_v52  ;;  %13078 = vst [vmem:[#allocation113_spill] sm:$0xff] %v10846_v55  ;;  %v2822_v52 = vadd.f32 %v10625_v47, %v10567_v32 }
 0x1d6   : > { %v10838_v8 = vpop.f32.mrf.mxu0  ;;  %v10852_v54 = vpop.f32.mrf.mxu1 }
 0x1d7   : > { %13074 = vst [vmem:[#allocation109_spill] sm:$0xff] %v10838_v8  ;;  %13081 = vst [vmem:[#allocation116_spill] sm:$0xff] %v10852_v54  ;;  %v3148_v55 = vadd.f32 %v8566_v43, %v2822_v52 }
 0x1d8   : > { %v10842_v63 = vpop.f32.mrf.mxu0  ;;  %v10864_v6 = vpop.f32.mrf.mxu1 }
 0x1d9   : > { %13076 = vst [vmem:[#allocation111_spill] sm:$0xff] %v10842_v63  ;;  %v2201_v63 = vadd.f32 %v10445_v40, %v10393_v53  ;;  %v3442_v32 = vadd.f32 %v8600_v46, %v3148_v55  ;;  %v10874_v53 = vld [vmem:[%s12438_s2] ss:$0 sm:$0xff] }
 0x1da   : > { %v10844_v27 = vpop.f32.mrf.mxu0  ;;  %v10878_v52 = vpop.f32.mrf.mxu1 }
 0x1db   : > { %13077 = vst [vmem:[#allocation112_spill] sm:$0xff] %v10844_v27  ;;  %v2820_v27 = vadd.f32 %v10633_v56, %v10575_v0 }
 0x1dc   : > { %v10848_v30 = vpop.f32.mrf.mxu0 }
 0x1dd   : > { %13079 = vst [vmem:[#allocation114_spill] sm:$0xff] %v10848_v30  ;;  %v3146_v54 = vadd.f32 %v3019_v7, %v2820_v27  ;;  %v2826_v27 = vadd.f32 %v10656_v16, %v10595_v23  ;;  %v10895_v16 = vpop.f32.mrf.mxu1 }
 0x1de   : > { %v10850_v3 = vpop.f32.mrf.mxu0 }
 0x1df   : > { %13080 = vst [vmem:[#allocation115_spill] sm:$0xff] %v10850_v3  ;;  %v2495_v3 = vadd.f32 %v10582_v22, %v2201_v63  ;;  %v3440_v56 = vadd.f32 %v3313_v41, %v3146_v54  ;;  %v13084_v63 = vld [vmem:[#allocation14_spill] sm:$0xff]  ;;  %v13087_v54 = vld [vmem:[#allocation19_spill] sm:$0xff] }
 0x1e0   : > { %v10854_v59 = vpop.f32.mrf.mxu0  ;;  %v1457_v22 = vadd.f32 %v13084_v63, %v10328_v44  ;;  %v1489_v41 = vadd.f32 %v10395_v36, %v13087_v54  ;;  %v2824_v44 = vadd.f32 %v10661_v34, %v10606_v35  ;;  %v13090_v54 = vld [vmem:[#allocation90_spill] sm:$0xff] }
 0x1e1   : > { %13082 = vst [vmem:[#allocation117_spill] sm:$0xff] %v10854_v59  ;;  %v2823_v59 = vadd.f32 %v10638_v50, %v10580_v39  ;;  %v2821_v40 = vadd.f32 %v10651_v29, %v2495_v3  ;;  %v13085_v39 = vld [vmem:[#allocation17_spill] sm:$0xff]  ;;  %v13086_v50 = vld [vmem:[#allocation20_spill] sm:$0xff]  ;;  %v3152_v3 = vadd.f32 %v10772_v33, %v2826_v27 }
 0x1e2   : > { %v10858_v8 = vpop.f32.mrf.mxu0  ;;  %v1473_v55 = vadd.f32 %v13086_v50, %v13085_v39 }
 0x1e3   : > { %v3149_v0 = vadd.f32 %v10764_v20, %v2823_v59  ;;  %v3147_v7 = vadd.f32 %v10768_v11, %v2821_v40  ;;  %v2205_v20 = vadd.f32 %v10470_v12, %v10417_v61  ;;  %v13088_v40 = vld [vmem:[#allocation11_spill] sm:$0xff]  ;;  %v2827_v61 = vadd.f32 %v10671_v26, %v10611_v15 }
 0x1e4   : > { %v10866_v30 = vpop.f32.mrf.mxu0  ;;  %v3150_v12 = vadd.f32 %v10776_v17, %v2824_v44  ;;  %v3446_v34 = vadd.f32 %v10798_v38, %v3152_v3  ;;  %v10914_v17 = vpop.f32.mrf.mxu1  ;;  %v1895_v50 = vadd.f32 %v10511_v45, %v1473_v55  ;;  %v2828_v45 = vadd.f32 %v10686_v51, %v10631_v57 }
 0x1e5   : > { %13083 = vst [vmem:[#allocation118_spill] sm:$0xff] %v10866_v30  ;;  %v3443_v30 = vadd.f32 %v8601_v19, %v3149_v0  ;;  %v3441_v23 = vadd.f32 %v3316_v2, %v3147_v7  ;;  %v10900_v0 = vadd.f32 %v10419_v25, %v13088_v40  ;;  %v2499_v36 = vadd.f32 %v10613_v60, %v2205_v20  ;;  %v13095_v40 = vld [vmem:[#allocation91_spill] sm:$0xff] }
 0x1e6   : > { %v8634_v47 = vpop.f32.mrf.mxu0  ;;  %v2209_v25 = vadd.f32 %v10493_v18, %v10440_v14  ;;  %v3444_v15 = vadd.f32 %v10802_v49, %v3150_v12  ;;  %v2830_v14 = vadd.f32 %v10681_v24, %v10623_v37  ;;  %v10930_v37 = vpop.f32.mrf.mxu1  ;;  %v3154_v51 = vadd.f32 %v13090_v54, %v2828_v45  ;;  %v13096_v12 = vld [vmem:[#allocation100_spill] sm:$0xff] }
 0x1e7   : > { %v3768_v43 = vadd.f32 %v8634_v47, %v3442_v32  ;;  %v2825_v60 = vadd.f32 %v10676_v31, %v2499_v36  ;;  %v13106_v45 = vld [vmem:[#allocation44_spill] sm:$0xff] }
 0x1e8   : > { %v3639_v46 = vpop.f32.mrf.mxu0 }
 0x1e9   : > { %v3807_v29 = vadd.f32 %v10874_v53, %v3768_v43  ;;  %v3766_v59 = vadd.f32 %v3639_v46, %v3440_v56  ;;  %v3153_v43 = vadd.f32 %v10780_v1, %v2827_v61  ;;  %v3151_v18 = vadd.f32 %v10784_v21, %v2825_v60 }
 0x1ea   : > { %v8635_v32 = vpop.f32.mrf.mxu0  ;;  %v1899_v46 = vadd.f32 %v10531_v5, %v1489_v41  ;;  %v13089_v5 = vld [vmem:[#allocation4_spill] sm:$0xff]  ;;  %v13091_v41 = vld [vmem:[#allocation98_spill] sm:$0xff] }
 0x1eb   : > { %v3839_v11 = vmax.f32 %v3807_v29, 0.0  ;;  %v3805_v19 = vadd.f32 %v10874_v53, %v3766_v59  ;;  %v3769_v47 = vadd.f32 %v8635_v32, %v3443_v30  ;;  %v1891_v30 = vadd.f32 %v10486_v62, %v1457_v22 }
 0x1ec   : > { %v3642_v35 = vpop.f32.mrf.mxu0  ;;  %v2213_v62 = vadd.f32 %v10518_v9, %v10465_v10  ;;  %v3447_v49 = vadd.f32 %v10806_v58, %v3153_v43  ;;  %v3156_v10 = vadd.f32 %v10788_v28, %v2830_v14  ;;  %v3445_v24 = vadd.f32 %v10810_v4, %v3151_v18  ;;  %v9146_v4 = vld [vmem:[%s12439_s3 + $0xb0] sm:$0xff]   ;;  %v13099_v43 = vld [vmem:[#allocation39_spill] sm:$0xff]  ;;  %v9147_v18 = vld [vmem:[%s12439_s3 + $0xa8] sm:$0xff]  }
 0x1ed   : > { %3909 = vst [vmem:[#allocation3 + $0x28] sm:$0xff] %v3839_v11  ;;  %v3837_v2 = vmax.f32 %v3805_v19, 0.0  ;;  %v3808_v33 = vadd.f32 %v10874_v53, %v3769_v47  ;;  %v3767_v56 = vadd.f32 %v3642_v35, %v3441_v23  ;;  %v2503_v29 = vadd.f32 %v10640_v48, %v2209_v25  ;;  %v13092_v23 = vld [vmem:[#allocation60_spill] sm:$0xff]  ;;  %v13097_v25 = vld [vmem:[#allocation35_spill] sm:$0xff] }
 0x1ee   : > { %v8638_v26 = vpop.f32.mrf.mxu0  ;;  %v2831_v59 = vadd.f32 %v13089_v5, %v10636_v13  ;;  %v3450_v20 = vadd.f32 %v13091_v41, %v3156_v10  ;;  %v2217_v48 = vadd.f32 %v13092_v23, %v1891_v30  ;;  %v13094_v13 = vld [vmem:[#allocation8_spill] sm:$0xff]  ;;  %v3448_v35 = vadd.f32 %v13096_v12, %v3154_v51  ;;  %v13098_v30 = vld [vmem:[#allocation27_spill] sm:$0xff] }
 0x1ef   : > { %3907 = vst [vmem:[#allocation3 + $0x18] sm:$0xff] %v3837_v2  ;;  %v3840_v38 = vmax.f32 %v3808_v33, 0.0  ;;  %v3806_v63 = vadd.f32 %v10874_v53, %v3767_v56  ;;  %v3772_v39 = vadd.f32 %v8638_v26, %v3446_v34  ;;  %v2829_v47 = vadd.f32 %v13094_v13, %v2503_v29  ;;  %v10949_v34 = vpop.f32.mrf.mxu1  ;;  %v13100_v26 = vld [vmem:[#allocation13_spill] sm:$0xff]  ;;  %v13115_v13 = vld [vmem:[#allocation62_spill] sm:$0xff] }
 0x1f0   : > { %v3655_v31 = vpop.f32.mrf.mxu0  ;;  %v3157_v36 = vadd.f32 %v13095_v40, %v2831_v59  ;;  %v10954_v60 = vadd.f32 %v13098_v30, %v1899_v46  ;;  %v2507_v10 = vadd.f32 %v13106_v45, %v2213_v62  ;;  %v13110_v29 = vld [vmem:[#allocation105_spill] sm:$0xff]  ;;  %v13112_v23 = vmov 0  ;;  %v13116_v40 = vld [vmem:[#allocation94_spill] sm:$0xff] }
 0x1f1   : > { %3910 = vst [vmem:[#allocation3 + $0x30] sm:$0xff] %v3840_v38  ;;  %v3838_v1 = vmax.f32 %v3806_v63, 0.0  ;;  %v3811_v22 = vadd.f32 %v10874_v53, %v3772_v39  ;;  %v3770_v27 = vadd.f32 %v3655_v31, %v3444_v15  ;;  %v4069_v55 = vpack.c.bf16 %v3840_v38, %v3839_v11  ;;  %v13093_v11 = vld [vmem:[#allocation22_spill] sm:$0xff]  ;;  %v13101_v38 = vld [vmem:[#allocation92_spill] sm:$0xff]  ;;  %v13117_v30 = vld [vmem:[#allocation5_spill] sm:$0xff] }
 0x1f2   : > { %v8639_v9 = vpop.f32.mrf.mxu0  ;;  %v10944_v19 = vadd.f32 %v13093_v11, %v1895_v50  ;;  %v2834_v15 = vadd.f32 %v13100_v26, %v13099_v43  ;;  %v3155_v63 = vadd.f32 %v13101_v38, %v2829_v47  ;;  %v13102_v39 = vld [vmem:[#allocation102_spill] sm:$0xff]  ;;  %v13113_v23 = vsel %vm10986_vm1, 4294967295, %v13112_v23  ;;  %v13114_v11 = vld [vmem:[#allocation32_spill] sm:$0xff]  ;;  %v13118_v26 = vld [vmem:[#allocation23_spill] sm:$0xff] }
 0x1f3   : > { %3908 = vst [vmem:[#allocation3 + $0x20] sm:$0xff] %v3838_v1  ;;  %v3843_v58 = vmax.f32 %v3811_v22, 0.0  ;;  %v3809_v21 = vadd.f32 %v10874_v53, %v3770_v27  ;;  %v3773_v7 = vadd.f32 %v8639_v9, %v3447_v49  ;;  %v4068_v28 = vpack.c.bf16 %v3838_v1, %v3837_v2  ;;  %v13107_v9 = vld [vmem:[#allocation43_spill] sm:$0xff]  ;;  %v13122_v22 = vld [vmem:[#allocation64_spill] sm:$0xff] }
 0x1f4   : > { %v3658_v57 = vpop.f32.mrf.mxu0  ;;  %v3451_v50 = vadd.f32 %v13102_v39, %v3157_v36  ;;  %v13104_v27 = vmov 0  ;;  %v3449_v5 = vadd.f32 %v13110_v29, %v3155_v63  ;;  %v2835_v47 = vadd.f32 %v13115_v13, %v13114_v11  ;;  %v13119_v38 = vld [vmem:[#allocation95_spill] sm:$0xff]  ;;  %v13120_v39 = vld [vmem:[#allocation110_spill] sm:$0xff]  ;;  %v13125_v29 = vld [vmem:[#allocation48_spill] sm:$0xff] }
 0x1f5   : > { %3913 = vst [vmem:[#allocation3 + $0x48] sm:$0xff] %v3843_v58  ;;  %v3841_v44 = vmax.f32 %v3809_v21, 0.0  ;;  %v3812_v3 = vadd.f32 %v10874_v53, %v3773_v7  ;;  %v3771_v32 = vadd.f32 %v3658_v57, %v3445_v24  ;;  %8681 = vmatmul.mubr.bf16.vlgmr.msra.gmra.mxu1 %v4068_v28  ;;  %v13105_v27 = vsel %vm10967_vm2, 4294967295, %v13104_v27  ;;  %v13109_v21 = vld [vmem:[#allocation93_spill] sm:$0xff]  ;;  %v10976_v28 = vpop.f32.mrf.mxu1  ;;  %v13132_v11 = vld [vmem:[#allocation67_spill] sm:$0xff] }
 0x1f6   : > { %v8642_v61 = vpop.f32.mrf.mxu0  ;;  %8761 = vmatpush3.bf16.msra.mxu1 %v13097_v25  ;;  %8684 = vmatprep.mubr.bf16.mxu1 %v4069_v55  ;;  %v13108_v55 = vld [vmem:[#allocation15_spill] sm:$0xff]  ;;  %v3160_v7 = vadd.f32 %v13109_v21, %v2834_v15  ;;  %v3941_v54 = vld [vmem:[#allocation3 + $0x17] sm:$0xff]  ;;  %v2511_v43 = vadd.f32 %v13117_v30, %v2217_v48  ;;  %v2833_v15 = vadd.f32 %v13118_v26, %v2507_v10  ;;  %v13121_v48 = vld [vmem:[#allocation50_spill] sm:$0xff] }
 0x1f7   : > { %3911 = vst [vmem:[#allocation3 + $0x38] sm:$0xff] %v3841_v44  ;;  %v3844_v2 = vmax.f32 %v3812_v3, 0.0  ;;  %v3810_v33 = vadd.f32 %v10874_v53, %v3771_v32  ;;  %v3776_v56 = vadd.f32 %v8642_v61, %v3450_v20  ;;  %8762 = vmatprep.subr.bf16.mxu1 %v9146_v4  ;;  %v2832_v24 = vadd.f32 %v13108_v55, %v13107_v9  ;;  %v13123_v10 = vld [vmem:[#allocation96_spill] sm:$0xff]  ;;  %v13124_v55 = vld [vmem:[#allocation113_spill] sm:$0xff]  ;;  %v13131_v32 = vld [vmem:[#allocation51_spill] sm:$0xff] }
 0x1f8   : > { %v3671_v14 = vpop.f32.mrf.mxu0  ;;  %v3944_v3 = vld [vmem:[#allocation3 + $0x2f] sm:$0xff]  ;;  %v2838_v45 = vadd.f32 %v13122_v22, %v13121_v48  ;;  %v3159_v9 = vadd.f32 %v13123_v10, %v2833_v15  ;;  %v2839_v13 = vadd.f32 %v13132_v11, %v13131_v32  ;;  %v9152_v22 = vld [vmem:[%s12439_s3 + $0x90] sm:$0xff]  }
 0x1f9   : > { %3914 = vst [vmem:[#allocation3 + $0x50] sm:$0xff] %v3844_v2  ;;  %v3842_v31 = vmax.f32 %v3810_v33, 0.0  ;;  %v3815_v49 = vadd.f32 %v10874_v53, %v3776_v56  ;;  %v3774_v1 = vadd.f32 %v3671_v14, %v3448_v35  ;;  %v4071_v46 = vpack.c.bf16 %v3844_v2, %v3843_v58  ;;  %v9148_v2 = vld [vmem:[%s12439_s3 + $0xa0] sm:$0xff]   ;;  %v11014_v14 = vpop.f32.mrf.mxu1  ;;  %v13144_v32 = vld [vmem:[#allocation103_spill] sm:$0xff] }
 0x1fa   : > { %v8643_v59 = vpop.f32.mrf.mxu0  ;;  %v3942_v51 = vld [vmem:[#allocation3 + $0x1f] sm:$0xff]  ;;  %v3943_v57 = vld [vmem:[#allocation3 + $0x27] sm:$0xff]  ;;  %8763 = vmatpush3.bf16.msra.mxu1 %v9146_v4  ;;  %v3158_v36 = vadd.f32 %v13116_v40, %v2832_v24  ;;  %v3454_v33 = vadd.f32 %v10834_v42, %v3160_v7  ;;  %v3161_v42 = vadd.f32 %v13119_v38, %v2835_v47 }
 0x1fb   : > { %3912 = vst [vmem:[#allocation3 + $0x40] sm:$0xff] %v3842_v31  ;;  %v3847_v41 = vmax.f32 %v3815_v49, 0.0  ;;  %v10979_v20 = vadd.f32 %v10874_v53, %v3774_v1  ;;  %v3777_v58 = vadd.f32 %v8643_v59, %v3451_v50  ;;  %v10981_v62 = vpack.c.bf16 %v3942_v51, %v3941_v54  ;;  %8764 = vmatprep.subr.bf16.mxu1 %v9147_v18  ;;  %v9149_v7 = vld [vmem:[%s12439_s3 + $0x98] sm:$0xff]   ;;  %v13133_v47 = vld [vmem:[#allocation97_spill] sm:$0xff] }
 0x1fc   : > { %v3674_v61 = vpop.f32.mrf.mxu0  ;;  %v10993_v12 = vpack.c.bf16 %v3944_v3, %v3943_v57  ;;  %v4070_v35 = vpack.c.bf16 %v3842_v31, %v3841_v44  ;;  %v9151_v44 = vld [vmem:[%s12439_s3 + $0xf0] sm:$0xff]   ;;  %v3452_v50 = vadd.f32 %v13120_v39, %v3158_v36  ;;  %v3455_v24 = vadd.f32 %v13124_v55, %v3161_v42  ;;  %v9153_v57 = vld [vmem:[%s12439_s3 + $0xe8] sm:$0xff]   ;;  %v13134_v36 = vld [vmem:[#allocation116_spill] sm:$0xff] }
 0x1fd   : > { %3917 = vst [vmem:[#allocation3 + $0x68] sm:$0xff] %v3847_v41  ;;  %v3845_v56 = vmax.f32 %v10979_v20, 0.0  ;;  %v3816_v4 = vadd.f32 %v10874_v53, %v3777_v58  ;;  %v3775_v25 = vadd.f32 %v3674_v61, %v3449_v5  ;;  %8729 = vmatmul.mubr.msk.bf16.vlgmr.msra.gmra.mxu0 %vm10967_vm2, %v10981_v62  ;;  %v13127_v54 = vmov 0  ;;  %v13129_v20 = vld [vmem:[#allocation37_spill] sm:$0xff]  ;;  %v13130_v58 = vld [vmem:[#allocation40_spill] sm:$0xff] }
 0x1fe   : > { %v8646_v63 = vpop.f32.mrf.mxu0  ;;  %8732 = vmatprep.mubr.msk.bf16.mxu0 %vm10986_vm1, %v10993_v12  ;;  %8685 = vmatmul.mubr.bf16.gmra.mxu1 %v4070_v35  ;;  %v13128_v54 = vsel %vm11031_vm7, 4294967295, %v13127_v54  ;;  %v2836_v3 = vadd.f32 %v13130_v58, %v13129_v20  ;;  %v3164_v40 = vadd.f32 %v13133_v47, %v2838_v45  ;;  %v3453_v61 = vadd.f32 %v13134_v36, %v3159_v9 }
 0x1ff   : > { %3915 = vst [vmem:[#allocation3 + $0x58] sm:$0xff] %v3845_v56  ;;  %v3848_v31 = vmax.f32 %v3816_v4, 0.0  ;;  %v3814_v49 = vadd.f32 %v10874_v53, %v3775_v25  ;;  %v3780_v1 = vadd.f32 %v8646_v63, %v3454_v33  ;;  %8688 = vmatprep.mubr.bf16.mxu1 %v4071_v46  ;;  %8765 = vmatpush3.bf16.msra.mxu1 %v9147_v18  ;;  %v3945_v33 = vld [vmem:[#allocation3 + $0x37] sm:$0xff]  ;;  %v13136_v39 = vmov 0 }
 0x200   : > { %v3687_v21 = vpop.f32.mrf.mxu0  ;;  %8766 = vmatprep.subr.bf16.mxu1 %v9148_v2  ;;  %8809 = vmatpush3.bf16.msra.mxu0 %v13125_v29  ;;  %v3948_v42 = vld [vmem:[#allocation3 + $0x4f] sm:$0xff]  ;;  %v13137_v39 = vsel %vm11055_vm12, 4294967295, %v13136_v39  ;;  %v3458_v45 = vadd.f32 %v10864_v6, %v3164_v40 }
 0x201   : > { %3918 = vst [vmem:[#allocation3 + $0x70] sm:$0xff] %v3848_v31  ;;  %v3846_v5 = vmax.f32 %v3814_v49, 0.0  ;;  %v11026_v46 = vadd.f32 %v10874_v53, %v3780_v1  ;;  %v3778_v18 = vadd.f32 %v3687_v21, %v3452_v50  ;;  %v4073_v51 = vpack.c.bf16 %v3848_v31, %v3847_v41  ;;  %8810 = vmatprep.subr.bf16.mxu0 %v9151_v44  ;;  %v11044_v41 = vpop.f32.mrf.mxu1  ;;  %v13138_v50 = vld [vmem:[#allocation99_spill] sm:$0xff]  ;;  %v13141_v21 = vld [vmem:[#allocation101_spill] sm:$0xff] }
 0x202   : > { %v8647_v35 = vpop.f32.mrf.mxu0  ;;  %v3946_v4 = vld [vmem:[#allocation3 + $0x3f] sm:$0xff]  ;;  %v3947_v25 = vld [vmem:[#allocation3 + $0x47] sm:$0xff]  ;;  %v3162_v31 = vadd.f32 %v13138_v50, %v2836_v3  ;;  %v3165_v29 = vadd.f32 %v13141_v21, %v2839_v13 }
 0x203   : > { %3916 = vst [vmem:[#allocation3 + $0x60] sm:$0xff] %v3846_v5  ;;  %v3851_v30 = vmax.f32 %v11026_v46, 0.0  ;;  %v11048_v26 = vadd.f32 %v10874_v53, %v3778_v18  ;;  %v3781_v15 = vadd.f32 %v8647_v35, %v3455_v24  ;;  %v11050_v38 = vpack.c.bf16 %v3946_v4, %v3945_v33  ;;  %8767 = vmatpush3.bf16.msra.mxu1 %v9148_v2  ;;  %v13140_v24 = vld [vmem:[#allocation49_spill] sm:$0xff]  ;;  %v11082_v18 = vpop.f32.mrf.mxu1  ;;  %v13149_v33 = vld [vmem:[#allocation75_spill] sm:$0xff] }
 0x204   : > { %v3690_v49 = vpop.f32.mrf.mxu0  ;;  %v11060_v1 = vpack.c.bf16 %v3948_v42, %v3947_v25  ;;  %v4072_v48 = vpack.c.bf16 %v3846_v5, %v3845_v56  ;;  %8768 = vmatprep.subr.bf16.mxu1 %v9149_v7  ;;  %8811 = vmatpush3.bf16.msra.mxu0 %v9151_v44  ;;  %v9154_v56 = vld [vmem:[%s12439_s3 + $0xe0] sm:$0xff]   ;;  %v13139_v44 = vld [vmem:[#allocation63_spill] sm:$0xff]  ;;  %v2837_v6 = vadd.f32 %v13140_v24, %v2511_v43  ;;  %v13148_v35 = vld [vmem:[#allocation61_spill] sm:$0xff] }
 0x205   : > { %3921 = vst [vmem:[#allocation3 + $0x88] sm:$0xff] %v3851_v30  ;;  %v3849_v10 = vmax.f32 %v11048_v26, 0.0  ;;  %v3820_v9 = vadd.f32 %v10874_v53, %v3781_v15  ;;  %v3779_v2 = vadd.f32 %v3690_v49, %v3453_v61  ;;  %8733 = vmatmul.mubr.msk.bf16.gmra.mxu0 %vm11031_vm7, %v11050_v38  ;;  %8812 = vmatprep.subr.bf16.mxu0 %v9153_v57  ;;  %v13143_v43 = vld [vmem:[#allocation72_spill] sm:$0xff]  ;;  %v13146_v61 = vmov 0  ;;  %v13150_v25 = vld [vmem:[#allocation21_spill] sm:$0xff]  ;;  %v13151_v26 = vld [vmem:[#allocation78_spill] sm:$0xff] }
 0x206   : > { %v2515_v55 = vadd.f32 %v13139_v44, %v10944_v19  ;;  %v8650_v5 = vpop.f32.mrf.mxu0  ;;  %8736 = vmatprep.mubr.msk.bf16.mxu0 %vm11055_vm12, %v11060_v1  ;;  %8689 = vmatmul.mubr.bf16.gmra.mxu1 %v4072_v48  ;;  %v3456_v46 = vadd.f32 %v10878_v52, %v3162_v31  ;;  %v13142_v19 = vld [vmem:[#allocation9_spill] sm:$0xff]  ;;  %v3163_v11 = vadd.f32 %v13144_v32, %v2837_v6  ;;  %v13147_v61 = vsel %vm11098_vm4, 4294967295, %v13146_v61  ;;  %v13152_v42 = vld [vmem:[#allocation104_spill] sm:$0xff] }
 0x207   : > { %3919 = vst [vmem:[#allocation3 + $0x78] sm:$0xff] %v3849_v10  ;;  %v3852_v59 = vmax.f32 %v3820_v9, 0.0  ;;  %v3818_v20 = vadd.f32 %v10874_v53, %v3779_v2  ;;  %v3784_v58 = vadd.f32 %v8650_v5, %v3458_v45  ;;  %8692 = vmatprep.mubr.bf16.mxu1 %v4073_v51  ;;  %8769 = vmatpush3.bf16.msra.mxu1 %v9149_v7  ;;  %v9155_v52 = vld [vmem:[%s12439_s3 + $0x88] sm:$0xff]  }
 0x208   : > { %v2842_v3 = vadd.f32 %v13143_v43, %v13142_v19  ;;  %v3459_v13 = vadd.f32 %v10895_v16, %v3165_v29  ;;  %v3703_v47 = vpop.f32.mrf.mxu0  ;;  %8770 = vmatprep.subr.bf16.mxu1 %v9152_v22  ;;  %8813 = vmatpush3.bf16.msra.mxu0 %v9153_v57  ;;  %v9156_v57 = vld [vmem:[%s12439_s3 + $0xd8] sm:$0xff]   ;;  %v2840_v4 = vadd.f32 %v13149_v33, %v13148_v35  ;;  %v3949_v49 = vld [vmem:[#allocation3 + $0x57] sm:$0xff]  ;;  %v13156_v29 = vld [vmem:[#allocation106_spill] sm:$0xff] }
 0x209   : > { %3922 = vst [vmem:[#allocation3 + $0x90] sm:$0xff] %v3852_v59  ;;  %v3850_v40 = vmax.f32 %v3818_v20, 0.0  ;;  %v11093_v36 = vadd.f32 %v10874_v53, %v3784_v58  ;;  %v3782_v7 = vadd.f32 %v3703_v47, %v3456_v46  ;;  %v4075_v16 = vpack.c.bf16 %v3852_v59, %v3851_v30  ;;  %8814 = vmatprep.subr.bf16.mxu0 %v9154_v56  ;;  %v11111_v30 = vpop.f32.mrf.mxu1  ;;  %v3952_v6 = vld [vmem:[#allocation3 + $0x6f] sm:$0xff]  ;;  %v13170_v21 = vld [vmem:[#allocation109_spill] sm:$0xff] }
 0x20a   : > { %v2843_v15 = vadd.f32 %v13151_v26, %v13150_v25  ;;  %v3168_v63 = vadd.f32 %v13152_v42, %v2842_v3  ;;  %v3457_v50 = vadd.f32 %v10914_v17, %v3163_v11  ;;  %v8651_v31 = vpop.f32.mrf.mxu0  ;;  %v3950_v48 = vld [vmem:[#allocation3 + $0x5f] sm:$0xff]  ;;  %v3951_v45 = vld [vmem:[#allocation3 + $0x67] sm:$0xff]  ;;  %v13154_v17 = vmov 0  ;;  %v9158_v58 = vld [vmem:[%s12439_s3 + $0x80] sm:$0xff]  }
 0x20b   : > { %3920 = vst [vmem:[#allocation3 + $0x80] sm:$0xff] %v3850_v40  ;;  %v3855_v9 = vmax.f32 %v11093_v36, 0.0  ;;  %v11115_v2 = vadd.f32 %v10874_v53, %v3782_v7  ;;  %v3785_v44 = vadd.f32 %v8651_v31, %v3459_v13  ;;  %v11117_v24 = vpack.c.bf16 %v3950_v48, %v3949_v49  ;;  %8771 = vmatpush3.bf16.msra.mxu1 %v9152_v22  ;;  %v13158_v11 = vld [vmem:[#allocation81_spill] sm:$0xff]  ;;  %v13159_v13 = vld [vmem:[#allocation107_spill] sm:$0xff]  ;;  %v11149_v7 = vpop.f32.mrf.mxu1  ;;  %v13162_v25 = vld [vmem:[#allocation108_spill] sm:$0xff] }
 0x20c   : > { %v13155_v17 = vsel %vm11122_vm9, 4294967295, %v13154_v17  ;;  %v3166_v5 = vadd.f32 %v13156_v29, %v2840_v4  ;;  %v3706_v46 = vpop.f32.mrf.mxu0  ;;  %v11127_v59 = vpack.c.bf16 %v3952_v6, %v3951_v45  ;;  %v4074_v20 = vpack.c.bf16 %v3850_v40, %v3849_v10  ;;  %8815 = vmatpush3.bf16.msra.mxu0 %v9154_v56  ;;  %8772 = vmatprep.subr.bf16.mxu1 %v9155_v52  ;;  %v9157_v10 = vld [vmem:[%s12439_s3 + $0xd0] sm:$0xff]   ;;  %v13157_v56 = vld [vmem:[#allocation68_spill] sm:$0xff]  ;;  %v13167_v48 = vld [vmem:[#allocation83_spill] sm:$0xff] }
 0x20d   : > { %v3462_v19 = vadd.f32 %v10930_v37, %v3168_v63  ;;  %3925 = vst [vmem:[#allocation3 + $0xa8] sm:$0xff] %v3855_v9  ;;  %v3853_v43 = vmax.f32 %v11115_v2, 0.0  ;;  %v3824_v3 = vadd.f32 %v10874_v53, %v3785_v44  ;;  %v3783_v22 = vadd.f32 %v3706_v46, %v3457_v50  ;;  %8737 = vmatmul.mubr.msk.bf16.gmra.mxu0 %vm11098_vm4, %v11117_v24  ;;  %v13166_v49 = vld [vmem:[#allocation66_spill] sm:$0xff]  ;;  %v13168_v2 = vld [vmem:[#allocation45_spill] sm:$0xff]  ;;  %v13169_v44 = vld [vmem:[#allocation84_spill] sm:$0xff] }
 0x20e   : > { %8816 = vmatprep.subr.bf16.mxu0 %v9156_v57  ;;  %v2519_v32 = vadd.f32 %v13157_v56, %v10954_v60  ;;  %v2841_v37 = vadd.f32 %v13158_v11, %v2515_v55  ;;  %v3169_v47 = vadd.f32 %v13159_v13, %v2843_v15  ;;  %v8654_v40 = vpop.f32.mrf.mxu0  ;;  %8740 = vmatprep.mubr.msk.bf16.mxu0 %vm11122_vm9, %v11127_v59  ;;  %v13160_v60 = vld [vmem:[#allocation38_spill] sm:$0xff]  ;;  %v13164_v31 = vmov 0 }
 0x20f   : > { %8693 = vmatmul.mubr.bf16.gmra.mxu1 %v4074_v20  ;;  %v3460_v36 = vadd.f32 %v10949_v34, %v3166_v5  ;;  %3923 = vst [vmem:[#allocation3 + $0x98] sm:$0xff] %v3853_v43  ;;  %v3856_v51 = vmax.f32 %v3824_v3, 0.0  ;;  %v3822_v35 = vadd.f32 %v10874_v53, %v3783_v22  ;;  %v3788_v33 = vadd.f32 %v8654_v40, %v3462_v19  ;;  %v13161_v55 = vld [vmem:[#allocation82_spill] sm:$0xff]  ;;  %v11159_v34 = vld [vmem:[%s12439_s3 + $0x138] sm:$0xff]   ;;  %v3953_v20 = vld [vmem:[#allocation3 + $0x77] sm:$0xff] }
 0x210   : > { %8696 = vmatprep.mubr.bf16.mxu1 %v4075_v16  ;;  %8773 = vmatpush3.bf16.msra.mxu1 %v9155_v52  ;;  %v2846_v4 = vadd.f32 %v13161_v55, %v13160_v60  ;;  %v3167_v26 = vadd.f32 %v13162_v25, %v2841_v37  ;;  %v3463_v15 = vadd.f32 %v10976_v28, %v3169_v47  ;;  %v3719_v42 = vpop.f32.mrf.mxu0  ;;  %v13165_v31 = vsel %vm11165_vm5, 4294967295, %v13164_v31  ;;  %v3956_v13 = vld [vmem:[#allocation3 + $0x8f] sm:$0xff] }
 0x211   : > { %8817 = vmatpush3.bf16.msra.mxu0 %v9156_v57  ;;  %8774 = vmatprep.subr.bf16.mxu1 %v9158_v58  ;;  %3926 = vst [vmem:[#allocation3 + $0xb0] sm:$0xff] %v3856_v51  ;;  %v3854_v63 = vmax.f32 %v3822_v35, 0.0  ;;  %v3827_v16 = vadd.f32 %v10874_v53, %v3788_v33  ;;  %v3786_v52 = vadd.f32 %v3719_v42, %v3460_v36  ;;  %v9159_v57 = vld [vmem:[%s12439_s3 + $0xc8] sm:$0xff]   ;;  %v13174_v40 = vld [vmem:[#allocation111_spill] sm:$0xff] }
 0x212   : > { %v4077_v28 = vpack.c.bf16 %v3856_v51, %v3855_v9  ;;  %8818 = vmatprep.subr.bf16.mxu0 %v9157_v10  ;;  %v2844_v45 = vadd.f32 %v13167_v48, %v13166_v49  ;;  %v2847_v6 = vadd.f32 %v13169_v44, %v13168_v2  ;;  %v3172_v29 = vadd.f32 %v13170_v21, %v2846_v4  ;;  %v8655_v46 = vpop.f32.mrf.mxu0  ;;  %v3954_v19 = vld [vmem:[#allocation3 + $0x7f] sm:$0xff]  ;;  %v3955_v3 = vld [vmem:[#allocation3 + $0x87] sm:$0xff]  ;;  %v11178_v9 = vpop.f32.mrf.mxu1 }
 0x213   : > { %v3461_v5 = vadd.f32 %v11014_v14, %v3167_v26  ;;  %3924 = vst [vmem:[#allocation3 + $0xa0] sm:$0xff] %v3854_v63  ;;  %v3859_v22 = vmax.f32 %v3827_v16, 0.0  ;;  %v11181_v56 = vadd.f32 %v10874_v53, %v3786_v52  ;;  %v3789_v11 = vadd.f32 %v8655_v46, %v3463_v15  ;;  %v13176_v26 = vld [vmem:[#allocation85_spill] sm:$0xff]  ;;  %v13177_v15 = vld [vmem:[#allocation112_spill] sm:$0xff]  ;;  %v13180_v2 = vld [vmem:[#allocation86_spill] sm:$0xff] }
 0x214   : > { %v11183_v37 = vpack.c.bf16 %v3954_v19, %v3953_v20  ;;  %v13172_v14 = vmov 0  ;;  %8775 = vmatpush3.bf16.msra.mxu1 %v9158_v58  ;;  %v3170_v36 = vadd.f32 %v13174_v40, %v2844_v45  ;;  %v3722_v51 = vpop.f32.mrf.mxu0  ;;  %v11193_v35 = vpack.c.bf16 %v3956_v13, %v3955_v3  ;;  %v9160_v58 = vld [vmem:[%s12439_s3 + $0xc0] sm:$0xff]   ;;  %v3425_v52 = vpop.f32.mrf.mxu1  ;;  %v13182_v19 = vld [vmem:[#allocation29_spill] sm:$0xff]  ;;  %v13188_v13 = vld [vmem:[#allocation87_spill] sm:$0xff] }
 0x215   : > { %v13173_v14 = vsel %vm11188_vm6, 4294967295, %v13172_v14  ;;  %v4076_v33 = vpack.c.bf16 %v3854_v63, %v3853_v43  ;;  %8819 = vmatpush3.bf16.msra.mxu0 %v9157_v10  ;;  %8856 = vmatprep.subr.bf16.mxu1 %v11159_v34  ;;  %v3466_v60 = vadd.f32 %v11044_v41, %v3172_v29  ;;  %3929 = vst [vmem:[#allocation3 + $0xc8] sm:$0xff] %v3859_v22  ;;  %v3857_v55 = vmax.f32 %v11181_v56, 0.0  ;;  %v13175_v43 = vld [vmem:[#allocation25_spill] sm:$0xff]  ;;  %v13189_v40 = vld [vmem:[#allocation115_spill] sm:$0xff] }
 0x216   : > { %v3828_v4 = vadd.f32 %v10874_v53, %v3789_v11  ;;  %v3787_v25 = vadd.f32 %v3722_v51, %v3461_v5  ;;  %8741 = vmatmul.mubr.msk.bf16.gmra.mxu0 %vm11165_vm5, %v11183_v37  ;;  %8820 = vmatprep.subr.bf16.mxu0 %v9159_v57  ;;  %v1903_v10 = vadd.f32 %v13175_v43, %v10900_v0  ;;  %v8658_v63 = vpop.f32.mrf.mxu0  ;;  %v13178_v0 = vld [vmem:[#allocation28_spill] sm:$0xff]  ;;  %v13187_v11 = vld [vmem:[#allocation73_spill] sm:$0xff] }
 0x217   : > { %v2845_v41 = vadd.f32 %v13176_v26, %v2519_v32  ;;  %v3173_v42 = vadd.f32 %v13177_v15, %v2847_v6  ;;  %8744 = vmatprep.mubr.msk.bf16.mxu0 %vm11188_vm6, %v11193_v35  ;;  %8697 = vmatmul.mubr.bf16.gmra.mxu1 %v4076_v33  ;;  %v3464_v16 = vadd.f32 %v11082_v18, %v3170_v36  ;;  %v13179_v32 = vld [vmem:[#allocation69_spill] sm:$0xff]  ;;  %v13181_v6 = vld [vmem:[#allocation114_spill] sm:$0xff] }
 0x218   : > { %3927 = vst [vmem:[#allocation3 + $0xb8] sm:$0xff] %v3857_v55  ;;  %v3860_v50 = vmax.f32 %v3828_v4, 0.0  ;;  %v3826_v49 = vadd.f32 %v10874_v53, %v3787_v25  ;;  %v3792_v48 = vadd.f32 %v8658_v63, %v3466_v60  ;;  %8700 = vmatprep.mubr.bf16.mxu1 %v4077_v28  ;;  %v2229_v45 = vadd.f32 %v13178_v0, %v1903_v10  ;;  %v3735_v5 = vpop.f32.mrf.mxu0  ;;  %v3957_v60 = vld [vmem:[#allocation3 + $0x97] sm:$0xff]  ;;  %v3960_v15 = vld [vmem:[#allocation3 + $0xaf] sm:$0xff] }
 0x219   : > { %v2850_v44 = vadd.f32 %v13180_v2, %v13179_v32  ;;  %v3171_v21 = vadd.f32 %v13181_v6, %v2845_v41  ;;  %v3467_v29 = vadd.f32 %v11111_v30, %v3173_v42  ;;  %8821 = vmatpush3.bf16.msra.mxu0 %v9159_v57  ;;  %v3790_v20 = vadd.f32 %v3735_v5, %v3464_v16  ;;  %v11230_v30 = vld [vmem:[%s12439_s3 + $0x178] sm:$0xff]   ;;  %v13186_v57 = vld [vmem:[#allocation80_spill] sm:$0xff] }
 0x21a   : > { %3930 = vst [vmem:[#allocation3 + $0xd0] sm:$0xff] %v3860_v50  ;;  %v3858_v18 = vmax.f32 %v3826_v49, 0.0  ;;  %v3831_v46 = vadd.f32 %v10874_v53, %v3792_v48  ;;  %vm13183_vm8 = vnez %v13182_v19  ;;  %v13184_v28 = vmov 0  ;;  %8822 = vmatprep.subr.bf16.mxu0 %v9160_v58  ;;  %v8659_v33 = vpop.f32.mrf.mxu0  ;;  %v3958_v4 = vld [vmem:[#allocation3 + $0x9f] sm:$0xff]  ;;  %v3959_v25 = vld [vmem:[#allocation3 + $0xa7] sm:$0xff]  ;;  %v13195_v16 = vld [vmem:[#allocation88_spill] sm:$0xff] }
 0x21b   : > { %vm11223_vm0 = vmpackc.low %vm9215_vm15, %vm13183_vm8  ;;  %v4079_v3 = vpack.c.bf16 %v3860_v50, %v3859_v22  ;;  %v2523_v56 = vadd.f32 %v13186_v57, %v2229_v45  ;;  %v2848_v47 = vadd.f32 %v13188_v13, %v13187_v11  ;;  %v3176_v36 = vadd.f32 %v13189_v40, %v2850_v44  ;;  %v8629_v22 = vpop.f32.mrf.mxu1  ;;  %v13190_v42 = vld [vmem:[#allocation31_spill] sm:$0xff]  ;;  %v13196_v49 = vld [vmem:[#allocation117_spill] sm:$0xff] }
 0x21c   : > { %v13185_v28 = vsel %vm11223_vm0, 4294967295, %v13184_v28  ;;  %v3465_v51 = vadd.f32 %v11149_v7, %v3171_v21  ;;  %3928 = vst [vmem:[#allocation3 + $0xc0] sm:$0xff] %v3858_v18  ;;  %v3863_v43 = vmax.f32 %v3831_v46, 0.0  ;;  %v3829_v10 = vadd.f32 %v10874_v53, %v3790_v20  ;;  %v13194_v7 = vld [vmem:[#allocation77_spill] sm:$0xff]  ;;  %v3738_v0 = vpop.f32.mrf.mxu0  ;;  %v13198_v57 = vld [vmem:[#allocation118_spill] sm:$0xff] }
 0x21d   : > { %v3793_v26 = vadd.f32 %v8659_v33, %v3467_v29  ;;  %v11238_v41 = vpack.c.bf16 %v3958_v4, %v3957_v60  ;;  %vm13191_vm8 = vnez %v13190_v42  ;;  %v13192_v63 = vmov 0  ;;  %8823 = vmatpush3.bf16.msra.mxu0 %v9160_v58  ;;  %v13197_v29 = vld [vmem:[#allocation89_spill] sm:$0xff] }
 0x21e   : > { %vm11243_vm14 = vmpackc.low %vm9215_vm15, %vm13191_vm8  ;;  %v2851_v50 = vadd.f32 %v13195_v16, %v13194_v7  ;;  %v3174_v48 = vadd.f32 %v13196_v49, %v2848_v47  ;;  %v11250_v45 = vpack.c.bf16 %v3960_v15, %v3959_v25  ;;  %v4078_v32 = vpack.c.bf16 %v3858_v18, %v3857_v55  ;;  %3933 = vst [vmem:[#allocation3 + $0xe8] sm:$0xff] %v3863_v43  ;;  %v8662_v20 = vpop.f32.mrf.mxu0  ;;  %v3428_v55 = vpop.f32.mrf.mxu1  ;;  %v13203_v7 = vld [vmem:[#allocation36_spill] sm:$0xff] }
 0x21f   : > { %v13193_v63 = vsel %vm11243_vm14, 4294967295, %v13192_v63  ;;  %v3470_v2 = vadd.f32 %v11178_v9, %v3176_v36  ;;  %v3861_v44 = vmax.f32 %v3829_v10, 0.0  ;;  %v3832_v6 = vadd.f32 %v10874_v53, %v3793_v26  ;;  %8745 = vmatmul.mubr.msk.bf16.gmra.mxu0 %vm11223_vm0, %v11238_v41  ;;  %8904 = vmatprep.subr.bf16.mxu0 %v11230_v30  ;;  %v13199_v36 = vld [vmem:[#allocation33_spill] sm:$0xff] }
 0x220   : > { %v3791_v21 = vadd.f32 %v3738_v0, %v3465_v51  ;;  %v2849_v5 = vadd.f32 %v13197_v29, %v2523_v56  ;;  %v3177_v46 = vadd.f32 %v10858_v8, %v2851_v50  ;;  %8748 = vmatprep.mubr.msk.bf16.mxu0 %vm11243_vm14, %v11250_v45  ;;  %8701 = vmatmul.mubr.bf16.gmra.mxu1 %v4078_v32  ;;  %v3751_v56 = vpop.f32.mrf.mxu0  ;;  %v3961_v60 = vld [vmem:[#allocation3 + $0xb7] sm:$0xff]  ;;  %v13205_v16 = vmov 0 }
 0x221   : > { %v3468_v9 = vadd.f32 %v3425_v52, %v3174_v48  ;;  %3931 = vst [vmem:[#allocation3 + $0xd8] sm:$0xff] %v3861_v44  ;;  %v3864_v58 = vmax.f32 %v3832_v6, 0.0  ;;  %v3796_v19 = vadd.f32 %v8662_v20, %v3470_v2  ;;  %8704 = vmatprep.mubr.bf16.mxu1 %v4079_v3  ;;  %vm13200_vm8 = vnez %v13199_v36  ;;  %v3964_v42 = vld [vmem:[#allocation3 + $0xcf] sm:$0xff]  ;;  %v9205_v36 = vld [vmem:[#allocation3] sm:$0xff] }
 0x222   : > { %v3830_v18 = vadd.f32 %v10874_v53, %v3791_v21  ;;  %v3175_v11 = vadd.f32 %v13198_v57, %v2849_v5  ;;  %v3471_v13 = vadd.f32 %v8629_v22, %v3177_v46  ;;  %vm11271_vm11 = vmpackc.low %vm9215_vm15, %vm13200_vm8  ;;  %v13201_v52 = vmov 0  ;;  %v8663_v3 = vpop.f32.mrf.mxu0  ;;  %v4518_v6 = vld [vmem:[#allocation3 + $0x9] sm:$0xff]  ;;  %v13207_v5 = vld [vmem:[#allocation42_spill] sm:$0xff] }
 0x223   : > { %3934 = vst [vmem:[#allocation3 + $0xf0] sm:$0xff] %v3864_v58  ;;  %v3835_v47 = vadd.f32 %v10874_v53, %v3796_v19  ;;  %v3794_v40 = vadd.f32 %v3751_v56, %v3468_v9  ;;  %v13202_v52 = vsel %vm11271_vm11, 4294967295, %v13201_v52  ;;  %v4081_v51 = vpack.c.bf16 %v3864_v58, %v3863_v43  ;;  %v3962_v4 = vld [vmem:[#allocation3 + $0xbf] sm:$0xff]  ;;  %v3963_v25 = vld [vmem:[#allocation3 + $0xc7] sm:$0xff]  ;;  %v4519_v20 = vld [vmem:[#allocation3 + $0x11] sm:$0xff] }
 0x224   : > { %v11265_v8 = vmax.f32 %v3830_v18, 0.0  ;;  %v3469_v33 = vadd.f32 %v3428_v55, %v3175_v11  ;;  %v3797_v26 = vadd.f32 %v8663_v3, %v3471_v13  ;;  %v11277_v15 = vpack.c.bf16 %v3962_v4, %v3961_v60  ;;  %v3754_v43 = vpop.f32.mrf.mxu0  ;;  %v13211_v18 = vld [vmem:[#allocation47_spill] sm:$0xff]  ;;  %v13215_v13 = vld [vmem:[#allocation34_spill] sm:$0xff]  ;;  %v4523_v4 = vld [vmem:[#allocation3 + $0x31] sm:$0xff] }
 0x225   : > { %v3867_v22 = vmax.f32 %v3835_v47, 0.0  ;;  %v3833_v10 = vadd.f32 %v10874_v53, %v3794_v40  ;;  %vm13204_vm8 = vnez %v13203_v7  ;;  %v11286_v50 = vpack.c.bf16 %v3964_v42, %v3963_v25  ;;  %v13219_v40 = vld [vmem:[#allocation65_spill] sm:$0xff]  ;;  %v4522_v42 = vld [vmem:[#allocation3 + $0x29] sm:$0xff]  ;;  %v13226_v7 = vld [vmem:[#allocation46_spill] sm:$0xff] }
 0x226   : > { %3932 = vst [vmem:[#allocation3 + $0xe0] sm:$0xff] %v11265_v8  ;;  %vm11282_vm14 = vmpackc.low %vm9215_vm15, %vm13204_vm8  ;;  %v4080_v49 = vpack.c.bf16 %v11265_v8, %v3861_v44  ;;  %v11290_v0 = vadd.f32 %v10874_v53, %v3797_v26  ;;  %v3795_v32 = vadd.f32 %v3754_v43, %v3469_v33  ;;  %vm13208_vm8 = vnez %v13207_v5  ;;  %v4521_v33 = vld [vmem:[#allocation3 + $0x21] sm:$0xff] }
 0x227   : > { %v13206_v16 = vsel %vm11282_vm14, 4294967295, %v13205_v16  ;;  %3937 = vst [vmem:[#allocation3 + $0x108] sm:$0xff] %v3867_v22  ;;  %v3865_v48 = vmax.f32 %v3833_v10, 0.0  ;;  %8749 = vmatmul.mubr.msk.bf16.gmra.mxu0 %vm11271_vm11, %v11277_v15  ;;  %vm11305_vm11 = vmpackc.low %vm9215_vm15, %vm13208_vm8  ;;  %v13213_v19 = vmov 0  ;;  %vm13216_vm8 = vnez %v13215_v13  ;;  %v9167_v13 = vld [vmem:[%s12439_s3 + $0x170] sm:$0xff]  }
 0x228   : > { %8752 = vmatprep.mubr.msk.bf16.mxu0 %vm11282_vm14, %v11286_v50  ;;  %8705 = vmatmul.mubr.bf16.gmra.mxu1 %v4080_v49  ;;  %v12630_v2 = vmax.f32 %v11290_v0, 0.0  ;;  %v3834_v44 = vadd.f32 %v10874_v53, %v3795_v32  ;;  %v3965_v29 = vld [vmem:[#allocation3 + $0xd7] sm:$0xff]  ;;  %vm13212_vm14 = vnez %v13211_v18  ;;  %vm11325_vm6 = vmpackc.low %vm13216_vm8, %vm9215_vm15  ;;  %v13217_v56 = vmov 0  ;;  %v9162_v49 = vld [vmem:[%s12439_s3 + $0x130] sm:$0xff]  }
 0x229   : > { %3935 = vst [vmem:[#allocation3 + $0xf8] sm:$0xff] %v3865_v48  ;;  %8708 = vmatprep.mubr.bf16.mxu1 %v4081_v51  ;;  %vm11314_vm0 = vmpackc.low %vm9215_vm15, %vm13212_vm14  ;;  %v13218_v56 = vsel %vm11325_vm6, 4294967295, %v13217_v56  ;;  %v7512_v47 = vpack.c.bf16 %v4519_v20, %v4518_v6  ;;  %vm13220_vm14 = vnez %v13219_v40  ;;  %v4520_v51 = vld [vmem:[#allocation3 + $0x19] sm:$0xff]  ;;  %v13228_v43 = vmov 0  ;;  %v4526_v20 = vld [vmem:[#allocation3 + $0x49] sm:$0xff] }
 0x22a   : > { %3938 = vst [vmem:[#allocation3 + $0x110] sm:$0xff] %v12630_v2  ;;  %v3866_v21 = vmax.f32 %v3834_v44, 0.0  ;;  %v3968_v58 = vld [vmem:[#allocation3 + $0xef] sm:$0xff]  ;;  %v13214_v19 = vsel %vm11314_vm0, 4294967295, %v13213_v19  ;;  %vm11341_vm8 = vmpackc.low %vm9215_vm15, %vm13220_vm14  ;;  %v11354_v26 = vpack.c.bf16 %v4521_v33, %v4520_v51  ;;  %vm13227_vm14 = vnez %v13226_v7  ;;  %v13230_v32 = vld [vmem:[#allocation30_spill] sm:$0xff] }
 0x22b   : > { %v9163_v44 = vld [vmem:[%s12439_s3 + $0x128] sm:$0xff]   ;;  %v4529_v40 = vld [vmem:[#allocation3 + $0x61] sm:$0xff]  ;;  %v13244_v22 = vmov 0 }
 0x22c   : > { %3936 = vst [vmem:[#allocation3 + $0x100] sm:$0xff] %v3866_v21  ;;  %v11320_v11 = vpack.c.bf16 %v3866_v21, %v3865_v48  ;;  %v11369_v48 = vpack.c.bf16 %v4523_v4, %v4522_v42  ;;  %v4524_v6 = vld [vmem:[#allocation3 + $0x39] sm:$0xff]  ;;  %v4525_v21 = vld [vmem:[#allocation3 + $0x41] sm:$0xff]  ;;  %v4531_v51 = vld [vmem:[#allocation3 + $0x71] sm:$0xff] }
 0x22d   : > { %v3966_v9 = vld [vmem:[#allocation3 + $0xdf] sm:$0xff]  ;;  %v3967_v55 = vld [vmem:[#allocation3 + $0xe7] sm:$0xff]  ;;  %v4539_v33 = vld [vmem:[#allocation3 + $0xb1] sm:$0xff] }
 0x22e   : > { %v11309_v53 = vpack.c.bf16 %v3966_v9, %v3965_v29  ;;  %v11318_v57 = vpack.c.bf16 %v3968_v58, %v3967_v55  ;;  %v4527_v29 = vld [vmem:[#allocation3 + $0x51] sm:$0xff]  ;;  %v4530_v4 = vld [vmem:[#allocation3 + $0x69] sm:$0xff]  ;;  %v9168_v42 = vld [vmem:[%s12439_s3 + $0x110] sm:$0xff]  }
 0x22f   : > { %v13235_v9 = vld [vmem:[#allocation53_spill] sm:$0xff]  ;;  %v9164_v58 = vld [vmem:[%s12439_s3 + $0x120] sm:$0xff]   ;;  %v11406_v18 = vpack.c.bf16 %v4527_v29, %v4526_v20  ;;  %v11449_v7 = vpack.c.bf16 %v4531_v51, %v4530_v4  ;;  %v4537_v51 = vld [vmem:[#allocation3 + $0xa1] sm:$0xff] }
 0x230   : > { %8753 = vmatmul.mubr.msk.bf16.gmra.mxu0 %vm11305_vm11, %v11309_v53  ;;  %8709 = vmatmul.mubr.bf16.gmra.mxu1 %v11320_v11  ;;  %v3969_v3 = vld [vmem:[#allocation3 + $0xf7] sm:$0xff]  ;;  %v13256_v4 = vld [vmem:[#allocation58_spill] sm:$0xff] }
 0x231   : > { %8756 = vmatprep.mubr.msk.bf16.mxu0 %vm11314_vm0, %v11318_v57  ;;  %8776 = vmatprep.mubr.msk.bf16.mxu1 %vm11325_vm6, %v7512_v47  ;;  %vm11350_vm0 = vmpackc.low %vm12972_vm3, %vm9215_vm15  ;;  %v4528_v47 = vld [vmem:[#allocation3 + $0x59] sm:$0xff]  ;;  %v13246_v29 = vld [vmem:[#allocation56_spill] sm:$0xff] }
 0x232   : > { %vm11359_vm6 = vmpackc.low %vm13227_vm14, %vm9215_vm15 }
 0x233   : > { %v3970_v60 = vld [vmem:[#allocation3 + $0xff] sm:$0xff]  ;;  %v13229_v43 = vsel %vm11359_vm6, 4294967295, %v13228_v43 }
 0x234   : > { %v11345_v25 = vpack.c.bf16 %v3970_v60, %v3969_v3  ;;  %v11434_v60 = vpack.c.bf16 %v4529_v40, %v4528_v47  ;;  %v9173_v40 = vld [vmem:[%s12439_s3 + $0x150] sm:$0xff]  }
 0x238   : > { %8757 = vmatmul.mubr.msk.bf16.gmra.mxu0 %vm11341_vm8, %v11345_v25  ;;  %8777 = vmatmul.mubr.msk.bf16.vlgmr.msra.gmra.mxu1 %vm11350_vm0, %v11354_v26 }
 0x239   : > { %8824 = vmatprep.mubr.msk.bf16.mxu0 %vm10645_vm10, %v10981_v62  ;;  %8857 = vmatpush3.bf16.msra.mxu1 %v11159_v34  ;;  %v13231_v62 = vld [vmem:[#allocation52_spill] sm:$0xff]  ;;  %v11391_v34 = vpack.c.bf16 %v4525_v21, %v4524_v6  ;;  %vm13236_vm10 = vnez %v13235_v9  ;;  %v4533_v6 = vld [vmem:[#allocation3 + $0x81] sm:$0xff] }
 0x23a   : > { %8780 = vmatprep.mubr.msk.bf16.mxu1 %vm11359_vm6, %v11369_v48  ;;  %8858 = vmatprep.subr.bf16.mxu1 %v9162_v49  ;;  %vm13232_vm3 = vnez %v13231_v62  ;;  %vm11396_vm6 = vmpackc.low %vm13236_vm10, %vm9215_vm15  ;;  %v4535_v21 = vld [vmem:[#allocation3 + $0x91] sm:$0xff]  ;;  %v13248_v62 = vmov 0  ;;  %v4534_v9 = vld [vmem:[#allocation3 + $0x89] sm:$0xff] }
 0x23b   : > { %vm11387_vm14 = vmpackc.low %vm13232_vm3, %vm9215_vm15  ;;  %v11491_v47 = vpack.c.bf16 %v4535_v21, %v4534_v9  ;;  %v4541_v21 = vld [vmem:[#allocation3 + $0xc1] sm:$0xff]  ;;  %v4543_v9 = vld [vmem:[#allocation3 + $0xd1] sm:$0xff] }
 0x23c   : > { %vm11430_vm10 = vmpackc.low %vm12987_vm13, %vm9215_vm15  ;;  %vm13247_vm13 = vnez %v13246_v29  ;;  %v11550_v29 = vld [vmem:[%s12439_s3 + $0x1f8] sm:$0xff]  }
 0x23d   : > { %8859 = vmatpush3.bf16.msra.mxu1 %v9162_v49  ;;  %v9170_v49 = vld [vmem:[%s12439_s3 + $0x160] sm:$0xff]  }
 0x23e   : > { %8860 = vmatprep.subr.bf16.mxu1 %v9163_v44 }
 0x240   : > { %8825 = vmatmul.mubr.msk.bf16.vlgmr.msra.gmra.mxu0 %vm10967_vm2, %v10993_v12  ;;  %8781 = vmatmul.mubr.msk.bf16.gmra.mxu1 %vm11387_vm14, %v11391_v34  ;;  %v9165_v12 = vld [vmem:[%s12439_s3 + $0x118] sm:$0xff]  }
 0x241   : > { %8828 = vmatprep.mubr.msk.bf16.mxu0 %vm10986_vm1, %v11050_v38  ;;  %8784 = vmatprep.mubr.msk.bf16.mxu1 %vm11396_vm6, %v11406_v18  ;;  %v9169_v38 = vld [vmem:[%s12439_s3 + $0x168] sm:$0xff]  }
 0x242   : > { %8861 = vmatpush3.bf16.msra.mxu1 %v9163_v44  ;;  %8905 = vmatpush3.bf16.msra.mxu0 %v11230_v30  ;;  %v13242_v30 = vld [vmem:[#allocation55_spill] sm:$0xff]  ;;  %v4532_v44 = vld [vmem:[#allocation3 + $0x79] sm:$0xff] }
 0x243   : > { %8862 = vmatprep.subr.bf16.mxu1 %v9164_v58  ;;  %8906 = vmatprep.subr.bf16.mxu0 %v9167_v13  ;;  %vm13243_vm3 = vnez %v13242_v30  ;;  %v11476_v20 = vpack.c.bf16 %v4533_v6, %v4532_v44  ;;  %v13258_v30 = vmov 0  ;;  %v13263_v44 = vmov 0 }
 0x244   : > { %vm11439_vm1 = vmpackc.low %vm13243_vm3, %vm9215_vm15 }
 0x245   : > { %v13245_v22 = vsel %vm11439_vm1, 4294967295, %v13244_v22  ;;  %vm11472_vm3 = vmpackc.low %vm13247_vm13, %vm9215_vm15 }
 0x246   : > { %8863 = vmatpush3.bf16.msra.mxu1 %v9164_v58  ;;  %8907 = vmatpush3.bf16.msra.mxu0 %v9167_v13  ;;  %v13249_v62 = vsel %vm11472_vm3, 4294967295, %v13248_v62  ;;  %v13251_v58 = vld [vmem:[#allocation57_spill] sm:$0xff]  ;;  %v13253_v13 = vmov 0 }
 0x247   : > { %8864 = vmatprep.subr.bf16.mxu1 %v9165_v12  ;;  %8908 = vmatprep.subr.bf16.mxu0 %v9169_v38  ;;  %13250 = vst [vmem:[#allocation14_spill] sm:$0xff] %v13249_v62 }
 0x248   : > { %8829 = vmatmul.mubr.msk.bf16.gmra.mxu0 %vm11031_vm7, %v11060_v1  ;;  %8785 = vmatmul.mubr.msk.bf16.gmra.mxu1 %vm11430_vm10, %v11434_v60  ;;  %v9171_v1 = vld [vmem:[%s12439_s3 + $0x108] sm:$0xff]  }
 0x249   : > { %8832 = vmatprep.mubr.msk.bf16.mxu0 %vm11055_vm12, %v11117_v24  ;;  %8788 = vmatprep.mubr.msk.bf16.mxu1 %vm11439_vm1, %v11449_v7  ;;  %v9172_v24 = vld [vmem:[%s12439_s3 + $0x158] sm:$0xff]   ;;  %vm13252_vm12 = vnez %v13251_v58  ;;  %v13269_v58 = vmov 0 }
 0x24a   : > { %8865 = vmatpush3.bf16.msra.mxu1 %v9165_v12  ;;  %8909 = vmatpush3.bf16.msra.mxu0 %v9169_v38  ;;  %vm11481_vm7 = vmpackc.low %vm13252_vm12, %vm9215_vm15  ;;  %v9174_v12 = vld [vmem:[%s12439_s3 + $0x100] sm:$0xff]   ;;  %v4536_v38 = vld [vmem:[#allocation3 + $0x99] sm:$0xff]  ;;  %vm13257_vm12 = vnez %v13256_v4 }
 0x24b   : > { %8866 = vmatprep.subr.bf16.mxu1 %v9168_v42  ;;  %8910 = vmatprep.subr.bf16.mxu0 %v9170_v49  ;;  %v13254_v13 = vsel %vm11481_vm7, 4294967295, %v13253_v13  ;;  %vm11516_vm13 = vmpackc.low %vm13257_vm12, %vm9215_vm15  ;;  %v4545_v4 = vld [vmem:[#allocation3 + $0xe1] sm:$0xff] }
 0x24c   : > { %13255 = vst [vmem:[#allocation17_spill] sm:$0xff] %v13254_v13  ;;  %v13259_v30 = vsel %vm11516_vm13, 4294967295, %v13258_v30  ;;  %v6482_v13 = vld [vmem:[#allocation3 + $0x29] sm:$0xff] }
 0x24d   : > { %13260 = vst [vmem:[#allocation20_spill] sm:$0xff] %v13259_v30 }
 0x24e   : > { %8867 = vmatpush3.bf16.msra.mxu1 %v9168_v42  ;;  %8911 = vmatpush3.bf16.msra.mxu0 %v9170_v49  ;;  %v11520_v42 = vpack.c.bf16 %v4537_v51, %v4536_v38  ;;  %v4538_v49 = vld [vmem:[#allocation3 + $0xa9] sm:$0xff]  ;;  %v13272_v38 = vld [vmem:[#allocation74_spill] sm:$0xff]  ;;  %v13274_v51 = vmov 0 }
 0x24f   : > { %8868 = vmatprep.subr.bf16.mxu1 %v9171_v1  ;;  %8912 = vmatprep.subr.bf16.mxu0 %v9172_v24  ;;  %v11533_v6 = vpack.c.bf16 %v4539_v33, %v4538_v49  ;;  %v4544_v33 = vld [vmem:[#allocation3 + $0xd9] sm:$0xff]  ;;  %v4547_v49 = vld [vmem:[#allocation3 + $0xf1] sm:$0xff] }
 0x250   : > { %8833 = vmatmul.mubr.msk.bf16.gmra.mxu0 %vm11098_vm4, %v11127_v59  ;;  %8789 = vmatmul.mubr.msk.bf16.gmra.mxu1 %vm11472_vm3, %v11476_v20  ;;  %v11508_v59 = vld [vmem:[%s12439_s3 + $0x1b8] sm:$0xff]  }
 0x251   : > { %8836 = vmatprep.mubr.msk.bf16.mxu0 %vm11122_vm9, %v11183_v37  ;;  %8792 = vmatprep.mubr.msk.bf16.mxu1 %vm11481_vm7, %v11491_v47  ;;  %v9175_v37 = vld [vmem:[%s12439_s3 + $0x148] sm:$0xff]  }
 0x252   : > { %8869 = vmatpush3.bf16.msra.mxu1 %v9171_v1  ;;  %8913 = vmatpush3.bf16.msra.mxu0 %v9172_v24  ;;  %v13261_v1 = vld [vmem:[#allocation70_spill] sm:$0xff]  ;;  %v9176_v24 = vld [vmem:[%s12439_s3 + $0x140] sm:$0xff]  }
 0x253   : > { %8870 = vmatprep.subr.bf16.mxu1 %v9174_v12  ;;  %8914 = vmatprep.subr.bf16.mxu0 %v9173_v40  ;;  %vm13262_vm9 = vnez %v13261_v1  ;;  %v13281_v1 = vmov 0 }
 0x254   : > { %vm11525_vm4 = vmpackc.low %vm13262_vm9, %vm9215_vm15  ;;  %vm13266_vm9 = vnez %v13173_v14 }
 0x255   : > { %v13264_v44 = vsel %vm11525_vm4, 4294967295, %v13263_v44 }
 0x256   : > { %8871 = vmatpush3.bf16.msra.mxu1 %v9174_v12  ;;  %13265 = vst [vmem:[#allocation19_spill] sm:$0xff] %v13264_v44  ;;  %8915 = vmatpush3.bf16.msra.mxu0 %v9173_v40  ;;  %v4542_v40 = vld [vmem:[#allocation3 + $0xc9] sm:$0xff] }
 0x257   : > { %8952 = vmatprep.subr.bf16.mxu1 %v11508_v59  ;;  %8916 = vmatprep.subr.bf16.mxu0 %v9175_v37 }
 0x258   : > { %8837 = vmatmul.mubr.msk.bf16.gmra.mxu0 %vm11165_vm5, %v11193_v35  ;;  %8793 = vmatmul.mubr.msk.bf16.gmra.mxu1 %vm11516_vm13, %v11520_v42  ;;  %v4540_v35 = vld [vmem:[#allocation3 + $0xb9] sm:$0xff]  ;;  %vm13273_vm5 = vnez %v13272_v38 }
 0x259   : > { %8840 = vmatprep.mubr.msk.bf16.mxu0 %vm13266_vm9, %v11238_v41  ;;  %8796 = vmatprep.mubr.msk.bf16.mxu1 %vm11525_vm4, %v11533_v6  ;;  %v13267_v41 = vld [vmem:[#allocation71_spill] sm:$0xff]  ;;  %v11559_v12 = vpack.c.bf16 %v4541_v21, %v4540_v35  ;;  %vm11564_vm2 = vmpackc.low %vm13273_vm5, %vm9215_vm15  ;;  %vm13277_vm4 = vnez %v13185_v28  ;;  %v13286_v21 = vmov 0  ;;  %v5195_v38 = vld [vmem:[#allocation3 + $0x20] sm:$0xff] }
 0x25a   : > { %8917 = vmatpush3.bf16.msra.mxu0 %v9175_v37  ;;  %vm13268_vm12 = vnez %v13267_v41  ;;  %v13275_v51 = vsel %vm11564_vm2, 4294967295, %v13274_v51  ;;  %v11571_v37 = vpack.c.bf16 %v4543_v9, %v4542_v40  ;;  %v13284_v35 = vld [vmem:[#allocation79_spill] sm:$0xff]  ;;  %v4548_v41 = vld [vmem:[#allocation3 + $0xf9] sm:$0xff] }
 0x25b   : > { %8918 = vmatprep.subr.bf16.mxu0 %v9176_v24  ;;  %vm11555_vm9 = vmpackc.low %vm13268_vm12, %vm9215_vm15  ;;  %13276 = vst [vmem:[#allocation4_spill] sm:$0xff] %v13275_v51  ;;  %vm13278_vm12 = vnez %v13193_v63  ;;  %v4549_v40 = vld [vmem:[#allocation3 + $0x101] sm:$0xff] }
 0x25c   : > { %v13270_v58 = vsel %vm11555_vm9, 4294967295, %v13269_v58 }
 0x25d   : > { %13271 = vst [vmem:[#allocation11_spill] sm:$0xff] %v13270_v58 }
 0x25e   : > { %8919 = vmatpush3.bf16.msra.mxu0 %v9176_v24  ;;  %v11590_v24 = vpack.c.bf16 %v4545_v4, %v4544_v33  ;;  %v13291_v33 = vld [vmem:[#allocation59_spill] sm:$0xff]  ;;  %v11620_v4 = vpack.c.bf16 %v4549_v40, %v4548_v41  ;;  %v5199_v41 = vld [vmem:[#allocation3 + $0x40] sm:$0xff] }
 0x25f   : > { %9000 = vmatprep.subr.bf16.mxu0 %v11550_v29 }
 0x260   : > { %8841 = vmatmul.mubr.msk.bf16.gmra.mxu0 %vm13277_vm4, %v11250_v45  ;;  %8797 = vmatmul.mubr.msk.bf16.gmra.mxu1 %vm11555_vm9, %v11559_v12  ;;  %v13279_v45 = vld [vmem:[#allocation76_spill] sm:$0xff] }
 0x261   : > { %8844 = vmatprep.mubr.msk.bf16.mxu0 %vm13278_vm12, %v11277_v15  ;;  %8800 = vmatprep.mubr.msk.bf16.mxu1 %vm11564_vm2, %v11571_v37  ;;  %vm13280_vm5 = vnez %v13279_v45  ;;  %v4546_v15 = vld [vmem:[#allocation3 + $0xe9] sm:$0xff]  ;;  %vm13285_vm12 = vnez %v13284_v35  ;;  %vm13289_vm2 = vnez %v13202_v52 }
 0x262   : > { %vm11586_vm4 = vmpackc.low %vm13280_vm5, %vm9215_vm15  ;;  %v11602_v9 = vpack.c.bf16 %v4547_v49, %v4546_v15  ;;  %vm13290_vm5 = vnez %v13206_v16  ;;  %v4886_v45 = vld [vmem:[#allocation3 + $0x107] sm:$0xff]  ;;  %v5197_v15 = vld [vmem:[#allocation3 + $0x30] sm:$0xff] }
 0x263   : > { %v13282_v1 = vsel %vm11586_vm4, 4294967295, %v13281_v1  ;;  %vm11595_vm9 = vmpackc.low %vm13285_vm12, %vm9215_vm15  ;;  %vm13292_vm12 = vnez %v13291_v33  ;;  %v4887_v35 = vld [vmem:[#allocation3 + $0x10f] sm:$0xff] }
 0x264   : > { %13283 = vst [vmem:[#allocation90_spill] sm:$0xff] %v13282_v1  ;;  %v13287_v21 = vsel %vm11595_vm9, 4294967295, %v13286_v21  ;;  %v11631_v40 = vpack.c.bf16 %v4887_v35, %v4886_v45  ;;  %v5196_v33 = vld [vmem:[#allocation3 + $0x28] sm:$0xff]  ;;  %v5203_v45 = vld [vmem:[#allocation3 + $0x60] sm:$0xff] }
 0x265   : > { %13288 = vst [vmem:[#allocation98_spill] sm:$0xff] %v13287_v21  ;;  %v11633_v2 = vpack.c.bf16 %v5197_v15, %v5196_v33  ;;  %v5200_v15 = vld [vmem:[#allocation3 + $0x48] sm:$0xff]  ;;  %v9183_v33 = vld [vmem:[%s12439_s3 + $0x1f0] sm:$0xff]  }
 0x268   : > { %8845 = vmatmul.mubr.msk.bf16.gmra.mxu0 %vm13289_vm2, %v11286_v50  ;;  %8801 = vmatmul.mubr.msk.bf16.gmra.mxu1 %vm11586_vm4, %v11590_v24  ;;  %vm11616_vm2 = vmpackc.low %vm13292_vm12, %vm9215_vm15  ;;  %v13293_v50 = vmov 0  ;;  %vm13297_vm15 = vnez %v13218_v56  ;;  %vm13298_vm12 = vnez %v13229_v43 }
 0x269   : > { %8848 = vmatprep.mubr.msk.bf16.mxu0 %vm13290_vm5, %v11309_v53  ;;  %8804 = vmatprep.mubr.msk.bf16.mxu1 %vm11595_vm9, %v11602_v9  ;;  %v13294_v50 = vsel %vm11616_vm2, 4294967295, %v13293_v50  ;;  %v5194_v53 = vld [vmem:[#allocation3 + $0x18] sm:$0xff]  ;;  %vm13296_vm5 = vnez %v13214_v19 }
 0x26a   : > { %13295 = vst [vmem:[#allocation60_spill] sm:$0xff] %v13294_v50  ;;  %v5226_v49 = vpack.c.bf16 %v5195_v38, %v5194_v53  ;;  %v9178_v38 = vld [vmem:[%s12439_s3 + $0x1b0] sm:$0xff]   ;;  %v9179_v53 = vld [vmem:[%s12439_s3 + $0x1a8] sm:$0xff]  }
 0x270   : > { %8849 = vmatmul.mubr.msk.bf16.gmra.mxu0 %vm11305_vm11, %v11318_v57  ;;  %8805 = vmatmul.mubr.msk.bf16.gmra.mxu1 %vm11616_vm2, %v11620_v4  ;;  %v5198_v57 = vld [vmem:[#allocation3 + $0x38] sm:$0xff] }
 0x271   : > { %8852 = vmatprep.mubr.msk.bf16.mxu0 %vm13296_vm5, %v11345_v25  ;;  %8872 = vmatprep.mubr.bf16.mxu1 %v5226_v49  ;;  %v11641_v25 = vpack.c.bf16 %v5199_v41, %v5198_v57  ;;  %v5201_v49 = vld [vmem:[#allocation3 + $0x50] sm:$0xff]  ;;  %v5202_v41 = vld [vmem:[#allocation3 + $0x58] sm:$0xff] }
 0x272   : > { %v11652_v35 = vpack.c.bf16 %v5201_v49, %v5200_v15  ;;  %v5205_v57 = vld [vmem:[#allocation3 + $0x70] sm:$0xff]  ;;  %v5207_v49 = vld [vmem:[#allocation3 + $0x80] sm:$0xff]  ;;  %v5206_v15 = vld [vmem:[#allocation3 + $0x78] sm:$0xff] }
 0x278   : > { %8853 = vmatmul.mubr.msk.bf16.gmra.mxu0 %vm11341_vm8, %v11631_v40  ;;  %8873 = vmatmul.mubr.bf16.vlgmr.msra.gmra.mxu1 %v11633_v2 }
 0x279   : > { %8920 = vmatprep.mubr.msk.bf16.mxu0 %vm13297_vm15, %v11354_v26  ;;  %8953 = vmatpush3.bf16.msra.mxu1 %v11508_v59  ;;  %v9180_v26 = vld [vmem:[%s12439_s3 + $0x1a0] sm:$0xff]   ;;  %v11660_v59 = vpack.c.bf16 %v5203_v45, %v5202_v41 }
 0x27a   : > { %8876 = vmatprep.mubr.bf16.mxu1 %v11641_v25  ;;  %8954 = vmatprep.subr.bf16.mxu1 %v9178_v38  ;;  %v9186_v41 = vld [vmem:[%s12439_s3 + $0x1e0] sm:$0xff]  }
 0x27d   : > { %8955 = vmatpush3.bf16.msra.mxu1 %v9178_v38  ;;  %v9185_v38 = vld [vmem:[%s12439_s3 + $0x1e8] sm:$0xff]  }
 0x27e   : > { %8956 = vmatprep.subr.bf16.mxu1 %v9179_v53 }
 0x280   : > { %8921 = vmatmul.mubr.msk.bf16.vlgmr.msra.gmra.mxu0 %vm11350_vm0, %v11369_v48  ;;  %8877 = vmatmul.mubr.bf16.gmra.mxu1 %v11652_v35  ;;  %v9181_v48 = vld [vmem:[%s12439_s3 + $0x198] sm:$0xff]  }
 0x281   : > { %8924 = vmatprep.mubr.msk.bf16.mxu0 %vm13298_vm12, %v11391_v34  ;;  %8880 = vmatprep.mubr.bf16.mxu1 %v11660_v59  ;;  %v5204_v34 = vld [vmem:[#allocation3 + $0x68] sm:$0xff] }
 0x282   : > { %8957 = vmatpush3.bf16.msra.mxu1 %v9179_v53  ;;  %9001 = vmatpush3.bf16.msra.mxu0 %v11550_v29  ;;  %v11677_v45 = vpack.c.bf16 %v5205_v57, %v5204_v34  ;;  %v9184_v53 = vld [vmem:[%s12439_s3 + $0x190] sm:$0xff]   ;;  %v11685_v29 = vpack.c.bf16 %v5207_v49, %v5206_v15  ;;  %v5208_v49 = vld [vmem:[#allocation3 + $0x88] sm:$0xff]  ;;  %v5210_v34 = vld [vmem:[#allocation3 + $0x98] sm:$0xff] }
 0x283   : > { %8958 = vmatprep.subr.bf16.mxu1 %v9180_v26  ;;  %9002 = vmatprep.subr.bf16.mxu0 %v9183_v33  ;;  %v5211_v57 = vld [vmem:[#allocation3 + $0xa0] sm:$0xff] }
 0x284   : > { %v9189_v15 = vld [vmem:[%s12439_s3 + $0x1d0] sm:$0xff]  }
 0x286   : > { %8959 = vmatpush3.bf16.msra.mxu1 %v9180_v26  ;;  %9003 = vmatpush3.bf16.msra.mxu0 %v9183_v33  ;;  %v5209_v26 = vld [vmem:[#allocation3 + $0x90] sm:$0xff]  ;;  %v9188_v33 = vld [vmem:[%s12439_s3 + $0x1d8] sm:$0xff]  }
 0x287   : > { %8960 = vmatprep.subr.bf16.mxu1 %v9181_v48  ;;  %9004 = vmatprep.subr.bf16.mxu0 %v9185_v38 }
 0x288   : > { %8925 = vmatmul.mubr.msk.bf16.gmra.mxu0 %vm11387_vm14, %v11406_v18  ;;  %8881 = vmatmul.mubr.bf16.gmra.mxu1 %v11677_v45  ;;  %v9187_v18 = vld [vmem:[%s12439_s3 + $0x188] sm:$0xff]  }
 0x289   : > { %8928 = vmatprep.mubr.msk.bf16.mxu0 %vm11396_vm6, %v11434_v60  ;;  %8884 = vmatprep.mubr.bf16.mxu1 %v11685_v29  ;;  %v11701_v60 = vpack.c.bf16 %v5209_v26, %v5208_v49  ;;  %v5215_v26 = vld [vmem:[#allocation3 + $0xc0] sm:$0xff]  ;;  %v5214_v49 = vld [vmem:[#allocation3 + $0xb8] sm:$0xff] }
 0x28a   : > { %8961 = vmatpush3.bf16.msra.mxu1 %v9181_v48  ;;  %9005 = vmatpush3.bf16.msra.mxu0 %v9185_v38  ;;  %v9190_v48 = vld [vmem:[%s12439_s3 + $0x180] sm:$0xff]   ;;  %v11709_v38 = vpack.c.bf16 %v5211_v57, %v5210_v34  ;;  %v5212_v57 = vld [vmem:[#allocation3 + $0xa8] sm:$0xff] }
 0x28b   : > { %8962 = vmatprep.subr.bf16.mxu1 %v9184_v53  ;;  %9006 = vmatprep.subr.bf16.mxu0 %v9186_v41  ;;  %v5217_v34 = vld [vmem:[#allocation3 + $0xd0] sm:$0xff] }
 0x28e   : > { %8963 = vmatpush3.bf16.msra.mxu1 %v9184_v53  ;;  %9007 = vmatpush3.bf16.msra.mxu0 %v9186_v41  ;;  %v5213_v53 = vld [vmem:[#allocation3 + $0xb0] sm:$0xff]  ;;  %v9191_v41 = vld [vmem:[%s12439_s3 + $0x1c8] sm:$0xff]  }
 0x28f   : > { %8964 = vmatprep.subr.bf16.mxu1 %v9187_v18  ;;  %9008 = vmatprep.subr.bf16.mxu0 %v9188_v33 }
 0x290   : > { %8929 = vmatmul.mubr.msk.bf16.gmra.mxu0 %vm11430_vm10, %v11449_v7  ;;  %8885 = vmatmul.mubr.bf16.gmra.mxu1 %v11701_v60  ;;  %v9193_v7 = vld [vmem:[%s12439_s3 + $0x238] sm:$0xff]  }
 0x291   : > { %8932 = vmatprep.mubr.msk.bf16.mxu0 %vm11439_vm1, %v11476_v20  ;;  %8888 = vmatprep.mubr.bf16.mxu1 %v11709_v38  ;;  %v11725_v20 = vpack.c.bf16 %v5213_v53, %v5212_v57  ;;  %vm13301_vm1 = vnez %v13270_v58  ;;  %v5869_v58 = vld [vmem:[#allocation3 + $0x11f] sm:$0xff] }
 0x292   : > { %8965 = vmatpush3.bf16.msra.mxu1 %v9187_v18  ;;  %9009 = vmatpush3.bf16.msra.mxu0 %v9188_v33  ;;  %v11730_v18 = vpack.c.bf16 %v5215_v26, %v5214_v49  ;;  %v9192_v33 = vld [vmem:[%s12439_s3 + $0x1c0] sm:$0xff]   ;;  %v5220_v26 = vld [vmem:[#allocation3 + $0xe8] sm:$0xff] }
 0x293   : > { %8966 = vmatprep.subr.bf16.mxu1 %v9190_v48  ;;  %9010 = vmatprep.subr.bf16.mxu0 %v9189_v15 }
 0x296   : > { %8967 = vmatpush3.bf16.msra.mxu1 %v9190_v48  ;;  %9011 = vmatpush3.bf16.msra.mxu0 %v9189_v15  ;;  %v11740_v48 = vld [vmem:[#allocation3 + $0xd8] sm:$0xff]  ;;  %v5216_v15 = vld [vmem:[#allocation3 + $0xc8] sm:$0xff] }
 0x297   : > { %9048 = vmatprep.subr.bf16.mxu1 %v9193_v7  ;;  %9012 = vmatprep.subr.bf16.mxu0 %v9191_v41  ;;  %v11745_v53 = vpack.c.bf16 %v5217_v34, %v5216_v15  ;;  %v5841_v34 = vld [vmem:[#allocation3 + $0x3f] sm:$0xff]  ;;  %v5842_v15 = vld [vmem:[#allocation3 + $0x47] sm:$0xff] }
 0x298   : > { %8933 = vmatmul.mubr.msk.bf16.gmra.mxu0 %vm11472_vm3, %v11491_v47  ;;  %8889 = vmatmul.mubr.bf16.gmra.mxu1 %v11725_v20  ;;  %v7086_v47 = vld [vmem:[%s12441_s5] sm:$0x3]  ;;  %vm13300_vm3 = vnez %v13264_v44  ;;  %v7037_v44 = vld [vmem:[#allocation2 + $0xa9] ss:$2 sm:$0xff] }
 0x299   : > { %8936 = vmatprep.mubr.msk.bf16.mxu0 %vm11481_vm7, %v11520_v42  ;;  %8892 = vmatprep.mubr.bf16.mxu1 %v11730_v18  ;;  %v5238_v42 = vpack.c.bf16 %v11265_v8, %v11740_v48  ;;  %vm13299_vm7 = vcmask 1041408   ;;  %v11767_v8 = vld [vmem:[#allocation3 + $0x108] sm:$0xff] }
 0x29a   : > { %9013 = vmatpush3.bf16.msra.mxu0 %v9191_v41  ;;  %v5221_v41 = vld [vmem:[#allocation3 + $0xf0] sm:$0xff] }
 0x29b   : > { %9014 = vmatprep.subr.bf16.mxu0 %v9192_v33  ;;  %v11757_v57 = vpack.c.bf16 %v5221_v41, %v5220_v26  ;;  %v5843_v26 = vld [vmem:[#allocation3 + $0x4f] sm:$0xff] }
 0x29e   : > { %9015 = vmatpush3.bf16.msra.mxu0 %v9192_v33  ;;  %v5839_v33 = vld [vmem:[#allocation3 + $0x2f] sm:$0xff] }
 0x29f   : > { %9118 = vmatprep.subr.msk.bf16.mxu0 %vm13299_vm7, %v7086_v47  ;;  %vm13304_vm7 = vnez %v13230_v32 }
 0x2a0   : > { %8937 = vmatmul.mubr.msk.bf16.gmra.mxu0 %vm11516_vm13, %v11533_v6  ;;  %8893 = vmatmul.mubr.bf16.gmra.mxu1 %v11745_v53  ;;  %vm13302_vm13 = vnez %v13275_v51  ;;  %v5838_v6 = vld [vmem:[#allocation3 + $0x27] sm:$0xff]  ;;  %v5868_v51 = vld [vmem:[#allocation3 + $0x117] sm:$0xff] }
 0x2a1   : > { %8940 = vmatprep.mubr.msk.bf16.mxu0 %vm13300_vm3, %v11559_v12  ;;  %8896 = vmatprep.mubr.bf16.mxu1 %v5238_v42  ;;  %v13303_v12 = vmax.f32 %v11290_v0, 0.0  ;;  %v5840_v42 = vld [vmem:[#allocation3 + $0x37] sm:$0xff] }
 0x2a2   : > { %v7755_v41 = vpack.c.bf16 %v5841_v34, %v5840_v42  ;;  %v5847_v34 = vld [vmem:[#allocation3 + $0x6f] sm:$0xff] }
 0x2a3   : > { %v5241_v49 = vpack.c.bf16 %v13303_v12, %v11767_v8  ;;  %v9195_v12 = vld [vmem:[%s12439_s3 + $0x228] sm:$0xff]  }
 0x2a8   : > { %8941 = vmatmul.mubr.msk.bf16.gmra.mxu0 %vm13301_vm1, %v11571_v37  ;;  %8897 = vmatmul.mubr.bf16.gmra.mxu1 %v11757_v57  ;;  %v7752_v37 = vpack.c.bf16 %v5839_v33, %v5838_v6 }
 0x2a9   : > { %8944 = vmatprep.mubr.msk.bf16.mxu0 %vm13302_vm13, %v11590_v24  ;;  %8900 = vmatprep.mubr.bf16.mxu1 %v11320_v11  ;;  %v5530_v11 = vld [vmem:[#allocation3 + $0x109] sm:$0xff]  ;;  %v5531_v24 = vld [vmem:[#allocation3 + $0x111] sm:$0xff] }
 0x2aa   : > { %v11780_v0 = vpack.c.bf16 %v5531_v24, %v5530_v11  ;;  %v5844_v11 = vld [vmem:[#allocation3 + $0x57] sm:$0xff] }
 0x2ac   : > { %13305 = vst [vmem:[#allocation22_spill] sm:$0xff] %v11780_v0 }
 0x2b0   : > { %8945 = vmatmul.mubr.msk.bf16.gmra.mxu0 %vm11586_vm4, %v11602_v9  ;;  %8901 = vmatmul.mubr.bf16.gmra.mxu1 %v5241_v49  ;;  %v9194_v9 = vld [vmem:[%s12439_s3 + $0x230] sm:$0xff]  }
 0x2b1   : > { %8948 = vmatprep.mubr.msk.bf16.mxu0 %vm11595_vm9, %v11620_v4  ;;  %8968 = vmatprep.mubr.msk.bf16.mxu1 %vm13304_vm7, %v7752_v37  ;;  %v7758_v4 = vpack.c.bf16 %v5843_v26, %v5842_v15  ;;  %vm13306_vm7 = vnez %v13105_v27  ;;  %vm13307_vm9 = vnez %v13113_v23  ;;  %v5845_v49 = vld [vmem:[#allocation3 + $0x5f] sm:$0xff]  ;;  %v5846_v37 = vld [vmem:[#allocation3 + $0x67] sm:$0xff]  ;;  %v9196_v27 = vld [vmem:[%s12439_s3 + $0x220] sm:$0xff]  }
 0x2b2   : > { %v7761_v24 = vpack.c.bf16 %v5845_v49, %v5844_v11  ;;  %v5850_v49 = vld [vmem:[#allocation3 + $0x87] sm:$0xff]  ;;  %v5848_v11 = vld [vmem:[#allocation3 + $0x77] sm:$0xff] }
 0x2b5   : > { %v8682_v32 = vpop.f32.mrf.mxu1 }
 0x2b7   : > { %v4182_v6 = vpop.f32.mrf.mxu1 }
 0x2b8   : > { %8949 = vmatmul.mubr.msk.bf16.gmra.mxu0 %vm11616_vm2, %v11780_v0  ;;  %8969 = vmatmul.mubr.msk.bf16.vlgmr.msra.gmra.mxu1 %vm13306_vm7, %v7755_v41  ;;  %vm13309_vm7 = vnez %v13128_v54  ;;  %vm13310_vm2 = vnez %v13137_v39 }
 0x2b9   : > { %9016 = vmatprep.mubr.bf16.mxu0 %v11633_v2  ;;  %9049 = vmatpush3.bf16.msra.mxu1 %v9193_v7  ;;  %v8683_v33 = vpop.f32.mrf.mxu1  ;;  %v7764_v7 = vpack.c.bf16 %v5847_v34, %v5846_v37  ;;  %v9198_v34 = vld [vmem:[%s12439_s3 + $0x210] sm:$0xff]  }
 0x2ba   : > { %8972 = vmatprep.mubr.msk.bf16.mxu1 %vm13307_vm9, %v7758_v4  ;;  %9050 = vmatprep.subr.bf16.mxu1 %v9194_v9  ;;  %vm13308_vm9 = vcmask 1041408  }
 0x2bb   : > { %v4185_v2 = vpop.f32.mrf.mxu1  ;;  %v7107_v15 = vsel %vm13308_vm9, %v7086_v47, 0  ;;  %vm13312_vm9 = vnez %v13155_v17 }
 0x2bd   : > { %9051 = vmatpush3.bf16.msra.mxu1 %v9194_v9  ;;  %v8730_v23 = vpop.f32.mrf.mxu0 }
 0x2be   : > { %9052 = vmatprep.subr.bf16.mxu1 %v9195_v12  ;;  %v11801_v42 = vadd.f32 %v8730_v23, %v8682_v32  ;;  %v8686_v41 = vpop.f32.mrf.mxu1 }
 0x2bf   : > { %v4391_v26 = vpop.f32.mrf.mxu0 }
 0x2c0   : > { %9017 = vmatmul.mubr.bf16.vlgmr.msra.gmra.mxu0 %v11641_v25  ;;  %8973 = vmatmul.mubr.msk.bf16.gmra.mxu1 %vm13309_vm7, %v7761_v24  ;;  %v11808_v9 = vadd.f32 %v4391_v26, %v4182_v6  ;;  %v4198_v4 = vpop.f32.mrf.mxu1  ;;  %v9197_v25 = vld [vmem:[%s12439_s3 + $0x218] sm:$0xff]   ;;  %vm13313_vm7 = vnez %v13165_v31 }
 0x2c1   : > { %9020 = vmatprep.mubr.bf16.mxu0 %v11652_v35  ;;  %8976 = vmatprep.mubr.msk.bf16.mxu1 %vm13310_vm2, %v7764_v7  ;;  %v8731_v47 = vpop.f32.mrf.mxu0  ;;  %v5849_v35 = vld [vmem:[#allocation3 + $0x7f] sm:$0xff]  ;;  %v5851_v24 = vld [vmem:[#allocation3 + $0x8f] sm:$0xff]  ;;  %vm13311_vm2 = vnez %v13147_v61  ;;  %v5854_v61 = vld [vmem:[#allocation3 + $0xa7] sm:$0xff] }
 0x2c2   : > { %9053 = vmatpush3.bf16.msra.mxu1 %v9195_v12  ;;  %9097 = vmatpush3.bf16.msra.mxu0 %v7107_v15  ;;  %v11813_v32 = vadd.f32 %v8731_v47, %v8683_v33  ;;  %v8687_v54 = vpop.f32.mrf.mxu1  ;;  %v7767_v12 = vpack.c.bf16 %v5849_v35, %v5848_v11  ;;  %v7770_v33 = vpack.c.bf16 %v5851_v24, %v5850_v49  ;;  %v5853_v47 = vld [vmem:[#allocation3 + $0x9f] sm:$0xff]  ;;  %v5855_v11 = vld [vmem:[#allocation3 + $0xaf] sm:$0xff] }
 0x2c3   : > { %9054 = vmatprep.subr.bf16.mxu1 %v9196_v27  ;;  %v4394_v37 = vpop.f32.mrf.mxu0 }
 0x2c4   : > { %v11815_v39 = vadd.f32 %v4394_v37, %v4185_v2  ;;  %v4201_v6 = vpop.f32.mrf.mxu1  ;;  %v5852_v37 = vld [vmem:[#allocation3 + $0x97] sm:$0xff] }
 0x2c5   : > { %v8734_v23 = vpop.f32.mrf.mxu0 }
 0x2c6   : > { %9055 = vmatpush3.bf16.msra.mxu1 %v9196_v27  ;;  %v11821_v7 = vadd.f32 %v8734_v23, %v8686_v41  ;;  %v8690_v15 = vpop.f32.mrf.mxu1 }
 0x2c7   : > { %9056 = vmatprep.subr.bf16.mxu1 %v9197_v25  ;;  %v4407_v2 = vpop.f32.mrf.mxu0 }
 0x2c8   : > { %9021 = vmatmul.mubr.bf16.gmra.mxu0 %v11660_v59  ;;  %8977 = vmatmul.mubr.msk.bf16.gmra.mxu1 %vm13311_vm2, %v7767_v12  ;;  %v11828_v27 = vadd.f32 %v4407_v2, %v4198_v4  ;;  %v4214_v26 = vpop.f32.mrf.mxu1  ;;  %v9199_v59 = vld [vmem:[%s12439_s3 + $0x208] sm:$0xff]   ;;  %v7773_v4 = vpack.c.bf16 %v5853_v47, %v5852_v37  ;;  %v9200_v12 = vld [vmem:[%s12439_s3 + $0x200] sm:$0xff]   ;;  %vm13314_vm2 = vnez %v13173_v14 }
 0x2c9   : > { %9024 = vmatprep.mubr.bf16.mxu0 %v11677_v45  ;;  %8980 = vmatprep.mubr.msk.bf16.mxu1 %vm13312_vm9, %v7770_v33  ;;  %v8735_v41 = vpop.f32.mrf.mxu0  ;;  %v5859_v14 = vld [vmem:[#allocation3 + $0xcf] sm:$0xff]  ;;  %vm13316_vm9 = vnez %v13185_v28 }
 0x2ca   : > { %9057 = vmatpush3.bf16.msra.mxu1 %v9197_v25  ;;  %v11833_v45 = vadd.f32 %v8735_v41, %v8687_v54  ;;  %v8691_v35 = vpop.f32.mrf.mxu1  ;;  %v7776_v54 = vpack.c.bf16 %v5855_v11, %v5854_v61  ;;  %v5858_v61 = vld [vmem:[#allocation3 + $0xc7] sm:$0xff] }
 0x2cb   : > { %9058 = vmatprep.subr.bf16.mxu1 %v9198_v34  ;;  %v4410_v49 = vpop.f32.mrf.mxu0 }
 0x2cc   : > { %v11835_v17 = vadd.f32 %v4410_v49, %v4201_v6  ;;  %v4217_v25 = vpop.f32.mrf.mxu1  ;;  %v5856_v49 = vld [vmem:[#allocation3 + $0xb7] sm:$0xff] }
 0x2cd   : > { %v8738_v24 = vpop.f32.mrf.mxu0 }
 0x2ce   : > { %9059 = vmatpush3.bf16.msra.mxu1 %v9198_v34  ;;  %v11841_v23 = vadd.f32 %v8738_v24, %v8690_v15 }
 0x2cf   : > { %9060 = vmatprep.subr.bf16.mxu1 %v9199_v59  ;;  %v8694_v33 = vpop.f32.mrf.mxu1  ;;  %v4423_v6 = vpop.f32.mrf.mxu0 }
 0x2d0   : > { %9025 = vmatmul.mubr.bf16.gmra.mxu0 %v11685_v29  ;;  %8981 = vmatmul.mubr.msk.bf16.gmra.mxu1 %vm13313_vm7, %v7773_v4  ;;  %v11848_v34 = vadd.f32 %v4423_v6, %v4214_v26  ;;  %v5857_v29 = vld [vmem:[#allocation3 + $0xbf] sm:$0xff]  ;;  %v7782_v26 = vpack.c.bf16 %v5859_v14, %v5858_v61  ;;  %vm13317_vm7 = vnez %v13193_v63  ;;  %v5860_v61 = vld [vmem:[#allocation3 + $0xd7] sm:$0xff] }
 0x2d1   : > { %9028 = vmatprep.mubr.bf16.mxu0 %v11701_v60  ;;  %8984 = vmatprep.mubr.msk.bf16.mxu1 %vm13314_vm2, %v7776_v54  ;;  %v4230_v2 = vpop.f32.mrf.mxu1  ;;  %v8739_v41 = vpop.f32.mrf.mxu0  ;;  %v7779_v4 = vpack.c.bf16 %v5857_v29, %v5856_v49  ;;  %v5861_v6 = vld [vmem:[#allocation3 + $0xdf] sm:$0xff]  ;;  %v5863_v49 = vld [vmem:[#allocation3 + $0xef] sm:$0xff]  ;;  %vm13322_vm2 = vnez %v13202_v52 }
 0x2d2   : > { %9061 = vmatpush3.bf16.msra.mxu1 %v9199_v59  ;;  %v11850_v47 = vadd.f32 %v8739_v41, %v8691_v35  ;;  %v7785_v28 = vpack.c.bf16 %v5861_v6, %v5860_v61  ;;  %v6987_v6 = vld [vmem:[#allocation2 + $0x18] ss:$2 sm:$0xff]  ;;  %v7019_v61 = vld [vmem:[#allocation2 + $0x19] ss:$2 sm:$0xff]  ;;  %v7021_v52 = vld [vmem:[#allocation2 + $0x29] ss:$2 sm:$0xff] }
 0x2d3   : > { %9062 = vmatprep.subr.bf16.mxu1 %v9200_v12  ;;  %v8695_v15 = vpop.f32.mrf.mxu1  ;;  %v4426_v60 = vpop.f32.mrf.mxu0  ;;  %v7050_v0 = vadd.f32 %v7019_v61, %v6987_v6  ;;  %v6202_v6 = vld [vmem:[#allocation3 + $0xf8] sm:$0xff] }
 0x2d4   : > { %v11852_v31 = vadd.f32 %v4426_v60, %v4217_v25  ;;  %v7029_v61 = vld [vmem:[#allocation2 + $0x69] ss:$2 sm:$0xff] }
 0x2d5   : > { %v4233_v37 = vpop.f32.mrf.mxu1 }
 0x2d6   : > { %9063 = vmatpush3.bf16.msra.mxu1 %v9200_v12  ;;  %v8742_v11 = vpop.f32.mrf.mxu0 }
 0x2d7   : > { %v11855_v59 = vadd.f32 %v8742_v11, %v8694_v33  ;;  %v8698_v35 = vpop.f32.mrf.mxu1  ;;  %v5862_v33 = vld [vmem:[#allocation3 + $0xe7] sm:$0xff] }
 0x2d8   : > { %9029 = vmatmul.mubr.bf16.gmra.mxu0 %v11709_v38  ;;  %8985 = vmatmul.mubr.msk.bf16.gmra.mxu1 %vm13316_vm9, %v7779_v4  ;;  %v4439_v24 = vpop.f32.mrf.mxu0  ;;  %v7788_v63 = vpack.c.bf16 %v5863_v49, %v5862_v33  ;;  %vm13323_vm9 = vnez %v13206_v16  ;;  %v6199_v11 = vld [vmem:[#allocation3 + $0xe0] sm:$0xff] }
 0x2d9   : > { %13315 = vst [vmem:[#allocation8_spill] sm:$0xff] %v11855_v59  ;;  %9032 = vmatprep.mubr.bf16.mxu0 %v11725_v20  ;;  %8988 = vmatprep.mubr.msk.bf16.mxu1 %vm13317_vm7, %v7782_v26  ;;  %v11862_v25 = vadd.f32 %v4439_v24, %v4230_v2  ;;  %v4246_v12 = vpop.f32.mrf.mxu1  ;;  %v6219_v49 = vpack.c.bf16 %v6199_v11, %v11740_v48  ;;  %v6993_v16 = vld [vmem:[#allocation2 + $0x48] ss:$2 sm:$0xff]  ;;  %v6205_v11 = vld [vmem:[#allocation3 + $0x110] sm:$0xff] }
 0x2da   : > { %v8743_v54 = vpop.f32.mrf.mxu0  ;;  %v6203_v48 = vld [vmem:[#allocation3 + $0x100] sm:$0xff] }
 0x2db   : > { %13318 = vst [vmem:[#allocation91_spill] sm:$0xff] %v11862_v25  ;;  %v11864_v41 = vadd.f32 %v8743_v54, %v8695_v15  ;;  %v8699_v38 = vpop.f32.mrf.mxu1  ;;  %v5864_v54 = vld [vmem:[#allocation3 + $0xf7] sm:$0xff] }
 0x2dc   : > { %v4442_v29 = vpop.f32.mrf.mxu0  ;;  %v7041_v25 = vld [vmem:[#allocation2 + $0xc9] ss:$2 sm:$0xff] }
 0x2dd   : > { %13319 = vst [vmem:[#allocation100_spill] sm:$0xff] %v11864_v41  ;;  %v11866_v20 = vadd.f32 %v4442_v29, %v4233_v37  ;;  %v4249_v60 = vpop.f32.mrf.mxu1  ;;  %v6991_v29 = vld [vmem:[#allocation2 + $0x38] ss:$2 sm:$0xff]  ;;  %v7039_v41 = vld [vmem:[#allocation2 + $0xb9] ss:$2 sm:$0xff] }
 0x2df   : > { %13320 = vst [vmem:[#allocation35_spill] sm:$0xff] %v11866_v20  ;;  %v8746_v4 = vpop.f32.mrf.mxu0  ;;  %v7009_v20 = vld [vmem:[#allocation2 + $0xc8] ss:$2 sm:$0xff] }
 0x2e0   : > { %9033 = vmatmul.mubr.bf16.gmra.mxu0 %v11730_v18  ;;  %v11869_v2 = vadd.f32 %v8746_v4, %v8698_v35  ;;  %v8702_v14 = vpop.f32.mrf.mxu1  ;;  %8989 = vmatmul.mubr.msk.bf16.gmra.mxu1 %vm13322_vm2, %v7785_v28  ;;  %v5865_v18 = vld [vmem:[#allocation3 + $0xff] sm:$0xff]  ;;  %v7023_v4 = vld [vmem:[#allocation2 + $0x39] ss:$2 sm:$0xff] }
 0x2e1   : > { %9036 = vmatprep.mubr.bf16.mxu0 %v11745_v53  ;;  %v4455_v15 = vpop.f32.mrf.mxu0  ;;  %8992 = vmatprep.mubr.msk.bf16.mxu1 %vm13323_vm9, %v7788_v63  ;;  %v6989_v35 = vld [vmem:[#allocation2 + $0x28] ss:$2 sm:$0xff]  ;;  %v7791_v50 = vpack.c.bf16 %v5865_v18, %v5864_v54 }
 0x2e2   : > { %13321 = vst [vmem:[#allocation27_spill] sm:$0xff] %v11869_v2  ;;  %v11876_v37 = vadd.f32 %v4455_v15, %v4246_v12  ;;  %v4262_v26 = vpop.f32.mrf.mxu1  ;;  %v7025_v12 = vld [vmem:[#allocation2 + $0x49] ss:$2 sm:$0xff]  ;;  %v7051_v1 = vadd.f32 %v7021_v52, %v6989_v35  ;;  %v7001_v18 = vld [vmem:[#allocation2 + $0x88] ss:$2 sm:$0xff]  ;;  %v7797_v2 = vpack.c.bf16 %v5869_v58, %v5868_v51 }
 0x2e3   : > { %v8747_v24 = vpop.f32.mrf.mxu0  ;;  %v7027_v35 = vld [vmem:[#allocation2 + $0x59] ss:$2 sm:$0xff] }
 0x2e4   : > { %13324 = vst [vmem:[#allocation39_spill] sm:$0xff] %v11876_v37  ;;  %v11878_v33 = vadd.f32 %v8747_v24, %v8699_v38  ;;  %v8703_v53 = vpop.f32.mrf.mxu1  ;;  %v7031_v52 = vld [vmem:[#allocation2 + $0x79] ss:$2 sm:$0xff] }
 0x2e5   : > { %v4458_v28 = vpop.f32.mrf.mxu0  ;;  %v7035_v37 = vld [vmem:[#allocation2 + $0x99] ss:$2 sm:$0xff] }
 0x2e6   : > { %13325 = vst [vmem:[#allocation13_spill] sm:$0xff] %v11878_v33  ;;  %v11881_v63 = vadd.f32 %v4458_v28, %v4249_v60  ;;  %v4265_v15 = vpop.f32.mrf.mxu1  ;;  %v7052_v60 = vadd.f32 %v7023_v4, %v6991_v29  ;;  %v7053_v28 = vadd.f32 %v7025_v12, %v6993_v16  ;;  %v7066_v29 = vadd.f32 %v7051_v1, %v7050_v0  ;;  %v7033_v16 = vld [vmem:[#allocation2 + $0x89] ss:$2 sm:$0xff]  ;;  %v7003_v4 = vld [vmem:[#allocation2 + $0x98] ss:$2 sm:$0xff] }
 0x2e7   : > { %v8750_v21 = vpop.f32.mrf.mxu0  ;;  %v7005_v12 = vld [vmem:[#allocation2 + $0xa8] ss:$2 sm:$0xff]  ;;  %v7007_v33 = vld [vmem:[#allocation2 + $0xb8] ss:$2 sm:$0xff]  ;;  %v7058_v62 = vadd.f32 %v7035_v37, %v7003_v4 }
 0x2e8   : > { %13326 = vst [vmem:[#allocation92_spill] sm:$0xff] %v11881_v63  ;;  %9037 = vmatmul.mubr.bf16.gmra.mxu0 %v6219_v49  ;;  %v11883_v38 = vadd.f32 %v8750_v21, %v8702_v14  ;;  %v8706_v24 = vpop.f32.mrf.mxu1  ;;  %8993 = vmatmul.mubr.msk.bf16.gmra.mxu1 %vm11305_vm11, %v7791_v50  ;;  %v6995_v63 = vld [vmem:[#allocation2 + $0x58] ss:$2 sm:$0xff]  ;;  %v6997_v21 = vld [vmem:[#allocation2 + $0x68] ss:$2 sm:$0xff]  ;;  %v7074_v59 = vmul.f32 0.25, %v7066_v29 }
 0x2e9   : > { %9040 = vmatprep.mubr.bf16.mxu0 %v11757_v57  ;;  %v4471_v54 = vpop.f32.mrf.mxu0  ;;  %8996 = vmatprep.mubr.msk.bf16.mxu1 %vm13296_vm5, %v11631_v40  ;;  %v6999_v14 = vld [vmem:[#allocation2 + $0x78] ss:$2 sm:$0xff]  ;;  %v7067_v40 = vadd.f32 %v7053_v28, %v7052_v60  ;;  %v7054_v30 = vadd.f32 %v7027_v35, %v6995_v63  ;;  %v7061_v63 = vadd.f32 %v7041_v25, %v7009_v20  ;;  %v7043_v25 = vld [vmem:[#allocation2 + $0xd9] ss:$2 sm:$0xff]  ;;  %vm13330_vm11 = vcmask 31744  }
 0x2ea   : > { %13327 = vst [vmem:[#allocation102_spill] sm:$0xff] %v11883_v38  ;;  %v11891_v57 = vadd.f32 %v4471_v54, %v4262_v26  ;;  %v4278_v46 = vpop.f32.mrf.mxu1  ;;  %v6483_v50 = vld [vmem:[#allocation3 + $0x31] sm:$0xff]  ;;  %v6221_v54 = vpack.c.bf16 %v6203_v48, %v6202_v6  ;;  %v7059_v48 = vadd.f32 %v7037_v44, %v7005_v12 }
 0x2eb   : > { %v8751_v49 = vpop.f32.mrf.mxu0  ;;  %v7848_v28 = vpack.c.bf16 %v6483_v50, %v6482_v13  ;;  %v7075_v51 = vmul.f32 0.25, %v7067_v40  ;;  %v6487_v44 = vld [vmem:[#allocation3 + $0x51] sm:$0xff] }
 0x2ec   : > { %13328 = vst [vmem:[#allocation6_spill] sm:$0xff] %v11891_v57  ;;  %v11893_v38 = vadd.f32 %v8751_v49, %v8703_v53  ;;  %v8707_v19 = vpop.f32.mrf.mxu1  ;;  %v6222_v57 = vpack.c.bf16 %v6205_v11, %v11767_v8  ;;  %v7055_v53 = vadd.f32 %v7029_v61, %v6997_v21  ;;  %v7056_v49 = vadd.f32 %v7031_v52, %v6999_v14  ;;  %v6484_v11 = vld [vmem:[#allocation3 + $0x39] sm:$0xff]  ;;  %v6485_v21 = vld [vmem:[#allocation3 + $0x41] sm:$0xff]  ;;  %v7047_v29 = vld [vmem:[#allocation2 + $0xf9] ss:$2 sm:$0xff] }
 0x2ed   : > { %v4474_v26 = vpop.f32.mrf.mxu0  ;;  %v7060_v8 = vadd.f32 %v7039_v41, %v7007_v33  ;;  %v7015_v35 = vld [vmem:[#allocation2 + $0xf8] ss:$2 sm:$0xff]  ;;  %v7017_v41 = vld [vmem:[#allocation2 + $0x108] ss:$2 sm:$0xff]  ;;  %v7082_v33 = vpack.c.bf16 %v7075_v51, %v7074_v59  ;;  %v7070_v61 = vadd.f32 %v7059_v48, %v7058_v62 }
 0x2ee   : > { %13329 = vst [vmem:[#allocation44_spill] sm:$0xff] %v11893_v38  ;;  %v11896_v1 = vadd.f32 %v4474_v26, %v4265_v15  ;;  %v4281_v0 = vpop.f32.mrf.mxu1  ;;  %v7057_v38 = vadd.f32 %v7033_v16, %v7001_v18  ;;  %v7011_v18 = vld [vmem:[#allocation2 + $0xd8] ss:$2 sm:$0xff]  ;;  %v7049_v16 = vld [vmem:[#allocation2 + $0x109] ss:$2 sm:$0xff] }
 0x2ef   : > { %v7071_v52 = vadd.f32 %v7061_v63, %v7060_v8  ;;  %v7065_v59 = vadd.f32 %v7049_v16, %v7017_v41 }
 0x2f0   : > { %v8754_v60 = vpop.f32.mrf.mxu0  ;;  %9041 = vmatmul.mubr.bf16.gmra.mxu0 %v6221_v54  ;;  %v8710_v58 = vpop.f32.mrf.mxu1  ;;  %8997 = vmatmul.mubr.msk.bf16.gmra.mxu1 %vm11341_vm8, %v7797_v2  ;;  %v7069_v14 = vadd.f32 %v7057_v38, %v7056_v49  ;;  %v6223_v2 = vpack.c.bf16 %v9205_v36, %v9205_v36  ;;  %v6486_v38 = vld [vmem:[#allocation3 + $0x49] sm:$0xff]  ;;  %v6491_v36 = vld [vmem:[#allocation3 + $0x71] sm:$0xff] }
 0x2f1   : > { %v11898_v6 = vadd.f32 %v8754_v60, %v8706_v24  ;;  %9044 = vmatprep.mubr.bf16.mxu0 %v6222_v57  ;;  %9064 = vmatprep.mubr.msk.bf16.mxu1 %vm13297_vm15, %v7848_v28  ;;  %v7068_v24 = vadd.f32 %v7055_v53, %v7054_v30  ;;  %v7013_v57 = vld [vmem:[#allocation2 + $0xe8] ss:$2 sm:$0xff]  ;;  %v7851_v30 = vpack.c.bf16 %v6485_v21, %v6484_v11  ;;  %v7079_v51 = vmul.f32 0.25, %v7071_v52 }
 0x2f2   : > { %v4487_v15 = vpop.f32.mrf.mxu0  ;;  %v4294_v37 = vpop.f32.mrf.mxu1  ;;  %v7854_v26 = vpack.c.bf16 %v6487_v44, %v6486_v38  ;;  %v7077_v53 = vmul.f32 0.25, %v7069_v14  ;;  %v7064_v28 = vadd.f32 %v7047_v29, %v7015_v35  ;;  %v6488_v44 = vld [vmem:[#allocation3 + $0x59] sm:$0xff] }
 0x2f3   : > { %v11904_v13 = vadd.f32 %v4487_v15, %v4278_v46  ;;  %v7045_v46 = vld [vmem:[#allocation2 + $0xe9] ss:$2 sm:$0xff]  ;;  %v7076_v54 = vmul.f32 0.25, %v7068_v24 }
 0x2f4   : > { %v8755_v50 = vpop.f32.mrf.mxu0  ;;  %v8711_v56 = vpop.f32.mrf.mxu1  ;;  %v7063_v60 = vadd.f32 %v7045_v46, %v7013_v57  ;;  %v6489_v24 = vld [vmem:[#allocation3 + $0x61] sm:$0xff] }
 0x2f5   : > { %v11906_v20 = vadd.f32 %v8755_v50, %v8707_v19  ;;  %v7062_v19 = vadd.f32 %v7043_v25, %v7011_v18  ;;  %v7083_v10 = vpack.c.bf16 %v7077_v53, %v7076_v54  ;;  %v7073_v18 = vadd.f32 %v7065_v59, %v7064_v28  ;;  %v6490_v25 = vld [vmem:[#allocation3 + $0x69] sm:$0xff] }
 0x2f6   : > { %v4490_v4 = vpop.f32.mrf.mxu0  ;;  %v4297_v40 = vpop.f32.mrf.mxu1  ;;  %v7857_v41 = vpack.c.bf16 %v6489_v24, %v6488_v44  ;;  %v6494_v59 = vld [vmem:[#allocation3 + $0x89] sm:$0xff]  ;;  %v6496_v44 = vld [vmem:[#allocation3 + $0x99] sm:$0xff]  ;;  %v6497_v24 = vld [vmem:[#allocation3 + $0xa1] sm:$0xff] }
 0x2f7   : > { %v11908_v12 = vadd.f32 %v4490_v4, %v4281_v0  ;;  %v7078_v0 = vmul.f32 0.25, %v7070_v61  ;;  %v7072_v14 = vadd.f32 %v7063_v60, %v7062_v19  ;;  %v7860_v61 = vpack.c.bf16 %v6491_v36, %v6490_v25  ;;  %v13335_v25 = vld [vmem:[#allocation14_spill] sm:$0xff] }
 0x2f8   : > { %v8758_v49 = vpop.f32.mrf.mxu0  ;;  %9045 = vmatmul.mubr.bf16.gmra.mxu0 %v6223_v2  ;;  %v8778_v48 = vpop.f32.mrf.mxu1  ;;  %9065 = vmatmul.mubr.msk.bf16.vlgmr.msra.gmra.mxu1 %vm11350_vm0, %v7851_v30  ;;  %vm13331_vm0 = vmmov %vm13330_vm11 }
 0x2f9   : > { %v11910_v62 = vadd.f32 %v8758_v49, %v8710_v58  ;;  %9098 = vmatprep.mubr.msk.bf16.mxu0 %vm13330_vm11, %v7082_v33  ;;  %v4826_v63 = vadd.f32 %v8778_v48, %v11801_v42  ;;  %9068 = vmatprep.mubr.msk.bf16.mxu1 %vm13298_vm12, %v7854_v26  ;;  %v7084_v2 = vpack.c.bf16 %v7079_v51, %v7078_v0  ;;  %v7080_v52 = vmul.f32 0.25, %v7072_v14  ;;  %vm13332_vm8 = vmmov %vm13331_vm0  ;;  %v6493_v26 = vld [vmem:[#allocation3 + $0x81] sm:$0xff]  ;;  %v6495_v49 = vld [vmem:[#allocation3 + $0x91] sm:$0xff] }
 0x2fa   : > { %v4503_v8 = vpop.f32.mrf.mxu0  ;;  %v4697_v11 = vpop.f32.mrf.mxu1  ;;  %v7866_v51 = vpack.c.bf16 %v6495_v49, %v6494_v59  ;;  %v13342_v59 = vld [vmem:[#allocation35_spill] sm:$0xff] }
 0x2fb   : > { %v11918_v15 = vadd.f32 %v4503_v8, %v4294_v37  ;;  %v4824_v58 = vadd.f32 %v4697_v11, %v11808_v9 }
 0x2fc   : > { %v8759_v21 = vpop.f32.mrf.mxu0  ;;  %v8779_v50 = vpop.f32.mrf.mxu1 }
 0x2fd   : > { %v11921_v57 = vadd.f32 %v8759_v21, %v8711_v56  ;;  %v4827_v43 = vadd.f32 %v8779_v50, %v11813_v32  ;;  %v7081_v56 = vmul.f32 0.25, %v7073_v18  ;;  %v6499_v18 = vld [vmem:[#allocation3 + $0xb1] sm:$0xff] }
 0x2fe   : > { %v4506_v42 = vpop.f32.mrf.mxu0  ;;  %v4700_v37 = vpop.f32.mrf.mxu1 }
 0x2ff   : > { %v11924_v35 = vadd.f32 %v4506_v42, %v4297_v40  ;;  %v4825_v9 = vadd.f32 %v4700_v37, %v11815_v39  ;;  %v6492_v40 = vld [vmem:[#allocation3 + $0x79] sm:$0xff]  ;;  %v7085_v54 = vpack.c.bf16 %v7081_v56, %v7080_v52 }
 0x300   : > { %v8826_v33 = vpop.f32.mrf.mxu0  ;;  %9099 = vmatmul.mubr.msk.bf16.vlgmr.msra.gmra.mxu0 %vm13331_vm0, %v7083_v10  ;;  %v8782_v29 = vpop.f32.mrf.mxu1  ;;  %9069 = vmatmul.mubr.msk.bf16.gmra.mxu1 %vm11387_vm14, %v7857_v41  ;;  %v7863_v28 = vpack.c.bf16 %v6493_v26, %v6492_v40  ;;  %vm13334_vm14 = vnez %v13245_v22  ;;  %v7869_v22 = vpack.c.bf16 %v6497_v24, %v6496_v44  ;;  %v13338_v52 = vld [vmem:[#allocation17_spill] sm:$0xff] }
 0x301   : > { %v11928_v46 = vadd.f32 %v8826_v33, %v4826_v63  ;;  %9102 = vmatprep.mubr.msk.bf16.mxu0 %vm13332_vm8, %v7084_v2  ;;  %v4830_v16 = vadd.f32 %v8782_v29, %v11821_v7  ;;  %9072 = vmatprep.mubr.msk.bf16.mxu1 %vm11396_vm6, %v7860_v61  ;;  %vm13333_vm6 = vmmov %vm13331_vm0  ;;  %v6498_v2 = vld [vmem:[#allocation3 + $0xa9] sm:$0xff]  ;;  %vm13339_vm5 = vnez %v13338_v52  ;;  %v6503_v40 = vld [vmem:[#allocation3 + $0xd1] sm:$0xff] }
 0x302   : > { %v5035_v32 = vpop.f32.mrf.mxu0  ;;  %v4713_v4 = vpop.f32.mrf.mxu1  ;;  %v7872_v37 = vpack.c.bf16 %v6499_v18, %v6498_v2  ;;  %v13347_v18 = vld [vmem:[#allocation39_spill] sm:$0xff] }
 0x303   : > { %v11936_v39 = vadd.f32 %v5035_v32, %v4824_v58  ;;  %v4828_v38 = vadd.f32 %v4713_v4, %v11828_v27  ;;  %v13340_v32 = vld [vmem:[#allocation91_spill] sm:$0xff] }
 0x304   : > { %v8827_v30 = vpop.f32.mrf.mxu0  ;;  %v8783_v5 = vpop.f32.mrf.mxu1  ;;  %v6501_v4 = vld [vmem:[#allocation3 + $0xc1] sm:$0xff] }
 0x305   : > { %v11939_v53 = vadd.f32 %v8827_v30, %v4827_v43  ;;  %v4831_v60 = vadd.f32 %v8783_v5, %v11833_v45 }
 0x306   : > { %v5038_v19 = vpop.f32.mrf.mxu0  ;;  %v4716_v55 = vpop.f32.mrf.mxu1 }
 0x307   : > { %v11942_v7 = vadd.f32 %v5038_v19, %v4825_v9  ;;  %v4829_v0 = vadd.f32 %v4716_v55, %v11835_v17  ;;  %v13337_v9 = vld [vmem:[#allocation8_spill] sm:$0xff] }
 0x308   : > { %v8830_v48 = vpop.f32.mrf.mxu0  ;;  %9103 = vmatmul.mubr.msk.bf16.gmra.mxu0 %vm13333_vm6, %v7085_v54  ;;  %v8786_v8 = vpop.f32.mrf.mxu1  ;;  %9073 = vmatmul.mubr.msk.bf16.gmra.mxu1 %vm11430_vm10, %v7863_v28  ;;  %vm13336_vm10 = vnez %v13335_v25  ;;  %v13341_v54 = vld [vmem:[#allocation100_spill] sm:$0xff] }
 0x309   : > { %v11946_v27 = vadd.f32 %v8830_v48, %v4830_v16  ;;  %v4834_v45 = vadd.f32 %v8786_v8, %v11841_v23  ;;  %9076 = vmatprep.mubr.msk.bf16.mxu1 %vm13334_vm14, %v7866_v51  ;;  %v6502_v55 = vld [vmem:[#allocation3 + $0xc9] sm:$0xff] }
 0x30a   : > { %v5051_v63 = vpop.f32.mrf.mxu0  ;;  %v4729_v21 = vpop.f32.mrf.mxu1 }
 0x30b   : > { %v11953_v11 = vadd.f32 %v5051_v63, %v4828_v38  ;;  %v4832_v17 = vadd.f32 %v4729_v21, %v11848_v34  ;;  %v13343_v63 = vld [vmem:[#allocation20_spill] sm:$0xff]  ;;  %v13345_v21 = vld [vmem:[#allocation27_spill] sm:$0xff] }
 0x30c   : > { %v8831_v58 = vpop.f32.mrf.mxu0  ;;  %v8787_v14 = vpop.f32.mrf.mxu1  ;;  %vm13344_vm15 = vnez %v13343_v63 }
 0x30d   : > { %v11956_v10 = vadd.f32 %v8831_v58, %v4831_v60  ;;  %v4835_v50 = vadd.f32 %v8787_v14, %v11850_v47 }
 0x30e   : > { %v5054_v3 = vpop.f32.mrf.mxu0  ;;  %v4732_v23 = vpop.f32.mrf.mxu1 }
 0x30f   : > { %v11959_v36 = vadd.f32 %v5054_v3, %v4829_v0  ;;  %v4833_v43 = vadd.f32 %v4732_v23, %v11852_v31  ;;  %v6500_v31 = vld [vmem:[#allocation3 + $0xb9] sm:$0xff]  ;;  %v7878_v0 = vpack.c.bf16 %v6503_v40, %v6502_v55  ;;  %v6505_v23 = vld [vmem:[#allocation3 + $0xe1] sm:$0xff] }
 0x310   : > { %v8834_v42 = vpop.f32.mrf.mxu0  ;;  %v8790_v34 = vpop.f32.mrf.mxu1  ;;  %9077 = vmatmul.mubr.msk.bf16.gmra.mxu1 %vm13336_vm10, %v7869_v22  ;;  %v7875_v60 = vpack.c.bf16 %v6501_v4, %v6500_v31  ;;  %v13351_v40 = vld [vmem:[#allocation102_spill] sm:$0xff] }
 0x311   : > { %v11962_v41 = vadd.f32 %v8834_v42, %v4834_v45  ;;  %v4838_v61 = vadd.f32 %v8790_v34, %v13337_v9  ;;  %9080 = vmatprep.mubr.msk.bf16.mxu1 %vm13339_vm5, %v7872_v37  ;;  %v6507_v42 = vld [vmem:[#allocation3 + $0xf1] sm:$0xff]  ;;  %v13353_v55 = vld [vmem:[#allocation6_spill] sm:$0xff] }
 0x312   : > { %v5067_v33 = vpop.f32.mrf.mxu0  ;;  %v4745_v56 = vpop.f32.mrf.mxu1  ;;  %v13348_v37 = vld [vmem:[#allocation13_spill] sm:$0xff] }
 0x313   : > { %v11969_v47 = vadd.f32 %v5067_v33, %v4832_v17  ;;  %v4836_v16 = vadd.f32 %v4745_v56, %v13340_v32  ;;  %v13349_v56 = vld [vmem:[#allocation92_spill] sm:$0xff] }
 0x314   : > { %v8835_v29 = vpop.f32.mrf.mxu0  ;;  %v8791_v38 = vpop.f32.mrf.mxu1 }
 0x315   : > { %v11972_v30 = vadd.f32 %v8835_v29, %v4835_v50  ;;  %v4839_v5 = vadd.f32 %v8791_v38, %v13341_v54  ;;  %v6504_v50 = vld [vmem:[#allocation3 + $0xd9] sm:$0xff] }
 0x316   : > { %v5070_v26 = vpop.f32.mrf.mxu0  ;;  %v4748_v19 = vpop.f32.mrf.mxu1  ;;  %v7881_v9 = vpack.c.bf16 %v6505_v23, %v6504_v50 }
 0x317   : > { %v11975_v49 = vadd.f32 %v5070_v26, %v4833_v43  ;;  %v4837_v48 = vadd.f32 %v4748_v19, %v13342_v59  ;;  %v6508_v59 = vld [vmem:[#allocation3 + $0xf9] sm:$0xff] }
 0x318   : > { %v8838_v28 = vpop.f32.mrf.mxu0  ;;  %v8794_v8 = vpop.f32.mrf.mxu1  ;;  %9081 = vmatmul.mubr.msk.bf16.gmra.mxu1 %vm13344_vm15, %v7875_v60 }
 0x319   : > { %v11978_v51 = vadd.f32 %v8838_v28, %v4838_v61  ;;  %v4842_v58 = vadd.f32 %v8794_v8, %v13345_v21  ;;  %9084 = vmatprep.mubr.msk.bf16.mxu1 %vm13300_vm3, %v7878_v0  ;;  %v6506_v61 = vld [vmem:[#allocation3 + $0xe9] sm:$0xff] }
 0x31a   : > { %v5083_v45 = vpop.f32.mrf.mxu0  ;;  %v4761_v24 = vpop.f32.mrf.mxu1  ;;  %v7884_v32 = vpack.c.bf16 %v6507_v42, %v6506_v61 }
 0x31b   : > { %v11985_v44 = vadd.f32 %v5083_v45, %v4836_v16  ;;  %v4840_v3 = vadd.f32 %v4761_v24, %v13347_v18  ;;  %v13354_v45 = vld [vmem:[#allocation44_spill] sm:$0xff] }
 0x31c   : > { %v8839_v14 = vpop.f32.mrf.mxu0  ;;  %v8795_v2 = vpop.f32.mrf.mxu1 }
 0x31d   : > { %v11988_v22 = vadd.f32 %v8839_v14, %v4839_v5  ;;  %v4843_v34 = vadd.f32 %v8795_v2, %v13348_v37  ;;  %v13357_v37 = vld [vmem:[#allocation98_spill] sm:$0xff] }
 0x31e   : > { %v5086_v43 = vpop.f32.mrf.mxu0  ;;  %v4764_v33 = vpop.f32.mrf.mxu1 }
 0x31f   : > { %v11991_v25 = vadd.f32 %v5086_v43, %v4837_v48  ;;  %v4841_v29 = vadd.f32 %v4764_v33, %v13349_v56  ;;  %v6509_v48 = vld [vmem:[#allocation3 + $0x101] sm:$0xff] }
 0x320   : > { %v8842_v52 = vpop.f32.mrf.mxu0  ;;  %v8798_v31 = vpop.f32.mrf.mxu1  ;;  %9085 = vmatmul.mubr.msk.bf16.gmra.mxu1 %vm13301_vm1, %v7881_v9  ;;  %v7887_v24 = vpack.c.bf16 %v6509_v48, %v6508_v59  ;;  %v13356_v43 = vld [vmem:[#allocation22_spill] sm:$0xff]  ;;  %vm13358_vm1 = vnez %v13357_v37 }
 0x321   : > { %v11994_v16 = vadd.f32 %v8842_v52, %v4842_v58  ;;  %v4846_v26 = vadd.f32 %v8798_v31, %v13351_v40  ;;  %9088 = vmatprep.mubr.msk.bf16.mxu1 %vm13302_vm13, %v7884_v32  ;;  %v6513_v33 = vld [vmem:[#allocation3 + $0x121] sm:$0xff] }
 0x322   : > { %v5099_v38 = vpop.f32.mrf.mxu0  ;;  %v4777_v19 = vpop.f32.mrf.mxu1 }
 0x323   : > { %v12001_v5 = vadd.f32 %v5099_v38, %v4840_v3  ;;  %v4844_v28 = vadd.f32 %v4777_v19, %v13353_v55 }
 0x324   : > { %v8843_v60 = vpop.f32.mrf.mxu0  ;;  %v8799_v8 = vpop.f32.mrf.mxu1 }
 0x325   : > { %v12004_v0 = vadd.f32 %v8843_v60, %v4843_v34  ;;  %v4847_v21 = vadd.f32 %v8799_v8, %v13354_v45  ;;  %v6512_v34 = vld [vmem:[#allocation3 + $0x119] sm:$0xff]  ;;  %v13359_v60 = vld [vmem:[#allocation60_spill] sm:$0xff] }
 0x326   : > { %v5102_v63 = vpop.f32.mrf.mxu0  ;;  %v4780_v17 = vpop.f32.mrf.mxu1  ;;  %v7893_v32 = vpack.c.bf16 %v6513_v33, %v6512_v34 }
 0x327   : > { %v12007_v58 = vadd.f32 %v5102_v63, %v4841_v29  ;;  %v4845_v18 = vadd.f32 %v4780_v17, %v11896_v1 }
 0x328   : > { %v8846_v14 = vpop.f32.mrf.mxu0  ;;  %v8802_v50 = vpop.f32.mrf.mxu1  ;;  %9089 = vmatmul.mubr.msk.bf16.gmra.mxu1 %vm11586_vm4, %v7887_v24  ;;  %vm13360_vm4 = vnez %v13359_v60 }
 0x329   : > { %v12010_v3 = vadd.f32 %v8846_v14, %v4846_v26  ;;  %v4850_v42 = vadd.f32 %v8802_v50, %v11898_v6  ;;  %9092 = vmatprep.mubr.msk.bf16.mxu1 %vm13358_vm1, %v13356_v43 }
 0x32a   : > { %v5115_v2 = vpop.f32.mrf.mxu0  ;;  %v4793_v61 = vpop.f32.mrf.mxu1 }
 0x32b   : > { %v12018_v9 = vadd.f32 %v5115_v2, %v4844_v28  ;;  %v4848_v1 = vadd.f32 %v4793_v61, %v11904_v13 }
 0x32c   : > { %v8847_v52 = vpop.f32.mrf.mxu0  ;;  %v8803_v29 = vpop.f32.mrf.mxu1 }
 0x32d   : > { %v12021_v56 = vadd.f32 %v8847_v52, %v4847_v21  ;;  %v4851_v4 = vadd.f32 %v8803_v29, %v11906_v20 }
 0x32e   : > { %v5118_v31 = vpop.f32.mrf.mxu0  ;;  %v4796_v38 = vpop.f32.mrf.mxu1 }
 0x32f   : > { %v12024_v6 = vadd.f32 %v5118_v31, %v4845_v18  ;;  %v4849_v26 = vadd.f32 %v4796_v38, %v11908_v12 }
 0x330   : > { %v8850_v40 = vpop.f32.mrf.mxu0  ;;  %v8806_v19 = vpop.f32.mrf.mxu1  ;;  %9093 = vmatmul.mubr.msk.bf16.gmra.mxu1 %vm13360_vm4, %v7893_v32 }
 0x331   : > { %v12027_v54 = vadd.f32 %v8850_v40, %v4850_v42  ;;  %v4854_v55 = vadd.f32 %v8806_v19, %v11910_v62 }
 0x332   : > { %v5131_v13 = vpop.f32.mrf.mxu0  ;;  %v4809_v59 = vpop.f32.mrf.mxu1 }
 0x333   : > { %v12032_v28 = vadd.f32 %v5131_v13, %v4848_v1  ;;  %v4852_v20 = vadd.f32 %v4809_v59, %v11918_v15 }
 0x334   : > { %v8851_v48 = vpop.f32.mrf.mxu0  ;;  %v8807_v63 = vpop.f32.mrf.mxu1 }
 0x335   : > { %v12035_v8 = vadd.f32 %v8851_v48, %v4851_v4  ;;  %v4855_v12 = vadd.f32 %v8807_v63, %v11921_v57 }
 0x336   : > { %v5134_v45 = vpop.f32.mrf.mxu0  ;;  %v4812_v17 = vpop.f32.mrf.mxu1 }
 0x337   : > { %v12038_v21 = vadd.f32 %v5134_v45, %v4849_v26  ;;  %v4853_v14 = vadd.f32 %v4812_v17, %v11924_v35 }
 0x338   : > { %v8854_v24 = vpop.f32.mrf.mxu0  ;;  %v8874_v62 = vpop.f32.mrf.mxu1 }
 0x339   : > { %v12041_v18 = vadd.f32 %v8854_v24, %v4854_v55  ;;  %v5470_v23 = vadd.f32 %v8874_v62, %v11928_v46 }
 0x33a   : > { %v5147_v50 = vpop.f32.mrf.mxu0  ;;  %v5341_v15 = vpop.f32.mrf.mxu1 }
 0x33b   : > { %v12044_v2 = vadd.f32 %v5147_v50, %v4852_v20  ;;  %v5468_v43 = vadd.f32 %v5341_v15, %v11936_v39 }
 0x33c   : > { %v8855_v42 = vpop.f32.mrf.mxu0  ;;  %v8875_v57 = vpop.f32.mrf.mxu1 }
 0x33d   : > { %v12047_v37 = vadd.f32 %v8855_v42, %v4855_v12  ;;  %v5471_v33 = vadd.f32 %v8875_v57, %v11939_v53 }
 0x33e   : > { %v5150_v34 = vpop.f32.mrf.mxu0  ;;  %v5344_v35 = vpop.f32.mrf.mxu1 }
 0x33f   : > { %v12050_v61 = vadd.f32 %v5150_v34, %v4853_v14  ;;  %v5469_v1 = vadd.f32 %v5344_v35, %v11942_v7 }
 0x340   : > { %v8922_v52 = vpop.f32.mrf.mxu0  ;;  %v8878_v46 = vpop.f32.mrf.mxu1 }
 0x341   : > { %v12053_v29 = vadd.f32 %v8922_v52, %v5470_v23  ;;  %v5474_v31 = vadd.f32 %v8878_v46, %v11946_v27 }
 0x342   : > { %v5679_v32 = vpop.f32.mrf.mxu0  ;;  %v5357_v39 = vpop.f32.mrf.mxu1 }
 0x343   : > { %v12056_v4 = vadd.f32 %v5679_v32, %v5468_v43  ;;  %v5472_v40 = vadd.f32 %v5357_v39, %v11953_v11 }
 0x344   : > { %v8923_v38 = vpop.f32.mrf.mxu0  ;;  %v8879_v53 = vpop.f32.mrf.mxu1 }
 0x345   : > { %v12059_v26 = vadd.f32 %v8923_v38, %v5471_v33  ;;  %v5475_v60 = vadd.f32 %v8879_v53, %v11956_v10 }
 0x346   : > { %v5682_v19 = vpop.f32.mrf.mxu0  ;;  %v5360_v7 = vpop.f32.mrf.mxu1 }
 0x347   : > { %v12062_v13 = vadd.f32 %v5682_v19, %v5469_v1  ;;  %v5473_v59 = vadd.f32 %v5360_v7, %v11959_v36 }
 0x348   : > { %v8926_v55 = vpop.f32.mrf.mxu0  ;;  %v8882_v27 = vpop.f32.mrf.mxu1 }
 0x349   : > { %v12065_v48 = vadd.f32 %v8926_v55, %v5474_v31  ;;  %v5478_v63 = vadd.f32 %v8882_v27, %v11962_v41 }
 0x34a   : > { %v5695_v20 = vpop.f32.mrf.mxu0  ;;  %v5373_v11 = vpop.f32.mrf.mxu1 }
 0x34b   : > { %v12068_v45 = vadd.f32 %v5695_v20, %v5472_v40  ;;  %v5476_v17 = vadd.f32 %v5373_v11, %v11969_v47 }
 0x34c   : > { %v8927_v12 = vpop.f32.mrf.mxu0  ;;  %v8883_v10 = vpop.f32.mrf.mxu1 }
 0x34d   : > { %v12071_v24 = vadd.f32 %v8927_v12, %v5475_v60  ;;  %v5479_v62 = vadd.f32 %v8883_v10, %v11972_v30 }
 0x34e   : > { %v5698_v14 = vpop.f32.mrf.mxu0  ;;  %v5376_v36 = vpop.f32.mrf.mxu1 }
 0x34f   : > { %v12074_v50 = vadd.f32 %v5698_v14, %v5473_v59  ;;  %v5477_v15 = vadd.f32 %v5376_v36, %v11975_v49 }
 0x350   : > { %v8930_v23 = vpop.f32.mrf.mxu0  ;;  %v8886_v41 = vpop.f32.mrf.mxu1 }
 0x351   : > { %v12077_v42 = vadd.f32 %v8930_v23, %v5478_v63  ;;  %v5482_v57 = vadd.f32 %v8886_v41, %v11978_v51 }
 0x352   : > { %v5711_v43 = vpop.f32.mrf.mxu0  ;;  %v5389_v47 = vpop.f32.mrf.mxu1 }
 0x353   : > { %v12080_v34 = vadd.f32 %v5711_v43, %v5476_v17  ;;  %v5480_v35 = vadd.f32 %v5389_v47, %v11985_v44 }
 0x354   : > { %v8931_v33 = vpop.f32.mrf.mxu0  ;;  %v8887_v30 = vpop.f32.mrf.mxu1 }
 0x355   : > { %v12083_v52 = vadd.f32 %v8931_v33, %v5479_v62  ;;  %v5483_v46 = vadd.f32 %v8887_v30, %v11988_v22 }
 0x356   : > { %v5714_v1 = vpop.f32.mrf.mxu0  ;;  %v5392_v49 = vpop.f32.mrf.mxu1 }
 0x357   : > { %v12086_v32 = vadd.f32 %v5714_v1, %v5477_v15  ;;  %v5481_v39 = vadd.f32 %v5392_v49, %v11991_v25 }
 0x358   : > { %v8934_v31 = vpop.f32.mrf.mxu0  ;;  %v8890_v51 = vpop.f32.mrf.mxu1 }
 0x359   : > { %v12089_v38 = vadd.f32 %v8934_v31, %v5482_v57  ;;  %v5486_v53 = vadd.f32 %v8890_v51, %v11994_v16 }
 0x35a   : > { %v5727_v40 = vpop.f32.mrf.mxu0  ;;  %v5405_v44 = vpop.f32.mrf.mxu1 }
 0x35b   : > { %v12092_v19 = vadd.f32 %v5727_v40, %v5480_v35  ;;  %v5484_v7 = vadd.f32 %v5405_v44, %v12001_v5 }
 0x35c   : > { %v8935_v60 = vpop.f32.mrf.mxu0  ;;  %v8891_v22 = vpop.f32.mrf.mxu1 }
 0x35d   : > { %v12095_v55 = vadd.f32 %v8935_v60, %v5483_v46  ;;  %v5487_v27 = vadd.f32 %v8891_v22, %v12004_v0 }
 0x35e   : > { %v5730_v59 = vpop.f32.mrf.mxu0  ;;  %v5408_v25 = vpop.f32.mrf.mxu1 }
 0x35f   : > { %v12098_v20 = vadd.f32 %v5730_v59, %v5481_v39  ;;  %v5485_v11 = vadd.f32 %v5408_v25, %v12007_v58 }
 0x360   : > { %v8938_v63 = vpop.f32.mrf.mxu0  ;;  %v8894_v16 = vpop.f32.mrf.mxu1 }
 0x361   : > { %v12101_v12 = vadd.f32 %v8938_v63, %v5486_v53  ;;  %v5490_v10 = vadd.f32 %v8894_v16, %v12010_v3 }
 0x362   : > { %v5743_v17 = vpop.f32.mrf.mxu0  ;;  %v5421_v5 = vpop.f32.mrf.mxu1 }
 0x363   : > { %v12104_v14 = vadd.f32 %v5743_v17, %v5484_v7  ;;  %v5488_v36 = vadd.f32 %v5421_v5, %v12018_v9 }
 0x364   : > { %v8939_v62 = vpop.f32.mrf.mxu0  ;;  %v8895_v0 = vpop.f32.mrf.mxu1 }
 0x365   : > { %v12107_v23 = vadd.f32 %v8939_v62, %v5487_v27  ;;  %v5491_v41 = vadd.f32 %v8895_v0, %v12021_v56 }
 0x366   : > { %v5746_v15 = vpop.f32.mrf.mxu0  ;;  %v5424_v58 = vpop.f32.mrf.mxu1 }
 0x367   : > { %13361 = vst [vmem:[#allocation43_spill] sm:$0xff] %v12107_v23  ;;  %v12110_v43 = vadd.f32 %v5746_v15, %v5485_v11  ;;  %v5489_v47 = vadd.f32 %v5424_v58, %v12024_v6 }
 0x368   : > { %v8942_v57 = vpop.f32.mrf.mxu0  ;;  %v8898_v3 = vpop.f32.mrf.mxu1 }
 0x369   : > { %13362 = vst [vmem:[#allocation15_spill] sm:$0xff] %v12110_v43  ;;  %v12113_v33 = vadd.f32 %v8942_v57, %v5490_v10  ;;  %v5494_v30 = vadd.f32 %v8898_v3, %v12027_v54 }
 0x36a   : > { %v5759_v35 = vpop.f32.mrf.mxu0  ;;  %v5437_v9 = vpop.f32.mrf.mxu1 }
 0x36b   : > { %13363 = vst [vmem:[#allocation93_spill] sm:$0xff] %v12113_v33  ;;  %v12116_v1 = vadd.f32 %v5759_v35, %v5488_v36  ;;  %v5492_v49 = vadd.f32 %v5437_v9, %v12032_v28 }
 0x36c   : > { %v8943_v46 = vpop.f32.mrf.mxu0  ;;  %v8899_v56 = vpop.f32.mrf.mxu1 }
 0x36d   : > { %13364 = vst [vmem:[#allocation105_spill] sm:$0xff] %v12116_v1  ;;  %v12119_v31 = vadd.f32 %v8943_v46, %v5491_v41  ;;  %v5495_v51 = vadd.f32 %v8899_v56, %v12035_v8 }
 0x36e   : > { %v5762_v39 = vpop.f32.mrf.mxu0  ;;  %v5440_v6 = vpop.f32.mrf.mxu1 }
 0x36f   : > { %13365 = vst [vmem:[#allocation7_spill] sm:$0xff] %v12119_v31  ;;  %v12122_v40 = vadd.f32 %v5762_v39, %v5489_v47  ;;  %v5493_v44 = vadd.f32 %v5440_v6, %v12038_v21 }
 0x370   : > { %v8946_v53 = vpop.f32.mrf.mxu0  ;;  %v8902_v54 = vpop.f32.mrf.mxu1 }
 0x371   : > { %13366 = vst [vmem:[#allocation32_spill] sm:$0xff] %v12122_v40  ;;  %v12125_v60 = vadd.f32 %v8946_v53, %v5494_v30  ;;  %v5498_v22 = vadd.f32 %v8902_v54, %v12041_v18 }
 0x372   : > { %v5775_v7 = vpop.f32.mrf.mxu0  ;;  %v5453_v28 = vpop.f32.mrf.mxu1 }
 0x373   : > { %13367 = vst [vmem:[#allocation62_spill] sm:$0xff] %v12125_v60  ;;  %v12128_v59 = vadd.f32 %v5775_v7, %v5492_v49  ;;  %v5496_v25 = vadd.f32 %v5453_v28, %v12044_v2 }
 0x374   : > { %v8947_v27 = vpop.f32.mrf.mxu0  ;;  %v8903_v8 = vpop.f32.mrf.mxu1 }
 0x375   : > { %13368 = vst [vmem:[#allocation94_spill] sm:$0xff] %v12128_v59  ;;  %v12131_v63 = vadd.f32 %v8947_v27, %v5495_v51  ;;  %v5499_v16 = vadd.f32 %v8903_v8, %v12047_v37 }
 0x376   : > { %v5778_v11 = vpop.f32.mrf.mxu0  ;;  %v5456_v21 = vpop.f32.mrf.mxu1 }
 0x377   : > { %13369 = vst [vmem:[#allocation5_spill] sm:$0xff] %v12131_v63  ;;  %v12134_v17 = vadd.f32 %v5778_v11, %v5493_v44  ;;  %v5497_v5 = vadd.f32 %v5456_v21, %v12050_v61 }
 0x378   : > { %v8950_v10 = vpop.f32.mrf.mxu0  ;;  %v12139_v18 = vpop.f32.mrf.mxu1 }
 0x379   : > { %13370 = vst [vmem:[#allocation23_spill] sm:$0xff] %v12134_v17  ;;  %v12137_v62 = vadd.f32 %v8950_v10, %v5498_v22 }
 0x37a   : > { %v5791_v36 = vpop.f32.mrf.mxu0  ;;  %v12143_v2 = vpop.f32.mrf.mxu1 }
 0x37b   : > { %13371 = vst [vmem:[#allocation95_spill] sm:$0xff] %v12137_v62  ;;  %v12141_v0 = vadd.f32 %v5791_v36, %v5496_v25 }
 0x37c   : > { %v8951_v15 = vpop.f32.mrf.mxu0  ;;  %v12147_v58 = vpop.f32.mrf.mxu1 }
 0x37d   : > { %13372 = vst [vmem:[#allocation110_spill] sm:$0xff] %v12141_v0  ;;  %v12145_v41 = vadd.f32 %v8951_v15, %v5499_v16 }
 0x37e   : > { %v5794_v37 = vpop.f32.mrf.mxu0  ;;  %v12151_v47 = vpop.f32.mrf.mxu1 }
 0x37f   : > { %13373 = vst [vmem:[#allocation50_spill] sm:$0xff] %v12145_v41  ;;  %v12149_v57 = vadd.f32 %v5794_v37, %v5497_v5 }
 0x380   : > { %v9018_v61 = vpop.f32.mrf.mxu0  ;;  %v12153_v3 = vpop.f32.mrf.mxu1 }
 0x381   : > { %13374 = vst [vmem:[#allocation64_spill] sm:$0xff] %v12149_v57 }
 0x382   : > { %v6323_v35 = vpop.f32.mrf.mxu0  ;;  %v12155_v30 = vpop.f32.mrf.mxu1 }
 0x384   : > { %v9019_v9 = vpop.f32.mrf.mxu0  ;;  %v12157_v46 = vpop.f32.mrf.mxu1 }
 0x386   : > { %v12159_v49 = vpop.f32.mrf.mxu0  ;;  %v12161_v56 = vpop.f32.mrf.mxu1 }
 0x388   : > { %v12163_v39 = vpop.f32.mrf.mxu0  ;;  %v12165_v51 = vpop.f32.mrf.mxu1 }
 0x38a   : > { %v12167_v6 = vpop.f32.mrf.mxu0  ;;  %v12169_v53 = vpop.f32.mrf.mxu1 }
 0x38c   : > { %v12171_v44 = vpop.f32.mrf.mxu0  ;;  %v12173_v54 = vpop.f32.mrf.mxu1 }
 0x38e   : > { %v12175_v7 = vpop.f32.mrf.mxu0  ;;  %v12177_v22 = vpop.f32.mrf.mxu1 }
 0x390   : > { %v12179_v28 = vpop.f32.mrf.mxu0  ;;  %v12181_v27 = vpop.f32.mrf.mxu1 }
 0x392   : > { %v12183_v25 = vpop.f32.mrf.mxu0  ;;  %v12185_v8 = vpop.f32.mrf.mxu1 }
 0x394   : > { %v12187_v11 = vpop.f32.mrf.mxu0  ;;  %v12189_v16 = vpop.f32.mrf.mxu1 }
 0x396   : > { %v12191_v21 = vpop.f32.mrf.mxu0  ;;  %v12193_v10 = vpop.f32.mrf.mxu1 }
 0x398   : > { %v12195_v5 = vpop.f32.mrf.mxu0  ;;  %v12197_v36 = vpop.f32.mrf.mxu1 }
 0x39a   : > { %v12199_v15 = vpop.f32.mrf.mxu0  ;;  %v12201_v37 = vpop.f32.mrf.mxu1 }
 0x39c   : > { %v12203_v57 = vpop.f32.mrf.mxu0  ;;  %v12205_v41 = vpop.f32.mrf.mxu1 }
 0x39d   : > { %13375 = vst [vmem:[#allocation96_spill] sm:$0xff] %v12205_v41 }
 0x39e   : > { %v12207_v0 = vpop.f32.mrf.mxu0  ;;  %v12209_v62 = vpop.f32.mrf.mxu1 }
 0x39f   : > { %13376 = vst [vmem:[#allocation113_spill] sm:$0xff] %v12209_v62 }
 0x3a0   : > { %v12211_v17 = vpop.f32.mrf.mxu0  ;;  %v12213_v63 = vpop.f32.mrf.mxu1 }
 0x3a1   : > { %13377 = vst [vmem:[#allocation48_spill] sm:$0xff] %v12213_v63 }
 0x3a2   : > { %v12215_v59 = vpop.f32.mrf.mxu0  ;;  %v12217_v60 = vpop.f32.mrf.mxu1 }
 0x3a3   : > { %13378 = vst [vmem:[#allocation10_spill] sm:$0xff] %v12215_v59  ;;  %13379 = vst [vmem:[#allocation37_spill] sm:$0xff] %v12217_v60 }
 0x3a4   : > { %v12219_v40 = vpop.f32.mrf.mxu0  ;;  %v12221_v31 = vpop.f32.mrf.mxu1 }
 0x3a5   : > { %13380 = vst [vmem:[#allocation40_spill] sm:$0xff] %v12219_v40  ;;  %13381 = vst [vmem:[#allocation51_spill] sm:$0xff] %v12221_v31 }
 0x3a6   : > { %v12223_v1 = vpop.f32.mrf.mxu0  ;;  %v12225_v33 = vpop.f32.mrf.mxu1 }
 0x3a7   : > { %13382 = vst [vmem:[#allocation67_spill] sm:$0xff] %v12223_v1  ;;  %13383 = vst [vmem:[#allocation97_spill] sm:$0xff] %v12225_v33 }
 0x3a8   : > { %v12227_v43 = vpop.f32.mrf.mxu0  ;;  %v12229_v41 = vpop.f32.mrf.mxu1 }
 0x3a9   : > { %13384 = vst [vmem:[#allocation116_spill] sm:$0xff] %v12227_v43  ;;  %13385 = vst [vmem:[#allocation12_spill] sm:$0xff] %v12229_v41 }
 0x3aa   : > { %v12231_v62 = vpop.f32.mrf.mxu0  ;;  %v12233_v23 = vpop.f32.mrf.mxu1 }
 0x3ab   : > { %13386 = vst [vmem:[#allocation99_spill] sm:$0xff] %v12231_v62  ;;  %13387 = vst [vmem:[#allocation63_spill] sm:$0xff] %v12233_v23  ;;  %v6146_v23 = vadd.f32 %v12139_v18, %v12053_v29  ;;  %v6147_v29 = vadd.f32 %v12147_v58, %v12059_v26 }
 0x3ac   : > { %v12235_v63 = vpop.f32.mrf.mxu0  ;;  %v12237_v59 = vpop.f32.mrf.mxu1 }
 0x3ad   : > { %13388 = vst [vmem:[#allocation49_spill] sm:$0xff] %v12237_v59 }
 0x3ae   : > { %v12239_v60 = vpop.f32.mrf.mxu0  ;;  %v12241_v40 = vpop.f32.mrf.mxu1 }
 0x3af   : > { %13389 = vst [vmem:[#allocation101_spill] sm:$0xff] %v12239_v60  ;;  %13390 = vst [vmem:[#allocation9_spill] sm:$0xff] %v12241_v40  ;;  %v6452_v40 = vadd.f32 %v9018_v61, %v6146_v23  ;;  %v6145_v23 = vadd.f32 %v12151_v47, %v12062_v13  ;;  %v6148_v13 = vadd.f32 %v12155_v30, %v12068_v45 }
 0x3b0   : > { %v12243_v31 = vpop.f32.mrf.mxu0  ;;  %v12245_v1 = vpop.f32.mrf.mxu1  ;;  %v6149_v45 = vadd.f32 %v12161_v56, %v12074_v50  ;;  %v6152_v56 = vadd.f32 %v12169_v53, %v12080_v34  ;;  %v6153_v34 = vadd.f32 %v12177_v22, %v12086_v32  ;;  %v6158_v32 = vadd.f32 %v12181_v27, %v12089_v38 }
 0x3b1   : > { %13391 = vst [vmem:[#allocation72_spill] sm:$0xff] %v12243_v31  ;;  %13392 = vst [vmem:[#allocation103_spill] sm:$0xff] %v12245_v1  ;;  %v6144_v31 = vadd.f32 %v12143_v2, %v12056_v4 }
 0x3b2   : > { %v12247_v33 = vpop.f32.mrf.mxu0  ;;  %v12249_v43 = vpop.f32.mrf.mxu1 }
 0x3b3   : > { %13393 = vst [vmem:[#allocation16_spill] sm:$0xff] %v12247_v33  ;;  %13394 = vst [vmem:[#allocation61_spill] sm:$0xff] %v12249_v43  ;;  %v12268_v43 = vld [vmem:[%s12440_s4] ss:$0 sm:$0xff] }
 0x3b4   : > { %v12251_v41 = vpop.f32.mrf.mxu0  ;;  %v12253_v62 = vpop.f32.mrf.mxu1 }
 0x3b5   : > { %13395 = vst [vmem:[#allocation75_spill] sm:$0xff] %v12251_v41  ;;  %13396 = vst [vmem:[#allocation21_spill] sm:$0xff] %v12253_v62  ;;  %v6450_v62 = vadd.f32 %v6323_v35, %v6144_v31  ;;  %v6453_v41 = vadd.f32 %v9019_v9, %v6147_v29  ;;  %v6150_v31 = vadd.f32 %v12153_v3, %v12065_v48 }
 0x3b6   : > { %v12257_v59 = vpop.f32.mrf.mxu0  ;;  %v12259_v60 = vpop.f32.mrf.mxu1  ;;  %v6454_v9 = vadd.f32 %v12167_v6, %v6148_v13  ;;  %v6151_v48 = vadd.f32 %v12157_v46, %v12071_v24  ;;  %v6455_v29 = vadd.f32 %v12175_v7, %v6149_v45  ;;  %v6154_v24 = vadd.f32 %v12165_v51, %v12077_v42 }
 0x3b7   : > { %13397 = vst [vmem:[#allocation78_spill] sm:$0xff] %v12257_v59  ;;  %13398 = vst [vmem:[#allocation104_spill] sm:$0xff] %v12259_v60  ;;  %v6456_v58 = vadd.f32 %v12163_v39, %v6150_v31  ;;  %v6155_v7 = vadd.f32 %v12173_v54, %v12083_v52  ;;  %v12317_v52 = vld [vmem:[%s12442_s6] ss:$0 sm:$0xff] }
 0x3b8   : > { %v12263_v1 = vpop.f32.mrf.mxu0  ;;  %v9066_v33 = vpop.f32.mrf.mxu1  ;;  %v6460_v50 = vadd.f32 %v12179_v28, %v6154_v24 }
 0x3b9   : > { %13399 = vst [vmem:[#allocation18_spill] sm:$0xff] %v12263_v1  ;;  %v6790_v18 = vadd.f32 %v9066_v33, %v6452_v40  ;;  %v6451_v1 = vadd.f32 %v12159_v49, %v6145_v23  ;;  %v6457_v49 = vadd.f32 %v12171_v44, %v6151_v48  ;;  %v6461_v28 = vadd.f32 %v12187_v11, %v6155_v7 }
 0x3ba   : > { %v6661_v59 = vpop.f32.mrf.mxu1  ;;  %v12275_v61 = vpop.f32.mrf.mxu0  ;;  %v6459_v11 = vadd.f32 %v12191_v21, %v6153_v34  ;;  %v6464_v21 = vadd.f32 %v12195_v5, %v6158_v32  ;;  %v13404_v32 = vld [vmem:[#allocation15_spill] sm:$0xff] }
 0x3bb   : > { %v6829_v4 = vadd.f32 %v12268_v43, %v6790_v18  ;;  %v6788_v2 = vadd.f32 %v6661_v59, %v6450_v62 }
 0x3bc   : > { %v9067_v60 = vpop.f32.mrf.mxu1  ;;  %v12285_v47 = vpop.f32.mrf.mxu0 }
 0x3bd   : > { %6861 = vst [vmem:[#allocation3 + $0x10] sm:$0xff] %v6829_v4  ;;  %v6827_v26 = vadd.f32 %v12268_v43, %v6788_v2  ;;  %v6791_v33 = vadd.f32 %v9067_v60, %v6453_v41 }
 0x3be   : > { %v6664_v40 = vpop.f32.mrf.mxu1  ;;  %v12295_v39 = vpop.f32.mrf.mxu0 }
 0x3bf   : > { %6859 = vst [vmem:[#allocation3] sm:$0xff] %v6827_v26  ;;  %v6830_v59 = vadd.f32 %v12268_v43, %v6791_v33  ;;  %v6789_v62 = vadd.f32 %v6664_v40, %v6451_v1  ;;  %v6458_v26 = vadd.f32 %v12183_v25, %v6152_v56 }
 0x3c0   : > { %v9070_v35 = vpop.f32.mrf.mxu1  ;;  %v12301_v23 = vpop.f32.mrf.mxu0 }
 0x3c1   : > { %6862 = vst [vmem:[#allocation3 + $0x18] sm:$0xff] %v6830_v59  ;;  %v6828_v60 = vadd.f32 %v12268_v43, %v6789_v62  ;;  %v6794_v41 = vadd.f32 %v9070_v35, %v6456_v58 }
 0x3c2   : > { %v6677_v3 = vpop.f32.mrf.mxu1  ;;  %v7143_v13 = vpop.f32.mrf.mxu0 }
 0x3c3   : > { %6860 = vst [vmem:[#allocation3 + $0x8] sm:$0xff] %v6828_v60  ;;  %v6833_v1 = vadd.f32 %v12268_v43, %v6794_v41  ;;  %v6792_v30 = vadd.f32 %v6677_v3, %v6454_v9  ;;  %v7144_v41 = vadd.f32 %v12317_v52, %v7143_v13  ;;  %v6156_v3 = vadd.f32 %v12185_v8, %v12092_v19 }
 0x3c4   : > { %v9071_v6 = vpop.f32.mrf.mxu1  ;;  %v12328_v45 = vpop.f32.mrf.mxu0 }
 0x3c5   : > { %6865 = vst [vmem:[#allocation3 + $0x30] sm:$0xff] %v6833_v1  ;;  %v6831_v46 = vadd.f32 %v12268_v43, %v6792_v30  ;;  %v6795_v18 = vadd.f32 %v9071_v6, %v6457_v49  ;;  %v6159_v30 = vadd.f32 %v12189_v16, %v12095_v55  ;;  %v6157_v55 = vadd.f32 %v12193_v10, %v12098_v20 }
 0x3c6   : > { %v6680_v44 = vpop.f32.mrf.mxu1  ;;  %v7146_v56 = vpop.f32.mrf.mxu0 }
 0x3c7   : > { %6863 = vst [vmem:[#allocation3 + $0x20] sm:$0xff] %v6831_v46  ;;  %v6834_v4 = vadd.f32 %v12268_v43, %v6795_v18  ;;  %v6793_v2 = vadd.f32 %v6680_v44, %v6455_v29  ;;  %v6462_v29 = vadd.f32 %v12199_v15, %v6156_v3  ;;  %v6465_v18 = vadd.f32 %v12203_v57, %v6159_v30  ;;  %v13407_v30 = vld [vmem:[#allocation93_spill] sm:$0xff] }
 0x3c8   : > { %v9074_v42 = vpop.f32.mrf.mxu1  ;;  %v6893_v51 = vld [vmem:[#allocation3 + $0x10] ss:$2 sm:$0xff]  ;;  %v6925_v31 = vld [vmem:[#allocation3 + $0x11] ss:$2 sm:$0xff] }
 0x3c9   : > { %6866 = vst [vmem:[#allocation3 + $0x38] sm:$0xff] %v6834_v4  ;;  %v6832_v33 = vadd.f32 %v12268_v43, %v6793_v2  ;;  %v6798_v40 = vadd.f32 %v9074_v42, %v6460_v50  ;;  %v6955_v35 = vadd.f32 %v6925_v31, %v6893_v51  ;;  %v6463_v42 = vadd.f32 %v12207_v0, %v6157_v55  ;;  %v13410_v55 = vld [vmem:[#allocation37_spill] sm:$0xff] }
 0x3ca   : > { %v6693_v53 = vpop.f32.mrf.mxu1  ;;  %v6891_v54 = vld [vmem:[#allocation3] ss:$2 sm:$0xff]  ;;  %v6923_v58 = vld [vmem:[#allocation3 + $0x1] ss:$2 sm:$0xff]  ;;  %v6162_v51 = vadd.f32 %v12197_v36, %v12101_v12  ;;  %v13401_v36 = vld [vmem:[#allocation96_spill] sm:$0xff] }
 0x3cb   : > { %6864 = vst [vmem:[#allocation3 + $0x28] sm:$0xff] %v6832_v33  ;;  %v6837_v25 = vadd.f32 %v12268_v43, %v6798_v40  ;;  %v6796_v59 = vadd.f32 %v6693_v53, %v6458_v26  ;;  %v6954_v62 = vadd.f32 %v6923_v58, %v6891_v54  ;;  %v7147_v26 = vadd.f32 %v12317_v52, %v7146_v56  ;;  %v13400_v12 = vld [vmem:[#allocation43_spill] sm:$0xff] }
 0x3cc   : > { %v9075_v22 = vpop.f32.mrf.mxu1  ;;  %v6160_v33 = vadd.f32 %v12201_v37, %v12104_v14  ;;  %v6163_v54 = vadd.f32 %v13401_v36, %v13400_v12 }
 0x3cd   : > { %6869 = vst [vmem:[#allocation3 + $0x50] sm:$0xff] %v6837_v25  ;;  %v6835_v9 = vadd.f32 %v12268_v43, %v6796_v59  ;;  %v6799_v48 = vadd.f32 %v9075_v22, %v6461_v28  ;;  %v6970_v60 = vadd.f32 %v6955_v35, %v6954_v62  ;;  %v6468_v28 = vadd.f32 %v12211_v17, %v6162_v51  ;;  %v13402_v59 = vld [vmem:[#allocation10_spill] sm:$0xff]  ;;  %v13403_v17 = vld [vmem:[#allocation40_spill] sm:$0xff]  ;;  %v13405_v22 = vld [vmem:[#allocation113_spill] sm:$0xff] }
 0x3ce   : > { %v6696_v49 = vpop.f32.mrf.mxu1  ;;  %v6466_v62 = vadd.f32 %v13402_v59, %v6160_v33 }
 0x3cf   : > { %6867 = vst [vmem:[#allocation3 + $0x40] sm:$0xff] %v6835_v9  ;;  %v6838_v38 = vadd.f32 %v12268_v43, %v6799_v48  ;;  %v6797_v27 = vadd.f32 %v6696_v49, %v6459_v11  ;;  %v6978_v1 = vmul.f32 0.25, %v6970_v60  ;;  %v6469_v11 = vadd.f32 %v13403_v17, %v6163_v54 }
 0x3d0   : > { %v9078_v19 = vpop.f32.mrf.mxu1  ;;  %v6897_v8 = vld [vmem:[#allocation3 + $0x30] ss:$2 sm:$0xff]  ;;  %v6929_v6 = vld [vmem:[#allocation3 + $0x31] ss:$2 sm:$0xff]  ;;  %v6161_v9 = vadd.f32 %v13405_v22, %v13404_v32 }
 0x3d1   : > { %6870 = vst [vmem:[#allocation3 + $0x58] sm:$0xff] %v6838_v38  ;;  %v6836_v5 = vadd.f32 %v12268_v43, %v6797_v27  ;;  %v7174_v24 = vadd.f32 %v7144_v41, %v6978_v1  ;;  %v6802_v46 = vadd.f32 %v9078_v19, %v6464_v21  ;;  %v6957_v7 = vadd.f32 %v6929_v6, %v6897_v8  ;;  %v13406_v27 = vld [vmem:[#allocation67_spill] sm:$0xff]  ;;  %v13408_v19 = vld [vmem:[#allocation48_spill] sm:$0xff] }
 0x3d2   : > { %v6709_v16 = vpop.f32.mrf.mxu1  ;;  %v6895_v44 = vld [vmem:[#allocation3 + $0x20] ss:$2 sm:$0xff]  ;;  %v6927_v50 = vld [vmem:[#allocation3 + $0x21] ss:$2 sm:$0xff]  ;;  %v6467_v1 = vadd.f32 %v13406_v27, %v6161_v9  ;;  %v6166_v8 = vadd.f32 %v13408_v19, %v13407_v30  ;;  %v13423_v19 = vld [vmem:[#allocation5_spill] sm:$0xff] }
 0x3d3   : > { %6868 = vst [vmem:[#allocation3 + $0x48] sm:$0xff] %v6836_v5  ;;  %7182 = vst [vmem:[%s12337_s12] sm:$0xff] %v7174_v24  ;;  %v6841_v4 = vadd.f32 %v12268_v43, %v6802_v46  ;;  %v6800_v2 = vadd.f32 %v6709_v16, %v6462_v29  ;;  %v6956_v15 = vadd.f32 %v6927_v50, %v6895_v44  ;;  %v13411_v50 = vld [vmem:[#allocation116_spill] sm:$0xff] }
 0x3d4   : > { %v9079_v57 = vpop.f32.mrf.mxu1  ;;  %v7152_v29 = vadd.f32 %v12301_v23, %v12317_v52  ;;  %v6472_v56 = vadd.f32 %v13411_v50, %v6166_v8 }
 0x3d5   : > { %6873 = vst [vmem:[#allocation3 + $0x70] sm:$0xff] %v6841_v4  ;;  %v6839_v20 = vadd.f32 %v12268_v43, %v6800_v2  ;;  %v6803_v10 = vadd.f32 %v9079_v57, %v6465_v18  ;;  %v6971_v31 = vadd.f32 %v6957_v7, %v6956_v15  ;;  %v13409_v18 = vld [vmem:[#allocation105_spill] sm:$0xff]  ;;  %v13412_v7 = vld [vmem:[#allocation7_spill] sm:$0xff] }
 0x3d6   : > { %v6712_v40 = vpop.f32.mrf.mxu1  ;;  %v6164_v16 = vadd.f32 %v13410_v55, %v13409_v18 }
 0x3d7   : > { %6871 = vst [vmem:[#allocation3 + $0x60] sm:$0xff] %v6839_v20  ;;  %v6842_v0 = vadd.f32 %v12268_v43, %v6803_v10  ;;  %v6801_v34 = vadd.f32 %v6712_v40, %v6463_v42  ;;  %v6979_v53 = vmul.f32 0.25, %v6971_v31  ;;  %v13413_v42 = vld [vmem:[#allocation51_spill] sm:$0xff] }
 0x3d8   : > { %v6901_v58 = vld [vmem:[#allocation3 + $0x50] ss:$2 sm:$0xff]  ;;  %v6933_v13 = vld [vmem:[#allocation3 + $0x51] ss:$2 sm:$0xff]  ;;  %v9082_v25 = vpop.f32.mrf.mxu1  ;;  %v6167_v23 = vadd.f32 %v13413_v42, %v13412_v7  ;;  %v13414_v10 = vld [vmem:[#allocation99_spill] sm:$0xff] }
 0x3d9   : > { %6874 = vst [vmem:[#allocation3 + $0x78] sm:$0xff] %v6842_v0  ;;  %v6840_v14 = vadd.f32 %v12268_v43, %v6801_v34  ;;  %v7175_v37 = vadd.f32 %v7147_v26, %v6979_v53  ;;  %v6806_v35 = vadd.f32 %v9082_v25, %v6468_v28  ;;  %v6959_v49 = vadd.f32 %v6933_v13, %v6901_v58  ;;  %v13415_v0 = vld [vmem:[#allocation32_spill] sm:$0xff]  ;;  %v13416_v34 = vld [vmem:[#allocation97_spill] sm:$0xff] }
 0x3da   : > { %v6899_v48 = vld [vmem:[#allocation3 + $0x40] ss:$2 sm:$0xff]  ;;  %v6931_v60 = vld [vmem:[#allocation3 + $0x41] ss:$2 sm:$0xff]  ;;  %v6725_v41 = vpop.f32.mrf.mxu1  ;;  %v6470_v31 = vadd.f32 %v13414_v10, %v6164_v16  ;;  %v6473_v28 = vadd.f32 %v12235_v63, %v6167_v23  ;;  %v6165_v53 = vadd.f32 %v13416_v34, %v13415_v0  ;;  %v7155_v63 = vadd.f32 %v12328_v45, %v12317_v52  ;;  %v13424_v45 = vld [vmem:[#allocation49_spill] sm:$0xff] }
 0x3db   : > { %v6958_v3 = vadd.f32 %v6931_v60, %v6899_v48  ;;  %6872 = vst [vmem:[#allocation3 + $0x68] sm:$0xff] %v6840_v14  ;;  %7183 = vst [vmem:[%s12337_s12 + $0x8] sm:$0xff] %v7175_v37  ;;  %v6845_v21 = vadd.f32 %v12268_v43, %v6806_v35  ;;  %v6804_v38 = vadd.f32 %v6725_v41, %v6466_v62  ;;  %v13417_v62 = vld [vmem:[#allocation101_spill] sm:$0xff]  ;;  %v13418_v37 = vld [vmem:[#allocation62_spill] sm:$0xff] }
 0x3dc   : > { %v9083_v6 = vpop.f32.mrf.mxu1  ;;  %v6471_v14 = vadd.f32 %v13417_v62, %v6165_v53  ;;  %v13419_v35 = vld [vmem:[#allocation12_spill] sm:$0xff]  ;;  %v13420_v48 = vld [vmem:[#allocation94_spill] sm:$0xff]  ;;  %v13421_v60 = vld [vmem:[#allocation63_spill] sm:$0xff]  ;;  %v6171_v8 = vadd.f32 %v13424_v45, %v13423_v19 }
 0x3dd   : > { %v6972_v5 = vadd.f32 %v6959_v49, %v6958_v3  ;;  %6877 = vst [vmem:[#allocation3 + $0x90] sm:$0xff] %v6845_v21  ;;  %v6843_v24 = vadd.f32 %v12268_v43, %v6804_v38  ;;  %v6807_v46 = vadd.f32 %v9083_v6, %v6469_v11  ;;  %v6170_v17 = vadd.f32 %v13419_v35, %v13418_v37  ;;  %v12391_v49 = vpop.f32.mrf.mxu0  ;;  %v13422_v21 = vld [vmem:[#allocation72_spill] sm:$0xff]  ;;  %v13434_v62 = vld [vmem:[#allocation18_spill] sm:$0xff] }
 0x3de   : > { %v6728_v44 = vpop.f32.mrf.mxu1  ;;  %v6168_v41 = vadd.f32 %v13421_v60, %v13420_v48 }
 0x3df   : > { %v6980_v4 = vmul.f32 0.25, %v6972_v5  ;;  %6875 = vst [vmem:[#allocation3 + $0x80] sm:$0xff] %v6843_v24  ;;  %v6846_v2 = vadd.f32 %v12268_v43, %v6807_v46  ;;  %v6805_v15 = vadd.f32 %v6728_v44, %v6467_v1  ;;  %v6476_v38 = vadd.f32 %v13422_v21, %v6170_v17  ;;  %v13425_v24 = vld [vmem:[#allocation16_spill] sm:$0xff]  ;;  %v13426_v44 = vld [vmem:[#allocation75_spill] sm:$0xff]  ;;  %v7159_v23 = vpop.f32.mrf.mxu0 }
 0x3e0   : > { %v6905_v51 = vld [vmem:[#allocation3 + $0x70] ss:$2 sm:$0xff]  ;;  %v6937_v57 = vld [vmem:[#allocation3 + $0x71] ss:$2 sm:$0xff]  ;;  %v9086_v20 = vpop.f32.mrf.mxu1  ;;  %v6474_v46 = vadd.f32 %v13425_v24, %v6168_v41  ;;  %v6477_v50 = vadd.f32 %v13426_v44, %v6171_v8 }
 0x3e1   : > { %v7176_v26 = vadd.f32 %v7152_v29, %v6980_v4  ;;  %6878 = vst [vmem:[#allocation3 + $0x98] sm:$0xff] %v6846_v2  ;;  %v6844_v33 = vadd.f32 %v12268_v43, %v6805_v15  ;;  %v6810_v40 = vadd.f32 %v9086_v20, %v6472_v56  ;;  %v6961_v58 = vadd.f32 %v6937_v57, %v6905_v51  ;;  %v13427_v56 = vld [vmem:[#allocation23_spill] sm:$0xff]  ;;  %v13428_v4 = vld [vmem:[#allocation9_spill] sm:$0xff] }
 0x3e2   : > { %v6903_v12 = vld [vmem:[#allocation3 + $0x60] ss:$2 sm:$0xff]  ;;  %v6935_v36 = vld [vmem:[#allocation3 + $0x61] ss:$2 sm:$0xff]  ;;  %v6741_v54 = vpop.f32.mrf.mxu1  ;;  %v6169_v2 = vadd.f32 %v13428_v4, %v13427_v56 }
 0x3e3   : > { %7184 = vst [vmem:[%s12337_s12 + $0x10] sm:$0xff] %v7176_v26  ;;  %v6960_v13 = vadd.f32 %v6935_v36, %v6903_v12  ;;  %6876 = vst [vmem:[#allocation3 + $0x88] sm:$0xff] %v6844_v33  ;;  %v6849_v25 = vadd.f32 %v12268_v43, %v6810_v40  ;;  %v6808_v59 = vadd.f32 %v6741_v54, %v6470_v31  ;;  %v13429_v31 = vld [vmem:[#allocation78_spill] sm:$0xff]  ;;  %v13430_v33 = vld [vmem:[#allocation95_spill] sm:$0xff] }
 0x3e4   : > { %v9087_v11 = vpop.f32.mrf.mxu1  ;;  %v6475_v26 = vadd.f32 %v13429_v31, %v6169_v2  ;;  %v13431_v40 = vld [vmem:[#allocation103_spill] sm:$0xff]  ;;  %v7160_v36 = vadd.f32 %v12317_v52, %v7159_v23  ;;  %v13432_v54 = vld [vmem:[#allocation110_spill] sm:$0xff] }
 0x3e5   : > { %v6973_v32 = vadd.f32 %v6961_v58, %v6960_v13  ;;  %6881 = vst [vmem:[#allocation3 + $0xb0] sm:$0xff] %v6849_v25  ;;  %v6847_v22 = vadd.f32 %v12268_v43, %v6808_v59  ;;  %v6811_v9 = vadd.f32 %v9087_v11, %v6473_v28  ;;  %v6174_v28 = vadd.f32 %v13431_v40, %v13430_v33  ;;  %v13433_v58 = vld [vmem:[#allocation61_spill] sm:$0xff]  ;;  %v9105_v59 = vpop.f32.mrf.mxu0  ;;  %v13435_v11 = vld [vmem:[#allocation50_spill] sm:$0xff] }
 0x3e6   : > { %v6744_v3 = vpop.f32.mrf.mxu1  ;;  %v6172_v13 = vadd.f32 %v13433_v58, %v13432_v54 }
 0x3e7   : > { %v6981_v27 = vmul.f32 0.25, %v6973_v32  ;;  %6879 = vst [vmem:[#allocation3 + $0xa0] sm:$0xff] %v6847_v22  ;;  %v6850_v1 = vadd.f32 %v12268_v43, %v6811_v9  ;;  %v6809_v30 = vadd.f32 %v6744_v3, %v6471_v14  ;;  %v6480_v14 = vadd.f32 %v13434_v62, %v6174_v28 }
 0x3e8   : > { %v9090_v6 = vpop.f32.mrf.mxu1  ;;  %v6909_v29 = vld [vmem:[#allocation3 + $0x90] ss:$2 sm:$0xff]  ;;  %v6941_v5 = vld [vmem:[#allocation3 + $0x91] ss:$2 sm:$0xff]  ;;  %v6478_v60 = vadd.f32 %v12275_v61, %v6172_v13 }
 0x3e9   : > { %v7177_v18 = vadd.f32 %v7155_v63, %v6981_v27  ;;  %6882 = vst [vmem:[#allocation3 + $0xb8] sm:$0xff] %v6850_v1  ;;  %v6848_v55 = vadd.f32 %v12268_v43, %v6809_v30  ;;  %v6814_v16 = vadd.f32 %v9090_v6, %v6476_v38  ;;  %v6963_v10 = vadd.f32 %v6941_v5, %v6909_v29  ;;  %v13436_v63 = vld [vmem:[#allocation21_spill] sm:$0xff]  ;;  %v13437_v38 = vld [vmem:[#allocation64_spill] sm:$0xff]  ;;  %v7162_v6 = vpop.f32.mrf.mxu0 }
 0x3ea   : > { %v6757_v15 = vpop.f32.mrf.mxu1  ;;  %v6907_v7 = vld [vmem:[#allocation3 + $0x80] ss:$2 sm:$0xff]  ;;  %v6939_v42 = vld [vmem:[#allocation3 + $0x81] ss:$2 sm:$0xff]  ;;  %v6175_v32 = vadd.f32 %v13436_v63, %v13435_v11  ;;  %v13438_v27 = vld [vmem:[#allocation104_spill] sm:$0xff] }
 0x3eb   : > { %7185 = vst [vmem:[%s12337_s12 + $0x18] sm:$0xff] %v7177_v18  ;;  %6880 = vst [vmem:[#allocation3 + $0xa8] sm:$0xff] %v6848_v55  ;;  %v6853_v51 = vadd.f32 %v12268_v43, %v6814_v16  ;;  %v6812_v57 = vadd.f32 %v6757_v15, %v6474_v46  ;;  %v6962_v20 = vadd.f32 %v6939_v42, %v6907_v7 }
 0x3ec   : > { %v9091_v0 = vpop.f32.mrf.mxu1  ;;  %v6173_v1 = vadd.f32 %v13438_v27, %v13437_v38  ;;  %v6481_v30 = vadd.f32 %v12285_v47, %v6175_v32  ;;  %v7163_v47 = vadd.f32 %v12317_v52, %v7162_v6 }
 0x3ed   : > { %6885 = vst [vmem:[#allocation3 + $0xd0] sm:$0xff] %v6853_v51  ;;  %v6851_v34 = vadd.f32 %v12268_v43, %v6812_v57  ;;  %v6815_v53 = vadd.f32 %v9091_v0, %v6477_v50  ;;  %v6974_v12 = vadd.f32 %v6963_v10, %v6962_v20  ;;  %v7168_v10 = vadd.f32 %v12391_v49, %v12317_v52 }
 0x3ee   : > { %v6760_v25 = vpop.f32.mrf.mxu1  ;;  %v6479_v46 = vadd.f32 %v12295_v39, %v6173_v1 }
 0x3ef   : > { %6883 = vst [vmem:[#allocation3 + $0xc0] sm:$0xff] %v6851_v34  ;;  %v6854_v37 = vadd.f32 %v12268_v43, %v6815_v53  ;;  %v6813_v35 = vadd.f32 %v6760_v25, %v6475_v26  ;;  %v6982_v17 = vmul.f32 0.25, %v6974_v12 }
 0x3f0   : > { %v9094_v22 = vpop.f32.mrf.mxu1  ;;  %v6913_v9 = vld [vmem:[#allocation3 + $0xb0] ss:$2 sm:$0xff]  ;;  %v6945_v48 = vld [vmem:[#allocation3 + $0xb1] ss:$2 sm:$0xff] }
 0x3f1   : > { %6886 = vst [vmem:[#allocation3 + $0xd8] sm:$0xff] %v6854_v37  ;;  %v6852_v41 = vadd.f32 %v12268_v43, %v6813_v35  ;;  %v7178_v3 = vadd.f32 %v7160_v36, %v6982_v17  ;;  %v6818_v21 = vadd.f32 %v9094_v22, %v6480_v14  ;;  %v6965_v24 = vadd.f32 %v6945_v48, %v6913_v9 }
 0x3f2   : > { %v6773_v19 = vpop.f32.mrf.mxu1  ;;  %v6911_v45 = vld [vmem:[#allocation3 + $0xa0] ss:$2 sm:$0xff]  ;;  %v6943_v8 = vld [vmem:[#allocation3 + $0xa1] ss:$2 sm:$0xff]  ;;  %v7171_v36 = vadd.f32 %v9105_v59, %v12317_v52 }
 0x3f3   : > { %6884 = vst [vmem:[#allocation3 + $0xc8] sm:$0xff] %v6852_v41  ;;  %7186 = vst [vmem:[%s12337_s12 + $0x20] sm:$0xff] %v7178_v3  ;;  %v6857_v29 = vadd.f32 %v12268_v43, %v6818_v21  ;;  %v6816_v5 = vadd.f32 %v6773_v19, %v6478_v60  ;;  %v6964_v61 = vadd.f32 %v6943_v8, %v6911_v45 }
 0x3f4   : > { %v9095_v18 = vpop.f32.mrf.mxu1 }
 0x3f5   : > { %6889 = vst [vmem:[#allocation3 + $0xf0] sm:$0xff] %v6857_v29  ;;  %v6855_v55 = vadd.f32 %v12268_v43, %v6816_v5  ;;  %v6819_v16 = vadd.f32 %v9095_v18, %v6481_v30  ;;  %v6975_v44 = vadd.f32 %v6965_v24, %v6964_v61 }
 0x3f6   : > { %v6776_v50 = vpop.f32.mrf.mxu1 }
 0x3f7   : > { %6887 = vst [vmem:[#allocation3 + $0xe0] sm:$0xff] %v6855_v55  ;;  %v6858_v56 = vadd.f32 %v12268_v43, %v6819_v16  ;;  %v6817_v4 = vadd.f32 %v6776_v50, %v6479_v46  ;;  %v6983_v2 = vmul.f32 0.25, %v6975_v44 }
 0x3f8   : > { %v6917_v15 = vld [vmem:[#allocation3 + $0xd0] ss:$2 sm:$0xff]  ;;  %v6949_v7 = vld [vmem:[#allocation3 + $0xd1] ss:$2 sm:$0xff] }
 0x3f9   : > { %6890 = vst [vmem:[#allocation3 + $0xf8] sm:$0xff] %v6858_v56  ;;  %v6856_v39 = vadd.f32 %v12268_v43, %v6817_v4  ;;  %v7179_v42 = vadd.f32 %v7163_v47, %v6983_v2  ;;  %v6967_v57 = vadd.f32 %v6949_v7, %v6917_v15 }
 0x3fa   : > { %v6915_v23 = vld [vmem:[#allocation3 + $0xc0] ss:$2 sm:$0xff]  ;;  %v6947_v51 = vld [vmem:[#allocation3 + $0xc1] ss:$2 sm:$0xff] }
 0x3fb   : > { %v6966_v20 = vadd.f32 %v6947_v51, %v6915_v23  ;;  %6888 = vst [vmem:[#allocation3 + $0xe8] sm:$0xff] %v6856_v39  ;;  %7187 = vst [vmem:[%s12337_s12 + $0x28] sm:$0xff] %v7179_v42 }
 0x3fd   : > { %v6976_v31 = vadd.f32 %v6967_v57, %v6966_v20 }
 0x3ff   : > { %v6984_v26 = vmul.f32 0.25, %v6976_v31 }
 0x400   : > { %v6921_v33 = vld [vmem:[#allocation3 + $0xf0] ss:$2 sm:$0xff]  ;;  %v6953_v40 = vld [vmem:[#allocation3 + $0xf1] ss:$2 sm:$0xff] }
 0x401   : > { %v7180_v28 = vadd.f32 %v7168_v10, %v6984_v26  ;;  %v6969_v43 = vadd.f32 %v6953_v40, %v6921_v33 }
 0x402   : > { %v6919_v0 = vld [vmem:[#allocation3 + $0xe0] ss:$2 sm:$0xff]  ;;  %v6951_v34 = vld [vmem:[#allocation3 + $0xe1] ss:$2 sm:$0xff] }
 0x403   : > { %7188 = vst [vmem:[%s12337_s12 + $0x30] sm:$0xff] %v7180_v28  ;;  %v6968_v53 = vadd.f32 %v6951_v34, %v6919_v0 }
 0x405   : > { %v6977_v12 = vadd.f32 %v6969_v43, %v6968_v53 }
 0x407   : > { %v6985_v54 = vmul.f32 0.25, %v6977_v12 }
 0x409   : > { %v7181_v58 = vadd.f32 %v7171_v36, %v6985_v54 }
 0x40b   : > { %7189 = vst [vmem:[%s12337_s12 + $0x38] sm:$0xff] %v7181_v58 }
 0x40c PF: > { %s17_s24 = sadd.s32 1, %s9212_s24  }
 0x40d   : > { %p14_p4 = scmp.ge.s32.totalorder %s17_s24, 4  }
 0x40f   :  { %16 = sbr.rel (!%p14_p4) target bundleno = 1 (0x1), region = 157 }

</bundles_post_ra>
